<compile_context>
chip_gen: v7x
topology: tpu7x:2x2x1
jax: 0.10.0
libtpu: 0.0.40
codegen_flags: <defaults>
</compile_context>

<pallas_src>
import jax
import jax.numpy as jnp
from jax.experimental import pallas as pl
from jax.experimental.pallas import tpu as pltpu


HIDDEN = 1000        # PyTorch model hidden dim
HIDDEN_PAD = 1024    # multiple of 128 -> dense lanes / full MXU tiles
OUT_PAD = 128        # lane-dense output head; only column 0 is the real logit
MAX_TB = 512         # large-batch tile (amortizes ~0.35 us per-grid-step overhead)


def _round_up(x, m):
    return (x + m - 1) // m * m


def _pad2(a, rows, cols):
    r, c = a.shape
    return jnp.pad(a, ((0, rows - r), (0, cols - c)))


def dann_kernel(x_ref, w1_ref, b1_ref, w2_ref, b2_ref, w3_ref, b3_ref,
                w4_ref, b4_ref, o_ref):
    # x arrives f32; cast to bf16 in-kernel (VPU slots have slack, avoids a
    # separate wrapper-side pass over x).
    x = x_ref[...].astype(jnp.bfloat16)
    # Layer 1: (tb, Dp)bf16 @ (Dp, Hp)bf16 -> f32 acc, +b1 (f32), tanh (EUP)
    h = jnp.tanh(
        jnp.dot(x, w1_ref[...], preferred_element_type=jnp.float32)
        + b1_ref[...])
    # Layer 2
    h = jnp.tanh(
        jnp.dot(h.astype(jnp.bfloat16), w2_ref[...],
                preferred_element_type=jnp.float32) + b2_ref[...])
    # Layer 3
    h = jnp.tanh(
        jnp.dot(h.astype(jnp.bfloat16), w3_ref[...],
                preferred_element_type=jnp.float32) + b3_ref[...])
    # Output head: lane-padded to OUT_PAD columns (padded cols sliced off outside)
    z = (jnp.dot(h.astype(jnp.bfloat16), w4_ref[...],
                 preferred_element_type=jnp.float32) + b4_ref[...])
    o_ref[...] = jax.nn.sigmoid(z).astype(o_ref.dtype)


def _batch_tiling(B):
    """Choose (tb, B_pad, num_tiles). tb is always a multiple of 16."""
    if B <= 128:
        # Tiny batch: one grid step.
        tb = _round_up(B, 16)
        return tb, tb, 1
    if B <= 2 * MAX_TB:
        # Mid-size batch: exactly 2 steps so v7x can shard across both TCs.
        tb = _round_up(pl.cdiv(B, 2), 16)
        return tb, 2 * tb, 2
    # Large batch: MAX_TB-row tiles on a "parallel" grid axis.
    tb = MAX_TB
    B_pad = _round_up(B, tb)
    return tb, B_pad, B_pad // tb


def dann_forward(x, params):
    """x: (B, input_dim) f32. params: dict of W1..W4 (in,out) and b1..b4 (1,out).
    Returns (B, 1) f32 matching sigmoid(MLP(x))."""
    B, D = x.shape
    D_pad = _round_up(D, 128)          # dense lanes / full MXU contraction depth
    tb, B_pad, num_tiles = _batch_tiling(B)
    grid = (num_tiles,)

    # --- pad (exactly); weights cast to bf16, biases stay f32, x stays f32.
    xp = jnp.pad(x, ((0, B_pad - B), (0, D_pad - D)))
    w1 = _pad2(params["W1"], D_pad, HIDDEN_PAD).astype(jnp.bfloat16)
    w2 = _pad2(params["W2"], HIDDEN_PAD, HIDDEN_PAD).astype(jnp.bfloat16)
    w3 = _pad2(params["W3"], HIDDEN_PAD, HIDDEN_PAD).astype(jnp.bfloat16)
    w4 = _pad2(params["W4"], HIDDEN_PAD, OUT_PAD).astype(jnp.bfloat16)
    b1 = _pad2(params["b1"], 1, HIDDEN_PAD).astype(jnp.float32)
    b2 = _pad2(params["b2"], 1, HIDDEN_PAD).astype(jnp.float32)
    b3 = _pad2(params["b3"], 1, HIDDEN_PAD).astype(jnp.float32)
    b4 = _pad2(params["b4"], 1, OUT_PAD).astype(jnp.float32)

    def const_spec(shape):
        # Constant index_map -> block fetched once, VMEM-resident across grid.
        return pl.BlockSpec(shape, lambda i: (0, 0))

    out = pl.pallas_call(
        dann_kernel,
        out_shape=jax.ShapeDtypeStruct((B_pad, OUT_PAD), jnp.bfloat16),
        grid_spec=pltpu.PrefetchScalarGridSpec(
            num_scalar_prefetch=0,
            grid=grid,
            in_specs=[
                pl.BlockSpec((tb, D_pad), lambda i: (i, 0)),   # x tile (f32)
                const_spec((D_pad, HIDDEN_PAD)),               # W1
                const_spec((1, HIDDEN_PAD)),                   # b1
                const_spec((HIDDEN_PAD, HIDDEN_PAD)),          # W2
                const_spec((1, HIDDEN_PAD)),                   # b2
                const_spec((HIDDEN_PAD, HIDDEN_PAD)),          # W3
                const_spec((1, HIDDEN_PAD)),                   # b3
                const_spec((HIDDEN_PAD, OUT_PAD)),             # W4
                const_spec((1, OUT_PAD)),                      # b4
            ],
            out_specs=pl.BlockSpec((tb, OUT_PAD), lambda i: (i, 0)),
        ),
        compiler_params=pltpu.CompilerParams(
            dimension_semantics=("parallel",),
            vmem_limit_bytes=48 << 20,
        ),
    )(xp, w1, b1, w2, b2, w3, b3, w4, b4)

    return out[:B, :1].astype(jnp.float32)


def init_params(key, input_dim):
    """Deterministic init mimicking PyTorch nn.Linear (uniform +-1/sqrt(fan_in)).
    Weights stored as (in_features, out_features) = transpose of nn.Linear.weight."""
    dims = [(input_dim, HIDDEN), (HIDDEN, HIDDEN), (HIDDEN, HIDDEN), (HIDDEN, 1)]
    params = {}
    for n, (fan_in, fan_out) in enumerate(dims, start=1):
        key, kw, kb = jax.random.split(key, 3)
        bound = 1.0 / (fan_in ** 0.5)
        params[f"W{n}"] = jax.random.uniform(
            kw, (fan_in, fan_out), jnp.float32, -bound, bound)
        params[f"b{n}"] = jax.random.uniform(
            kb, (1, fan_out), jnp.float32, -bound, bound)
    return params


def reference_forward(x, params):
    h = jnp.tanh(x @ params["W1"] + params["b1"])
    h = jnp.tanh(h @ params["W2"] + params["b2"])
    h = jnp.tanh(h @ params["W3"] + params["b3"])
    return jax.nn.sigmoid(h @ params["W4"] + params["b4"])


if __name__ == "__main__":
    key = jax.random.PRNGKey(0)
    k_x, k_p = jax.random.split(key)

    batch, input_dim = 16, 32
    x = jax.random.normal(k_x, (batch, input_dim), jnp.float32)
    params = init_params(k_p, input_dim)

    out = jax.block_until_ready(dann_forward(x, params))
    ref = reference_forward(x, params)

    assert out.shape == (batch, 1), out.shape
    max_err = float(jnp.max(jnp.abs(out - ref)))
    # bf16 matmul operands + bf16 output store vs. f32 reference -> loose tol.
    assert max_err < 2e-2, f"max err {max_err}"

    print("KERNEL_OK")
</pallas_src>

<mosaic_0001>
module attributes {stable_mosaic.version = 11 : i64} {
  func.func @dann_kernel(%arg0: i32, %arg1: memref<16x128xf32, #tpu.memory_space<vmem>>, %arg2: memref<128x1024xbf16, #tpu.memory_space<vmem>>, %arg3: memref<1x1024xf32, #tpu.memory_space<vmem>>, %arg4: memref<1024x1024xbf16, #tpu.memory_space<vmem>>, %arg5: memref<1x1024xf32, #tpu.memory_space<vmem>>, %arg6: memref<1024x1024xbf16, #tpu.memory_space<vmem>>, %arg7: memref<1x1024xf32, #tpu.memory_space<vmem>>, %arg8: memref<1024x128xbf16, #tpu.memory_space<vmem>>, %arg9: memref<1x128xf32, #tpu.memory_space<vmem>>, %arg10: memref<16x128xbf16, #tpu.memory_space<vmem>>) attributes {dimension_semantics = [#tpu.dimension_semantics<parallel>], iteration_bounds = array<i64: 1>, scalar_prefetch = 0 : i64, scratch_operands = 0 : i64, tpu.core_type = #tpu.core_type<tc>, window_params = [{transform_indices = @transform_0, window_bounds = array<i64: 16, 128>}, {pipeline_mode = #tpu.pipeline_mode<synchronous>, transform_indices = @transform_1, window_bounds = array<i64: 128, 1024>}, {pipeline_mode = #tpu.pipeline_mode<synchronous>, transform_indices = @transform_2, window_bounds = array<i64: 1, 1024>}, {pipeline_mode = #tpu.pipeline_mode<synchronous>, transform_indices = @transform_3, window_bounds = array<i64: 1024, 1024>}, {pipeline_mode = #tpu.pipeline_mode<synchronous>, transform_indices = @transform_4, window_bounds = array<i64: 1, 1024>}, {pipeline_mode = #tpu.pipeline_mode<synchronous>, transform_indices = @transform_5, window_bounds = array<i64: 1024, 1024>}, {pipeline_mode = #tpu.pipeline_mode<synchronous>, transform_indices = @transform_6, window_bounds = array<i64: 1, 1024>}, {pipeline_mode = #tpu.pipeline_mode<synchronous>, transform_indices = @transform_7, window_bounds = array<i64: 1024, 128>}, {pipeline_mode = #tpu.pipeline_mode<synchronous>, transform_indices = @transform_8, window_bounds = array<i64: 1, 128>}, {transform_indices = @transform_9, window_bounds = array<i64: 16, 128>}]} {
    %c0 = arith.constant 0 : index
    %c0_0 = arith.constant 0 : index
    %0 = vector.load %arg1[%c0, %c0_0] : memref<16x128xf32, #tpu.memory_space<vmem>>, vector<16x128xf32>
    %1 = arith.truncf %0 : vector<16x128xf32> to vector<16x128xbf16>
    %c0_1 = arith.constant 0 : index
    %c0_2 = arith.constant 0 : index
    %2 = vector.load %arg2[%c0_1, %c0_2] : memref<128x1024xbf16, #tpu.memory_space<vmem>>, vector<128x1024xbf16>
    %cst = arith.constant dense<0.000000e+00> : vector<16x1024xf32>
    %3 = tpu.matmul %1, %2, %cst {dimension_numbers = #tpu.dot_dimension_numbers<[1], [0], [0], [1], [0, 0, 1, 1], [], []>} : vector<16x128xbf16>, vector<128x1024xbf16>, vector<16x1024xf32> -> vector<16x1024xf32>
    %c0_3 = arith.constant 0 : index
    %c0_4 = arith.constant 0 : index
    %4 = vector.load %arg3[%c0_3, %c0_4] : memref<1x1024xf32, #tpu.memory_space<vmem>>, vector<1x1024xf32>
    %5 = vector.broadcast %4 : vector<1x1024xf32> to vector<16x1024xf32>
    %6 = arith.addf %3, %5 : vector<16x1024xf32>
    %7 = math.tanh %6 : vector<16x1024xf32>
    %8 = arith.truncf %7 : vector<16x1024xf32> to vector<16x1024xbf16>
    %c0_5 = arith.constant 0 : index
    %c0_6 = arith.constant 0 : index
    %9 = vector.load %arg4[%c0_5, %c0_6] : memref<1024x1024xbf16, #tpu.memory_space<vmem>>, vector<1024x1024xbf16>
    %cst_7 = arith.constant dense<0.000000e+00> : vector<16x1024xf32>
    %10 = tpu.matmul %8, %9, %cst_7 {dimension_numbers = #tpu.dot_dimension_numbers<[1], [0], [0], [1], [0, 0, 1, 1], [], []>} : vector<16x1024xbf16>, vector<1024x1024xbf16>, vector<16x1024xf32> -> vector<16x1024xf32>
    %c0_8 = arith.constant 0 : index
    %c0_9 = arith.constant 0 : index
    %11 = vector.load %arg5[%c0_8, %c0_9] : memref<1x1024xf32, #tpu.memory_space<vmem>>, vector<1x1024xf32>
    %12 = vector.broadcast %11 : vector<1x1024xf32> to vector<16x1024xf32>
    %13 = arith.addf %10, %12 : vector<16x1024xf32>
    %14 = math.tanh %13 : vector<16x1024xf32>
    %15 = arith.truncf %14 : vector<16x1024xf32> to vector<16x1024xbf16>
    %c0_10 = arith.constant 0 : index
    %c0_11 = arith.constant 0 : index
    %16 = vector.load %arg6[%c0_10, %c0_11] : memref<1024x1024xbf16, #tpu.memory_space<vmem>>, vector<1024x1024xbf16>
    %cst_12 = arith.constant dense<0.000000e+00> : vector<16x1024xf32>
    %17 = tpu.matmul %15, %16, %cst_12 {dimension_numbers = #tpu.dot_dimension_numbers<[1], [0], [0], [1], [0, 0, 1, 1], [], []>} : vector<16x1024xbf16>, vector<1024x1024xbf16>, vector<16x1024xf32> -> vector<16x1024xf32>
    %c0_13 = arith.constant 0 : index
    %c0_14 = arith.constant 0 : index
    %18 = vector.load %arg7[%c0_13, %c0_14] : memref<1x1024xf32, #tpu.memory_space<vmem>>, vector<1x1024xf32>
    %19 = vector.broadcast %18 : vector<1x1024xf32> to vector<16x1024xf32>
    %20 = arith.addf %17, %19 : vector<16x1024xf32>
    %21 = math.tanh %20 : vector<16x1024xf32>
    %22 = arith.truncf %21 : vector<16x1024xf32> to vector<16x1024xbf16>
    %c0_15 = arith.constant 0 : index
    %c0_16 = arith.constant 0 : index
    %23 = vector.load %arg8[%c0_15, %c0_16] : memref<1024x128xbf16, #tpu.memory_space<vmem>>, vector<1024x128xbf16>
    %cst_17 = arith.constant dense<0.000000e+00> : vector<16x128xf32>
    %24 = tpu.matmul %22, %23, %cst_17 {dimension_numbers = #tpu.dot_dimension_numbers<[1], [0], [0], [1], [0, 0, 1, 1], [], []>} : vector<16x1024xbf16>, vector<1024x128xbf16>, vector<16x128xf32> -> vector<16x128xf32>
    %c0_18 = arith.constant 0 : index
    %c0_19 = arith.constant 0 : index
    %25 = vector.load %arg9[%c0_18, %c0_19] : memref<1x128xf32, #tpu.memory_space<vmem>>, vector<1x128xf32>
    %26 = vector.broadcast %25 : vector<1x128xf32> to vector<16x128xf32>
    %27 = arith.addf %24, %26 : vector<16x128xf32>
    %28 = arith.negf %27 : vector<16x128xf32>
    %29 = math.exp %28 : vector<16x128xf32>
    %cst_20 = arith.constant 1.000000e+00 : f32
    %30 = vector.broadcast %cst_20 : f32 to vector<16x128xf32>
    %31 = arith.addf %30, %29 : vector<16x128xf32>
    %32 = arith.divf %30, %31 : vector<16x128xf32>
    %33 = arith.truncf %32 : vector<16x128xf32> to vector<16x128xbf16>
    %c0_21 = arith.constant 0 : index
    %c0_22 = arith.constant 0 : index
    %34 = vector.load %arg10[%c0_21, %c0_22] : memref<16x128xbf16, #tpu.memory_space<vmem>>, vector<16x128xbf16>
    tpu.vector_store %arg10[%c0_21, %c0_22], %33 {strides = array<i32>} : memref<16x128xbf16, #tpu.memory_space<vmem>>, vector<16x128xbf16>,
    return
  }
  func.func @transform_0(%arg0: i32) -> (i32, i32) {
    %c0_i32 = arith.constant 0 : i32
    %c0_i32_0 = arith.constant 0 : i32
    return %arg0, %c0_i32 : i32, i32
  }
  func.func @transform_1(%arg0: i32) -> (i32, i32) {
    %c0_i32 = arith.constant 0 : i32
    %c0_i32_0 = arith.constant 0 : i32
    %c0_i32_1 = arith.constant 0 : i32
    return %c0_i32, %c0_i32_0 : i32, i32
  }
  func.func @transform_2(%arg0: i32) -> (i32, i32) {
    %c0_i32 = arith.constant 0 : i32
    %c0_i32_0 = arith.constant 0 : i32
    %c0_i32_1 = arith.constant 0 : i32
    return %c0_i32, %c0_i32_0 : i32, i32
  }
  func.func @transform_3(%arg0: i32) -> (i32, i32) {
    %c0_i32 = arith.constant 0 : i32
    %c0_i32_0 = arith.constant 0 : i32
    %c0_i32_1 = arith.constant 0 : i32
    return %c0_i32, %c0_i32_0 : i32, i32
  }
  func.func @transform_4(%arg0: i32) -> (i32, i32) {
    %c0_i32 = arith.constant 0 : i32
    %c0_i32_0 = arith.constant 0 : i32
    %c0_i32_1 = arith.constant 0 : i32
    return %c0_i32, %c0_i32_0 : i32, i32
  }
  func.func @transform_5(%arg0: i32) -> (i32, i32) {
    %c0_i32 = arith.constant 0 : i32
    %c0_i32_0 = arith.constant 0 : i32
    %c0_i32_1 = arith.constant 0 : i32
    return %c0_i32, %c0_i32_0 : i32, i32
  }
  func.func @transform_6(%arg0: i32) -> (i32, i32) {
    %c0_i32 = arith.constant 0 : i32
    %c0_i32_0 = arith.constant 0 : i32
    %c0_i32_1 = arith.constant 0 : i32
    return %c0_i32, %c0_i32_0 : i32, i32
  }
  func.func @transform_7(%arg0: i32) -> (i32, i32) {
    %c0_i32 = arith.constant 0 : i32
    %c0_i32_0 = arith.constant 0 : i32
    %c0_i32_1 = arith.constant 0 : i32
    return %c0_i32, %c0_i32_0 : i32, i32
  }
  func.func @transform_8(%arg0: i32) -> (i32, i32) {
    %c0_i32 = arith.constant 0 : i32
    %c0_i32_0 = arith.constant 0 : i32
    %c0_i32_1 = arith.constant 0 : i32
    return %c0_i32, %c0_i32_0 : i32, i32
  }
  func.func @transform_9(%arg0: i32) -> (i32, i32) {
    %c0_i32 = arith.constant 0 : i32
    %c0_i32_0 = arith.constant 0 : i32
    return %arg0, %c0_i32 : i32, i32
  }
}

</mosaic_0001>

<bundles_post_ra>
// kernel: tpu_custom_call.1
= control target key start
LH: loop header
LB: loop body
LE: loop exit
PB: predicated region body
PF: predicated region fallthrough
CT: control target
= control target key end

     0   :  { %14 = vsyncpa [#allocation3], 0  ;;  %s11395_s0 = inlined_call_operand.hbm [shape: f32[16,128], index: 0, kind: input, shape index: {}]   ;;  %s11396_s1 = inlined_call_operand.hbm [shape: bf16[128,1024], index: 1, kind: input, shape index: {}]   ;;  %s11397_s2 = inlined_call_operand.hbm [shape: f32[1,1024], index: 2, kind: input, shape index: {}]   ;;  %s11398_s3 = inlined_call_operand.hbm [shape: bf16[1024,1024], index: 3, kind: input, shape index: {}]   ;;  %s11399_s4 = inlined_call_operand.hbm [shape: f32[1,1024], index: 4, kind: input, shape index: {}]   ;;  %s11400_s5 = inlined_call_operand.hbm [shape: bf16[1024,1024], index: 5, kind: input, shape index: {}]   ;;  %s11401_s6 = inlined_call_operand.hbm [shape: f32[1,1024], index: 6, kind: input, shape index: {}]   ;;  %s11402_s7 = inlined_call_operand.hbm [shape: bf16[1024,128], index: 7, kind: input, shape index: {}]   ;;  %s11403_s8 = inlined_call_operand.hbm [shape: f32[1,128], index: 8, kind: input, shape index: {}]   ;;  %s11404_s9 = inlined_call_operand.hbm [shape: bf16[16,128], index: 9, kind: output, shape index: {}]  }
   0x1   :  { %15 = vsyncpa [#allocation6], 0 }
   0x2   :  { %16 = vsyncpa [#allocation9], 0 }
   0x3   :  { %17 = vsyncpa [#allocation12], 0 }
   0x4   :  { %18 = vsyncpa [#allocation15], 0 }
   0x5   :  { %19 = vsyncpa [#allocation4], 0  ;;  %s10949_s30 = smov [#allocation5]   ;;  %s10717_s13 = scalar_lea.hbm %s11396_s1, 8192 }
   0x6   :  { %s37_s10 = sshll.u32 %s10949_s30, 4  ;;  %p10718_p0 = scmp.ne.s32.totalorder %s11396_s1, %s10717_s13  ;;  %s38_s10 = int_to_ptr.vmem [resolvable:$true] %s37_s10 }
   0x7   :  { %p10721_p1 = scmp.lt.u32.totalorder %s10717_s13, %s11396_s1 }
   0x9   :  { %p10723_p2 = pnand %p10721_p1, %p10718_p0 }
   0xb   :  { %10726 = shalt.err (!%p10723_p2)
}
   0xc   :  { %s10727_s18 = scalar_lea.vmem %s38_s10, 8192  ;;  %p10732_p4 = scmp.lt.s32.totalorder %s38_s10, %s38_s10 }
   0xd   :  { %p10728_p3 = scmp.ne.s32.totalorder %s38_s10, %s10727_s18  ;;  %p10733_p5 = scmp.lt.s32.totalorder %s10727_s18, %s10727_s18 }
   0xf   :  { %p10734_p6 = por %p10733_p5, %p10732_p4 }
  0x11   :  { %p10735_p7 = pnand %p10734_p6, %p10728_p3 }
  0x13   :  { %10738 = shalt.err (!%p10735_p7)
}
  0x14   :  { %s10950_s19 = smov 512   ;;  %s10951_s20 = smov 32  }
  0x15   :  { %43 = dma.hbm_to_vmem [thread:$0]  %s11396_s1, 8192, %s38_s10, [#allocation6], %s10950_s19, %s10950_s19, %s10951_s20  }
  0x16   :  { %s10952_s23 = smov [#allocation8]   ;;  %s10953_s25 = smov [#allocation11]  }
  0x17   :  { %s59_s24 = sshll.u32 %s10952_s23, 4  ;;  %s81_s26 = sshll.u32 %s10953_s25, 4  ;;  %s60_s24 = int_to_ptr.vmem [resolvable:$true] %s59_s24  ;;  %s82_s26 = int_to_ptr.vmem [resolvable:$true] %s81_s26 }
  0x18   :  { %s10739_s29 = scalar_lea.hbm %s11398_s3, 65536 }
  0x19   :  { %p10740_p8 = scmp.ne.s32.totalorder %s11398_s3, %s10739_s29  ;;  %p10743_p9 = scmp.lt.u32.totalorder %s10739_s29, %s11398_s3 }
  0x1b   :  { %p10745_p10 = pnand %p10743_p9, %p10740_p8 }
  0x1d   :  { %10748 = shalt.err (!%p10745_p10)
}
  0x1e   :  { %s10749_s1 = scalar_lea.vmem %s60_s24, 65536  ;;  %p10754_p12 = scmp.lt.s32.totalorder %s60_s24, %s60_s24 }
  0x1f   :  { %p10750_p11 = scmp.ne.s32.totalorder %s60_s24, %s10749_s1  ;;  %p10755_p13 = scmp.lt.s32.totalorder %s10749_s1, %s10749_s1 }
  0x21   :  { %p10756_p0 = por %p10755_p13, %p10754_p12 }
  0x23   :  { %p10757_p1 = pnand %p10756_p0, %p10750_p11 }
  0x25   :  { %10760 = shalt.err (!%p10757_p1)
}
  0x26   :  { %65 = dma.hbm_to_vmem [thread:$0]  %s11398_s3, 65536, %s60_s24, [#allocation9], %s10950_s19, %s10950_s19, %s10951_s20  }
  0x27   :  { %s10761_s17 = scalar_lea.hbm %s11400_s5, 65536 }
  0x28   :  { %p10762_p2 = scmp.ne.s32.totalorder %s11400_s5, %s10761_s17  ;;  %p10765_p3 = scmp.lt.u32.totalorder %s10761_s17, %s11400_s5 }
  0x2a   :  { %p10767_p4 = pnand %p10765_p3, %p10762_p2 }
  0x2c   :  { %10770 = shalt.err (!%p10767_p4)
}
  0x2d   :  { %s10771_s25 = scalar_lea.vmem %s82_s26, 65536  ;;  %p10776_p6 = scmp.lt.s32.totalorder %s82_s26, %s82_s26 }
  0x2e   :  { %p10772_p5 = scmp.ne.s32.totalorder %s82_s26, %s10771_s25  ;;  %p10777_p7 = scmp.lt.s32.totalorder %s10771_s25, %s10771_s25 }
  0x30   :  { %p10778_p8 = por %p10777_p7, %p10776_p6 }
  0x32   :  { %p10779_p9 = pnand %p10778_p8, %p10772_p5 }
  0x34   :  { %10782 = shalt.err (!%p10779_p9)
}
  0x35   :  { %87 = dma.hbm_to_vmem [thread:$0]  %s11400_s5, 65536, %s82_s26, [#allocation12], %s10950_s19, %s10950_s19, %s10951_s20  }
  0x36   :  { %s10954_s27 = smov [#allocation14]   ;;  %s10783_s11 = scalar_lea.hbm %s11402_s7, 8192 }
  0x37   :  { %s103_s28 = sshll.u32 %s10954_s27, 4  ;;  %p10784_p10 = scmp.ne.s32.totalorder %s11402_s7, %s10783_s11  ;;  %s104_s28 = int_to_ptr.vmem [resolvable:$true] %s103_s28 }
  0x38   :  { %p10787_p11 = scmp.lt.u32.totalorder %s10783_s11, %s11402_s7 }
  0x3a   :  { %p10789_p12 = pnand %p10787_p11, %p10784_p10 }
  0x3c   :  { %10792 = shalt.err (!%p10789_p12)
}
  0x3d   :  { %s10793_s14 = scalar_lea.vmem %s104_s28, 8192  ;;  %p10798_p0 = scmp.lt.s32.totalorder %s104_s28, %s104_s28 }
  0x3e   :  { %p10794_p13 = scmp.ne.s32.totalorder %s104_s28, %s10793_s14  ;;  %p10799_p1 = scmp.lt.s32.totalorder %s10793_s14, %s10793_s14 }
  0x40   :  { %p10800_p2 = por %p10799_p1, %p10798_p0 }
  0x42   :  { %p10801_p3 = pnand %p10800_p2, %p10794_p13 }
  0x44   :  { %10804 = shalt.err (!%p10801_p3)
}
  0x45   :  { %s10955_s5 = smov 64   ;;  %s10956_s19 = smov 4  }
  0x46   :  { %109 = dma.hbm_to_vmem [thread:$0]  %s11402_s7, 8192, %s104_s28, [#allocation15], %s10955_s5, %s10955_s5, %s10956_s19  }
  0x47   :  { %s10957_s15 = smov [#allocation2]   ;;  %s10805_s21 = scalar_lea.hbm %s11395_s0, 256 }
  0x48   :  { %s25_s16 = sshll.u32 %s10957_s15, 4  ;;  %p10806_p4 = scmp.ne.s32.totalorder %s11395_s0, %s10805_s21  ;;  %s26_s16 = int_to_ptr.vmem [resolvable:$true] %s25_s16 }
  0x49   :  { %p10809_p5 = scmp.lt.u32.totalorder %s10805_s21, %s11395_s0 }
  0x4b   :  { %p10811_p6 = pnand %p10809_p5, %p10806_p4 }
  0x4d   :  { %10814 = shalt.err (!%p10811_p6)
}
  0x4e   :  { %s10815_s24 = scalar_lea.vmem %s26_s16, 256  ;;  %p10820_p8 = scmp.lt.s32.totalorder %s26_s16, %s26_s16 }
  0x4f   :  { %p10816_p7 = scmp.ne.s32.totalorder %s26_s16, %s10815_s24  ;;  %p10821_p9 = scmp.lt.s32.totalorder %s10815_s24, %s10815_s24 }
  0x51   :  { %p10822_p10 = por %p10821_p9, %p10820_p8 }
  0x53   :  { %p10823_p11 = pnand %p10822_p10, %p10816_p7 }
  0x55   :  { %10826 = shalt.err (!%p10823_p11)
}
  0x56   :  { %s10958_s7 = smov 128   ;;  %s10959_s27 = smov 8  }
  0x57   :  { %31 = dma.hbm_to_vmem [thread:$0]  %s11395_s0, 256, %s26_s16, [#allocation3], %s10958_s7, %s10958_s7, %s10959_s27  }
  0x58   :  { %s10960_s30 = smov [#allocation7]   ;;  %s10961_s12 = smov [#allocation10]  }
  0x59   :  { %s50_s11 = sshll.u32 %s10960_s30, 4  ;;  %s72_s13 = sshll.u32 %s10961_s12, 4  ;;  %s51_s11 = int_to_ptr.vmem [resolvable:$true] %s50_s11  ;;  %s73_s13 = int_to_ptr.vmem [resolvable:$true] %s72_s13 }
  0x5a   :  { %s10827_s14 = scalar_lea.hbm %s11397_s2, 128 }
  0x5b   :  { %p10828_p12 = scmp.ne.s32.totalorder %s11397_s2, %s10827_s14  ;;  %p10831_p13 = scmp.lt.u32.totalorder %s10827_s14, %s11397_s2 }
  0x5d   :  { %p10833_p0 = pnand %p10831_p13, %p10828_p12 }
  0x5f   :  { %10836 = shalt.err (!%p10833_p0)
}
  0x60   :  { %s10837_s0 = scalar_lea.vmem %s51_s11, 128  ;;  %p10842_p2 = scmp.lt.s32.totalorder %s51_s11, %s51_s11 }
  0x61   :  { %p10838_p1 = scmp.ne.s32.totalorder %s51_s11, %s10837_s0  ;;  %p10843_p3 = scmp.lt.s32.totalorder %s10837_s0, %s10837_s0 }
  0x63   :  { %p10844_p4 = por %p10843_p3, %p10842_p2 }
  0x65   :  { %p10845_p5 = pnand %p10844_p4, %p10838_p1 }
  0x67   :  { %10848 = shalt.err (!%p10845_p5)
}
  0x68   :  { %53 = dma.hbm_to_vmem [thread:$0]  %s11397_s2, 128, %s51_s11, [#allocation6]  }
  0x69   :  { %s10849_s23 = scalar_lea.hbm %s11399_s4, 128 }
  0x6a   :  { %p10850_p6 = scmp.ne.s32.totalorder %s11399_s4, %s10849_s23  ;;  %p10853_p7 = scmp.lt.u32.totalorder %s10849_s23, %s11399_s4 }
  0x6c   :  { %p10855_p8 = pnand %p10853_p7, %p10850_p6 }
  0x6e   :  { %10858 = shalt.err (!%p10855_p8)
}
  0x6f   :  { %s10859_s27 = scalar_lea.vmem %s73_s13, 128  ;;  %p10864_p10 = scmp.lt.s32.totalorder %s73_s13, %s73_s13 }
  0x70   :  { %p10860_p9 = scmp.ne.s32.totalorder %s73_s13, %s10859_s27  ;;  %p10865_p11 = scmp.lt.s32.totalorder %s10859_s27, %s10859_s27 }
  0x72   :  { %p10866_p12 = por %p10865_p11, %p10864_p10 }
  0x74   :  { %p10867_p13 = pnand %p10866_p12, %p10860_p9 }
  0x76   :  { %10870 = shalt.err (!%p10867_p13)
}
  0x77   :  { %75 = dma.hbm_to_vmem [thread:$0]  %s11399_s4, 128, %s73_s13, [#allocation9]  }
  0x78   :  { %s10962_s29 = smov [#allocation13]   ;;  %s10963_s11 = smov [#allocation16]  }
  0x79   :  { %s94_s30 = sshll.u32 %s10962_s29, 4  ;;  %s116_s12 = sshll.u32 %s10963_s11, 4  ;;  %s95_s30 = int_to_ptr.vmem [resolvable:$true] %s94_s30  ;;  %s117_s12 = int_to_ptr.vmem [resolvable:$true] %s116_s12 }
  0x7a   :  { %s10871_s14 = scalar_lea.hbm %s11401_s6, 128 }
  0x7b   :  { %p10872_p0 = scmp.ne.s32.totalorder %s11401_s6, %s10871_s14  ;;  %p10875_p1 = scmp.lt.u32.totalorder %s10871_s14, %s11401_s6 }
  0x7d   :  { %p10877_p2 = pnand %p10875_p1, %p10872_p0 }
  0x7f   :  { %10880 = shalt.err (!%p10877_p2)
}
  0x80   :  { %s10881_s4 = scalar_lea.vmem %s95_s30, 128  ;;  %p10886_p4 = scmp.lt.s32.totalorder %s95_s30, %s95_s30 }
  0x81   :  { %p10882_p3 = scmp.ne.s32.totalorder %s95_s30, %s10881_s4  ;;  %p10887_p5 = scmp.lt.s32.totalorder %s10881_s4, %s10881_s4 }
  0x83   :  { %p10888_p6 = por %p10887_p5, %p10886_p4 }
  0x85   :  { %p10889_p7 = pnand %p10888_p6, %p10882_p3 }
  0x87   :  { %10892 = shalt.err (!%p10889_p7)
}
  0x88   :  { %97 = dma.hbm_to_vmem [thread:$0]  %s11401_s6, 128, %s95_s30, [#allocation12]  }
  0x89   :  { %s10893_s21 = scalar_lea.hbm %s11403_s8, 16 }
  0x8a   :  { %p10894_p8 = scmp.ne.s32.totalorder %s11403_s8, %s10893_s21  ;;  %p10897_p9 = scmp.lt.u32.totalorder %s10893_s21, %s11403_s8 }
  0x8c   :  { %p10899_p10 = pnand %p10897_p9, %p10894_p8 }
  0x8e   :  { %10902 = shalt.err (!%p10899_p10)
}
  0x8f   :  { %s10903_s24 = scalar_lea.vmem %s117_s12, 16  ;;  %s10907_s7 = scalar_lea.vmem %s117_s12, 32 }
  0x90   :  { %p10904_p11 = scmp.ne.s32.totalorder %s117_s12, %s10903_s24  ;;  %p10908_p12 = scmp.lt.s32.totalorder %s117_s12, %s117_s12 }
  0x91   :  { %p10909_p13 = scmp.lt.s32.totalorder %s10907_s7, %s10903_s24 }
  0x93   :  { %p10910_p0 = por %p10909_p13, %p10908_p12 }
  0x95   :  { %p10911_p1 = pnand %p10910_p0, %p10904_p11 }
  0x97   :  { %10914 = shalt.err (!%p10911_p1)
}
  0x98   :  { %119 = dma.hbm_to_vmem [thread:$0]  %s11403_s8, 16, %s117_s12, [#allocation15]  }
  0x99   :  { %10937 = dma.done.wait [#allocation3], 256  }
  0x9a   :  { %10938 = vsyncadd [#allocation3], 4294967040 }
  0x9b   :  { %10939 = dma.done.wait [#allocation6], 8320  }
  0x9c   :  { %10940 = vsyncadd [#allocation6], 4294958976 }
  0x9d   :  { %10941 = dma.done.wait [#allocation9], 65664  }
  0x9e   :  { %10942 = vsyncadd [#allocation9], 4294901632 }
  0x9f   :  { %10943 = dma.done.wait [#allocation12], 65664  }
  0xa0   :  { %10944 = vsyncadd [#allocation12], 4294901632 }
  0xa1   :  { %10945 = dma.done.wait [#allocation15], 8208  }
  0xa2   :  { %10946 = vsyncadd [#allocation15], 4294959088  ;;  %v10964_v0 = vmov 0   ;;  %v151_v1 = vld [vmem:[#allocation5] sm:$0xff]  ;;  %v152_v14 = vld [vmem:[#allocation5 + $0x8] sm:$0xff]  ;;  %s10965_s8 = smov [#allocation17]  }
  0xa3   :  { %609 = vmatprep.mubr.bf16.mxu0 %v10964_v0  ;;  %652 = vmatprep.mubr.bf16.mxu1 %v10964_v0  ;;  %v155_v2 = vld [vmem:[#allocation5 + $0x20] sm:$0xff]  ;;  %v156_v15 = vld [vmem:[#allocation5 + $0x28] sm:$0xff]  ;;  %v153_v58 = vld [vmem:[#allocation5 + $0x10] sm:$0xff]  ;;  %s9135_s2 = sshll.u32 %s10965_s8, 4  ;;  %s9136_s2 = int_to_ptr.vmem [resolvable:$true] %s9135_s2 }
  0xa4   :  { %v159_v3 = vld [vmem:[#allocation5 + $0x40] sm:$0xff]  ;;  %v9152_v4 = vcombine.high %v151_v1, %v155_v2  ;;  %v9151_v5 = vcombine.low %v151_v1, %v155_v2  ;;  %v160_v16 = vld [vmem:[#allocation5 + $0x48] sm:$0xff]  ;;  %v9154_v17 = vcombine.high %v152_v14, %v156_v15  ;;  %v9153_v18 = vcombine.low %v152_v14, %v156_v15  ;;  %v157_v59 = vld [vmem:[#allocation5 + $0x30] sm:$0xff]  ;;  %s10915_s28 = scalar_lea.vmem %s9136_s2, 128  ;;  %p10920_p3 = scmp.lt.s32.totalorder %s9136_s2, %s9136_s2 }
  0xa5   :  { %v163_v6 = vld [vmem:[#allocation5 + $0x60] sm:$0xff]  ;;  %v164_v19 = vld [vmem:[#allocation5 + $0x68] sm:$0xff]  ;;  %v148_v60 = vld [vmem:[#allocation2] sm:$0xff]  ;;  %p10916_p2 = scmp.ne.s32.totalorder %s9136_s2, %s10915_s28  ;;  %p10921_p4 = scmp.lt.s32.totalorder %s10915_s28, %s10915_s28 }
  0xa6   :  { %v9160_v7 = vcombine.high %v159_v3, %v163_v6  ;;  %v167_v8 = vld [vmem:[#allocation5 + $0x80] sm:$0xff]  ;;  %577 = vmatprep.subr.bf16.mxu0 %v9152_v4  ;;  %v9159_v10 = vcombine.low %v159_v3, %v163_v6  ;;  %v9162_v21 = vcombine.high %v160_v16, %v164_v19  ;;  %v168_v22 = vld [vmem:[#allocation5 + $0x88] sm:$0xff]  ;;  %620 = vmatprep.subr.bf16.mxu1 %v9154_v17  ;;  %v149_v63 = vld [vmem:[#allocation2 + $0x8] sm:$0xff] }
  0xa7   :  { %v171_v9 = vld [vmem:[#allocation5 + $0xa0] sm:$0xff]  ;;  %578 = vmatpush1.bf16.msra.mxu0 %v9151_v5  ;;  %v172_v23 = vld [vmem:[#allocation5 + $0xa8] sm:$0xff]  ;;  %621 = vmatpush1.bf16.msra.mxu1 %v9153_v18  ;;  %v9161_v27 = vcombine.low %v160_v16, %v164_v19  ;;  %v9156_v3 = vcombine.high %v153_v58, %v157_v59  ;;  %v161_v5 = vld [vmem:[#allocation5 + $0x50] sm:$0xff]  ;;  %p10922_p5 = por %p10921_p4, %p10920_p3 }
  0xa8   :  { %579 = vmatprep.subr.bf16.mxu0 %v9160_v7  ;;  %v9168_v11 = vcombine.high %v167_v8, %v171_v9  ;;  %v175_v12 = vld [vmem:[#allocation5 + $0xc0] sm:$0xff]  ;;  %v9167_v20 = vcombine.low %v167_v8, %v171_v9  ;;  %622 = vmatprep.subr.bf16.mxu1 %v9162_v21  ;;  %v9170_v28 = vcombine.high %v168_v22, %v172_v23  ;;  %v176_v30 = vld [vmem:[#allocation5 + $0xc8] sm:$0xff]  ;;  %v165_v6 = vld [vmem:[#allocation5 + $0x70] sm:$0xff] }
  0xa9   :  { %v179_v13 = vld [vmem:[#allocation5 + $0xe0] sm:$0xff]  ;;  %v180_v31 = vld [vmem:[#allocation5 + $0xe8] sm:$0xff]  ;;  %v9169_v35 = vcombine.low %v168_v22, %v172_v23  ;;  %v11138_v7 = vpack.c.bf16 %v149_v63, %v148_v60  ;;  %v9155_v9 = vcombine.low %v153_v58, %v157_v59  ;;  %v169_v14 = vld [vmem:[#allocation5 + $0x90] sm:$0xff]  ;;  %v9163_v17 = vcombine.low %v161_v5, %v165_v6  ;;  %p10923_p6 = pnand %p10922_p5, %p10916_p2 }
  0xaa   :  { %v9176_v24 = vcombine.high %v175_v12, %v179_v13  ;;  %v183_v25 = vld [vmem:[#allocation5 + $0x100] sm:$0xff]  ;;  %v9175_v29 = vcombine.low %v175_v12, %v179_v13  ;;  %v9178_v36 = vcombine.high %v176_v30, %v180_v31  ;;  %v184_v38 = vld [vmem:[#allocation5 + $0x108] sm:$0xff]  ;;  %v9177_v43 = vcombine.low %v176_v30, %v180_v31  ;;  %v173_v15 = vld [vmem:[#allocation5 + $0xb0] sm:$0xff] }
  0xab   :  { %580 = vmatpush1.bf16.msra.mxu0 %v9159_v10  ;;  %v187_v26 = vld [vmem:[#allocation5 + $0x120] sm:$0xff]  ;;  %623 = vmatpush1.bf16.msra.mxu1 %v9161_v27  ;;  %v188_v39 = vld [vmem:[#allocation5 + $0x128] sm:$0xff]  ;;  %v154_v10 = vld [vmem:[#allocation5 + $0x18] sm:$0xff]  ;;  %v9164_v12 = vcombine.high %v161_v5, %v165_v6  ;;  %v9171_v27 = vcombine.low %v169_v14, %v173_v15 }
  0xac   :  { %581 = vmatprep.subr.bf16.mxu0 %v9168_v11  ;;  %v9184_v32 = vcombine.high %v183_v25, %v187_v26  ;;  %v191_v33 = vld [vmem:[#allocation5 + $0x140] sm:$0xff]  ;;  %624 = vmatprep.subr.bf16.mxu1 %v9170_v28  ;;  %v9183_v37 = vcombine.low %v183_v25, %v187_v26  ;;  %v9186_v44 = vcombine.high %v184_v38, %v188_v39  ;;  %v192_v46 = vld [vmem:[#allocation5 + $0x148] sm:$0xff]  ;;  %v158_v11 = vld [vmem:[#allocation5 + $0x38] sm:$0xff] }
  0xad   :  { %v195_v34 = vld [vmem:[#allocation5 + $0x160] sm:$0xff]  ;;  %v196_v47 = vld [vmem:[#allocation5 + $0x168] sm:$0xff]  ;;  %v9185_v51 = vcombine.low %v184_v38, %v188_v39  ;;  %v9158_v16 = vcombine.high %v154_v10, %v158_v11  ;;  %v162_v18 = vld [vmem:[#allocation5 + $0x58] sm:$0xff]  ;;  %v9157_v23 = vcombine.low %v154_v10, %v158_v11 }
  0xae   :  { %v9192_v40 = vcombine.high %v191_v33, %v195_v34  ;;  %v199_v41 = vld [vmem:[#allocation5 + $0x180] sm:$0xff]  ;;  %v9191_v45 = vcombine.low %v191_v33, %v195_v34  ;;  %v9194_v52 = vcombine.high %v192_v46, %v196_v47  ;;  %v200_v54 = vld [vmem:[#allocation5 + $0x188] sm:$0xff]  ;;  %v9193_v57 = vcombine.low %v192_v46, %v196_v47  ;;  %v166_v19 = vld [vmem:[#allocation5 + $0x78] sm:$0xff] }
  0xaf   :  { %582 = vmatpush1.bf16.msra.mxu0 %v9167_v20  ;;  %v203_v42 = vld [vmem:[#allocation5 + $0x1a0] sm:$0xff]  ;;  %625 = vmatpush1.bf16.msra.mxu1 %v9169_v35  ;;  %v204_v55 = vld [vmem:[#allocation5 + $0x1a8] sm:$0xff]  ;;  %v9172_v20 = vcombine.high %v169_v14, %v173_v15  ;;  %v177_v21 = vld [vmem:[#allocation5 + $0xd0] sm:$0xff]  ;;  %v9166_v26 = vcombine.high %v162_v18, %v166_v19  ;;  %v9165_v31 = vcombine.low %v162_v18, %v166_v19 }
  0xb0   :  { %583 = vmatprep.subr.bf16.mxu0 %v9176_v24  ;;  %626 = vmatprep.subr.bf16.mxu1 %v9178_v36  ;;  %v9200_v48 = vcombine.high %v199_v41, %v203_v42  ;;  %v207_v49 = vld [vmem:[#allocation5 + $0x1c0] sm:$0xff]  ;;  %v9199_v53 = vcombine.low %v199_v41, %v203_v42  ;;  %v9202_v61 = vcombine.high %v200_v54, %v204_v55  ;;  %v208_v1 = vld [vmem:[#allocation5 + $0x1c8] sm:$0xff]  ;;  %v181_v22 = vld [vmem:[#allocation5 + $0xf0] sm:$0xff] }
  0xb1   :  { %v211_v50 = vld [vmem:[#allocation5 + $0x1e0] sm:$0xff]  ;;  %v212_v2 = vld [vmem:[#allocation5 + $0x1e8] sm:$0xff]  ;;  %v9201_v4 = vcombine.low %v200_v54, %v204_v55  ;;  %v170_v24 = vld [vmem:[#allocation5 + $0x98] sm:$0xff]  ;;  %v9180_v30 = vcombine.high %v177_v21, %v181_v22  ;;  %v9179_v35 = vcombine.low %v177_v21, %v181_v22 }
  0xb2   :  { %v9208_v56 = vcombine.high %v207_v49, %v211_v50  ;;  %v9207_v62 = vcombine.low %v207_v49, %v211_v50  ;;  %v9210_v8 = vcombine.high %v208_v1, %v212_v2  ;;  %v9209_v13 = vcombine.low %v208_v1, %v212_v2  ;;  %v174_v25 = vld [vmem:[#allocation5 + $0xb8] sm:$0xff]  ;;  %v185_v28 = vld [vmem:[#allocation5 + $0x110] sm:$0xff]  ;;  %v773_v59 = vld [vmem:[#allocation8] sm:$0xff] }
  0xb3   :  { %584 = vmatpush1.bf16.msra.mxu0 %v9175_v29  ;;  %627 = vmatpush1.bf16.msra.mxu1 %v9177_v43  ;;  %v189_v29 = vld [vmem:[#allocation5 + $0x130] sm:$0xff]  ;;  %v182_v33 = vld [vmem:[#allocation5 + $0xf8] sm:$0xff]  ;;  %v9174_v34 = vcombine.high %v170_v24, %v174_v25  ;;  %v9173_v39 = vcombine.low %v170_v24, %v174_v25  ;;  %v777_v60 = vld [vmem:[#allocation8 + $0x20] sm:$0xff] }
  0xb4   :  { %585 = vmatprep.subr.bf16.mxu0 %v9184_v32  ;;  %628 = vmatprep.subr.bf16.mxu1 %v9186_v44  ;;  %v178_v32 = vld [vmem:[#allocation5 + $0xd8] sm:$0xff]  ;;  %v193_v36 = vld [vmem:[#allocation5 + $0x150] sm:$0xff]  ;;  %v9188_v38 = vcombine.high %v185_v28, %v189_v29  ;;  %v9187_v43 = vcombine.low %v185_v28, %v189_v29  ;;  %v785_v5 = vld [vmem:[#allocation8 + $0x60] sm:$0xff]  ;;  %v9216_v6 = vcombine.high %v773_v59, %v777_v60 }
  0xb5   :  { %v190_v41 = vld [vmem:[#allocation5 + $0x138] sm:$0xff]  ;;  %v9182_v42 = vcombine.high %v178_v32, %v182_v33  ;;  %v201_v44 = vld [vmem:[#allocation5 + $0x190] sm:$0xff]  ;;  %v9181_v46 = vcombine.low %v178_v32, %v182_v33  ;;  %v793_v14 = vld [vmem:[#allocation8 + $0xa0] sm:$0xff] }
  0xb6   :  { %v194_v47 = vld [vmem:[#allocation5 + $0x158] sm:$0xff]  ;;  %v778_v10 = vld [vmem:[#allocation8 + $0x28] sm:$0xff]  ;;  %v797_v21 = vld [vmem:[#allocation8 + $0xc0] sm:$0xff] }
  0xb7   :  { %586 = vmatpush1.bf16.msra.mxu0 %v9183_v37  ;;  %629 = vmatpush1.bf16.msra.mxu1 %v9185_v51  ;;  %v197_v37 = vld [vmem:[#allocation5 + $0x170] sm:$0xff]  ;;  %v202_v55 = vld [vmem:[#allocation5 + $0x198] sm:$0xff]  ;;  %v801_v22 = vld [vmem:[#allocation8 + $0xe0] sm:$0xff] }
  0xb8   :  { %587 = vmatprep.subr.bf16.mxu0 %v9192_v40  ;;  %630 = vmatprep.subr.bf16.mxu1 %v9194_v52  ;;  %v186_v40 = vld [vmem:[#allocation5 + $0x118] sm:$0xff]  ;;  %v9195_v50 = vcombine.low %v193_v36, %v197_v37  ;;  %v209_v51 = vld [vmem:[#allocation5 + $0x1d0] sm:$0xff]  ;;  %v805_v29 = vld [vmem:[#allocation8 + $0x100] sm:$0xff] }
  0xb9   :  { %v9190_v49 = vcombine.high %v186_v40, %v190_v41  ;;  %v213_v52 = vld [vmem:[#allocation5 + $0x1f0] sm:$0xff]  ;;  %v9189_v54 = vcombine.low %v186_v40, %v190_v41  ;;  %v210_v63 = vld [vmem:[#allocation5 + $0x1d8] sm:$0xff] }
  0xba   :  { %v214_v1 = vld [vmem:[#allocation5 + $0x1f8] sm:$0xff]  ;;  %v786_v18 = vld [vmem:[#allocation8 + $0x68] sm:$0xff] }
  0xbb   :  { %588 = vmatpush1.bf16.msra.mxu0 %v9191_v45  ;;  %631 = vmatpush1.bf16.msra.mxu1 %v9193_v57  ;;  %v205_v45 = vld [vmem:[#allocation5 + $0x1b0] sm:$0xff]  ;;  %v9214_v11 = vcombine.high %v210_v63, %v214_v1 }
  0xbc   :  { %589 = vmatprep.subr.bf16.mxu0 %v9200_v48  ;;  %632 = vmatprep.subr.bf16.mxu1 %v9202_v61  ;;  %v198_v48 = vld [vmem:[#allocation5 + $0x178] sm:$0xff]  ;;  %v9203_v58 = vcombine.low %v201_v44, %v205_v45  ;;  %v9212_v61 = vcombine.high %v209_v51, %v213_v52  ;;  %v790_v25 = vld [vmem:[#allocation8 + $0x88] sm:$0xff] }
  0xbd   :  { %v9198_v57 = vcombine.high %v194_v47, %v198_v48  ;;  %v798_v33 = vld [vmem:[#allocation8 + $0xc8] sm:$0xff] }
  0xbe   :  { %v806_v41 = vld [vmem:[#allocation8 + $0x108] sm:$0xff] }
  0xbf   :  { %590 = vmatpush1.bf16.msra.mxu0 %v9199_v53  ;;  %633 = vmatpush1.bf16.msra.mxu1 %v9201_v4  ;;  %v9204_v53 = vcombine.high %v201_v44, %v205_v45  ;;  %v781_v4 = vld [vmem:[#allocation8 + $0x40] sm:$0xff] }
  0xc0   :  { %591 = vmatprep.subr.bf16.mxu0 %v9208_v56  ;;  %634 = vmatprep.subr.bf16.mxu1 %v9210_v8  ;;  %v206_v56 = vld [vmem:[#allocation5 + $0x1b8] sm:$0xff]  ;;  %v9224_v15 = vcombine.high %v781_v4, %v785_v5 }
  0xc1   :  { %v9206_v2 = vcombine.high %v202_v55, %v206_v56  ;;  %v9205_v8 = vcombine.low %v202_v55, %v206_v56 }
  0xc3   :  { %592 = vmatpush1.bf16.msra.mxu0 %v9207_v62  ;;  %635 = vmatpush1.bf16.msra.mxu1 %v9209_v13  ;;  %v9197_v62 = vcombine.low %v194_v47, %v198_v48  ;;  %v789_v13 = vld [vmem:[#allocation8 + $0x80] sm:$0xff] }
  0xc4   :  { %663 = vmatprep.subr.bf16.mxu0 %v9156_v3  ;;  %706 = vmatprep.subr.bf16.mxu1 %v9158_v16  ;;  %v9211_v3 = vcombine.low %v209_v51, %v213_v52  ;;  %v9213_v16 = vcombine.low %v210_v63, %v214_v1  ;;  %v9231_v28 = vcombine.low %v789_v13, %v793_v14 }
  0xc6   :  { %610 = vmatmul.mubr.bf16.vlgmr.msra.gmra.mrb[0].mxu0 %v11138_v7  ;;  %653 = vmatmul.mubr.bf16.vlgmr.msra.gmra.mrb[0].mxu1 %v11138_v7 }
  0xc7   :  { %664 = vmatpush1.bf16.msra.mxu0 %v9155_v9  ;;  %695 = vmatprep.mubr.bf16.mxu0 %v10964_v0  ;;  %v774_v9 = vld [vmem:[#allocation8 + $0x8] sm:$0xff] }
  0xc8   :  { %665 = vmatprep.subr.bf16.mxu0 %v9164_v12  ;;  %707 = vmatpush1.bf16.msra.mxu1 %v9157_v23  ;;  %v9215_v12 = vcombine.low %v773_v59, %v777_v60  ;;  %v9218_v19 = vcombine.high %v774_v9, %v778_v10  ;;  %v9232_v23 = vcombine.high %v789_v13, %v793_v14 }
  0xc9   :  { %738 = vmatprep.mubr.bf16.mxu1 %v10964_v0  ;;  %708 = vmatprep.subr.bf16.mxu1 %v9166_v26  ;;  %v9196_v0 = vcombine.high %v193_v36, %v197_v37  ;;  %v9217_v24 = vcombine.low %v774_v9, %v778_v10  ;;  %v794_v26 = vld [vmem:[#allocation8 + $0xa8] sm:$0xff]  ;;  %v9239_v36 = vcombine.low %v797_v21, %v801_v22  ;;  %v813_v37 = vld [vmem:[#allocation8 + $0x140] sm:$0xff] }
  0xca   :  { %v9233_v40 = vcombine.low %v790_v25, %v794_v26 }
  0xcb   :  { %666 = vmatpush1.bf16.msra.mxu0 %v9163_v17  ;;  %v782_v17 = vld [vmem:[#allocation8 + $0x48] sm:$0xff] }
  0xcc   :  { %667 = vmatprep.subr.bf16.mxu0 %v9172_v20  ;;  %709 = vmatpush1.bf16.msra.mxu1 %v9165_v31  ;;  %v9223_v20 = vcombine.low %v781_v4, %v785_v5  ;;  %v9240_v31 = vcombine.high %v797_v21, %v801_v22  ;;  %v9225_v32 = vcombine.low %v782_v17, %v786_v18 }
  0xcd   :  { %710 = vmatprep.subr.bf16.mxu1 %v9174_v34  ;;  %v802_v34 = vld [vmem:[#allocation8 + $0xe8] sm:$0xff] }
  0xce   :  { %v9241_v45 = vcombine.low %v798_v33, %v802_v34 }
  0xcf   :  { %668 = vmatpush1.bf16.msra.mxu0 %v9171_v27  ;;  %v9226_v27 = vcombine.high %v782_v17, %v786_v18 }
  0xd0   :  { %669 = vmatprep.subr.bf16.mxu0 %v9180_v30  ;;  %711 = vmatpush1.bf16.msra.mxu1 %v9173_v39  ;;  %v809_v30 = vld [vmem:[#allocation8 + $0x120] sm:$0xff] }
  0xd1   :  { %712 = vmatprep.subr.bf16.mxu1 %v9182_v42  ;;  %v9248_v39 = vcombine.high %v805_v29, %v809_v30  ;;  %v810_v42 = vld [vmem:[#allocation8 + $0x128] sm:$0xff] }
  0xd2   :  { %v9250_v47 = vcombine.high %v806_v41, %v810_v42  ;;  %v9249_v52 = vcombine.low %v806_v41, %v810_v42  ;;  %v874_v42 = vld [vmem:[#allocation8 + $0x328] sm:$0xff] }
  0xd3   :  { %670 = vmatpush1.bf16.msra.mxu0 %v9179_v35  ;;  %v9234_v35 = vcombine.high %v790_v25, %v794_v26 }
  0xd4   :  { %671 = vmatprep.subr.bf16.mxu0 %v9188_v38  ;;  %713 = vmatpush1.bf16.msra.mxu1 %v9181_v46  ;;  %v817_v38 = vld [vmem:[#allocation8 + $0x160] sm:$0xff] }
  0xd5   :  { %714 = vmatprep.subr.bf16.mxu1 %v9190_v49  ;;  %v9256_v44 = vcombine.high %v813_v37, %v817_v38  ;;  %v825_v46 = vld [vmem:[#allocation8 + $0x1a0] sm:$0xff]  ;;  %v9255_v48 = vcombine.low %v813_v37, %v817_v38  ;;  %v814_v49 = vld [vmem:[#allocation8 + $0x148] sm:$0xff] }
  0xd6   :  { %v869_v38 = vld [vmem:[#allocation8 + $0x300] sm:$0xff] }
  0xd7   :  { %672 = vmatpush1.bf16.msra.mxu0 %v9187_v43  ;;  %v9247_v43 = vcombine.low %v805_v29, %v809_v30 }
  0xd8   :  { %673 = vmatprep.subr.bf16.mxu0 %v9196_v0  ;;  %715 = vmatpush1.bf16.msra.mxu1 %v9189_v54  ;;  %v821_v0 = vld [vmem:[#allocation8 + $0x180] sm:$0xff] }
  0xd9   :  { %716 = vmatprep.subr.bf16.mxu1 %v9198_v57  ;;  %v9264_v51 = vcombine.high %v821_v0, %v825_v46  ;;  %v833_v54 = vld [vmem:[#allocation8 + $0x1e0] sm:$0xff]  ;;  %v9263_v56 = vcombine.low %v821_v0, %v825_v46  ;;  %v822_v57 = vld [vmem:[#allocation8 + $0x188] sm:$0xff] }
  0xda   :  { %v881_v0 = vld [vmem:[#allocation8 + $0x360] sm:$0xff]  ;;  %v878_v46 = vld [vmem:[#allocation8 + $0x348] sm:$0xff] }
  0xdb   :  { %674 = vmatpush1.bf16.msra.mxu0 %v9195_v50  ;;  %v818_v50 = vld [vmem:[#allocation8 + $0x168] sm:$0xff] }
  0xdc   :  { %675 = vmatprep.subr.bf16.mxu0 %v9204_v53  ;;  %717 = vmatpush1.bf16.msra.mxu1 %v9197_v62  ;;  %v829_v53 = vld [vmem:[#allocation8 + $0x1c0] sm:$0xff]  ;;  %v9258_v55 = vcombine.high %v814_v49, %v818_v50  ;;  %v9257_v60 = vcombine.low %v814_v49, %v818_v50 }
  0xdd   :  { %718 = vmatprep.subr.bf16.mxu1 %v9206_v2  ;;  %v9272_v59 = vcombine.high %v829_v53, %v833_v54  ;;  %v841_v62 = vld [vmem:[#allocation8 + $0x220] sm:$0xff]  ;;  %v9271_v1 = vcombine.low %v829_v53, %v833_v54  ;;  %v830_v2 = vld [vmem:[#allocation8 + $0x1c8] sm:$0xff] }
  0xde   :  { %v889_v53 = vld [vmem:[#allocation8 + $0x3a0] sm:$0xff]  ;;  %v886_v54 = vld [vmem:[#allocation8 + $0x388] sm:$0xff] }
  0xdf   :  { %676 = vmatpush1.bf16.msra.mxu0 %v9203_v58  ;;  %v826_v58 = vld [vmem:[#allocation8 + $0x1a8] sm:$0xff] }
  0xe0   :  { %677 = vmatprep.subr.bf16.mxu0 %v9212_v61  ;;  %719 = vmatpush1.bf16.msra.mxu1 %v9205_v8  ;;  %v837_v61 = vld [vmem:[#allocation8 + $0x200] sm:$0xff]  ;;  %v9266_v63 = vcombine.high %v822_v57, %v826_v58  ;;  %v9265_v5 = vcombine.low %v822_v57, %v826_v58 }
  0xe1   :  { %720 = vmatprep.subr.bf16.mxu1 %v9214_v11  ;;  %v9280_v4 = vcombine.high %v837_v61, %v841_v62  ;;  %v849_v8 = vld [vmem:[#allocation8 + $0x260] sm:$0xff]  ;;  %v9279_v10 = vcombine.low %v837_v61, %v841_v62  ;;  %v838_v11 = vld [vmem:[#allocation8 + $0x208] sm:$0xff] }
  0xe2   :  { %v893_v57 = vld [vmem:[#allocation8 + $0x3c0] sm:$0xff]  ;;  %v894_v61 = vld [vmem:[#allocation8 + $0x3c8] sm:$0xff] }
  0xe3   :  { %678 = vmatpush1.bf16.msra.mxu0 %v9211_v3  ;;  %v834_v3 = vld [vmem:[#allocation8 + $0x1e8] sm:$0xff]  ;;  %v897_v58 = vld [vmem:[#allocation8 + $0x3e0] sm:$0xff] }
  0xe4   :  { %3887 = vmatprep.subr.bf16.mxu0 %v9216_v6  ;;  %721 = vmatpush1.bf16.msra.mxu1 %v9213_v16  ;;  %v845_v6 = vld [vmem:[#allocation8 + $0x240] sm:$0xff]  ;;  %v9274_v9 = vcombine.high %v830_v2, %v834_v3  ;;  %v9273_v14 = vcombine.low %v830_v2, %v834_v3  ;;  %v898_v62 = vld [vmem:[#allocation8 + $0x3e8] sm:$0xff]  ;;  %v9335_v3 = vcombine.low %v893_v57, %v897_v58 }
  0xe5   :  { %4059 = vmatprep.subr.bf16.mxu1 %v9218_v19  ;;  %v9288_v13 = vcombine.high %v845_v6, %v849_v8  ;;  %v857_v16 = vld [vmem:[#allocation8 + $0x2a0] sm:$0xff]  ;;  %v9287_v18 = vcombine.low %v845_v6, %v849_v8  ;;  %v846_v19 = vld [vmem:[#allocation8 + $0x248] sm:$0xff]  ;;  %v9338_v2 = vcombine.high %v894_v61, %v898_v62 }
  0xe6   :  { %696 = vmatmul.mubr.bf16.vlgmr.msra.gmra.mrb[4].mxu0 %v11138_v7  ;;  %v11148_v6 = vld [vmem:[#allocation8 + $0x420] sm:$0xff]  ;;  %v11150_v8 = vld [vmem:[#allocation8 + $0x408] sm:$0xff] }
  0xe7   :  { %3888 = vmatpush1.bf16.msra.mxu0 %v9215_v12  ;;  %739 = vmatmul.mubr.bf16.vlgmr.msra.gmra.mrb[4].mxu1 %v11138_v7  ;;  %v9242_v7 = vcombine.high %v798_v33, %v802_v34  ;;  %v842_v12 = vld [vmem:[#allocation8 + $0x228] sm:$0xff] }
  0xe8   :  { %3889 = vmatprep.subr.bf16.mxu0 %v9224_v15  ;;  %4060 = vmatpush1.bf16.msra.mxu1 %v9217_v24  ;;  %v853_v15 = vld [vmem:[#allocation8 + $0x280] sm:$0xff]  ;;  %v9282_v17 = vcombine.high %v838_v11, %v842_v12  ;;  %v9281_v22 = vcombine.low %v838_v11, %v842_v12  ;;  %v862_v33 = vld [vmem:[#allocation8 + $0x2c8] sm:$0xff] }
  0xe9   :  { %4061 = vmatprep.subr.bf16.mxu1 %v9226_v27  ;;  %v9296_v21 = vcombine.high %v853_v15, %v857_v16  ;;  %v865_v24 = vld [vmem:[#allocation8 + $0x2e0] sm:$0xff]  ;;  %v9295_v26 = vcombine.low %v853_v15, %v857_v16  ;;  %v854_v27 = vld [vmem:[#allocation8 + $0x288] sm:$0xff] }
  0xea   :  { %v866_v34 = vld [vmem:[#allocation8 + $0x2e8] sm:$0xff] }
  0xeb   :  { %3890 = vmatpush1.bf16.msra.mxu0 %v9223_v20  ;;  %v850_v20 = vld [vmem:[#allocation8 + $0x268] sm:$0xff]  ;;  %v9305_v37 = vcombine.low %v862_v33, %v866_v34 }
  0xec   :  { %3891 = vmatprep.subr.bf16.mxu0 %v9232_v23  ;;  %4062 = vmatpush1.bf16.msra.mxu1 %v9225_v32  ;;  %v861_v23 = vld [vmem:[#allocation8 + $0x2c0] sm:$0xff]  ;;  %v9290_v25 = vcombine.high %v846_v19, %v850_v20  ;;  %v9289_v30 = vcombine.low %v846_v19, %v850_v20 }
  0xed   :  { %4063 = vmatprep.subr.bf16.mxu1 %v9234_v35  ;;  %v9304_v29 = vcombine.high %v861_v23, %v865_v24  ;;  %v9303_v32 = vcombine.low %v861_v23, %v865_v24 }
  0xef   :  { %3892 = vmatpush1.bf16.msra.mxu0 %v9231_v28  ;;  %v858_v28 = vld [vmem:[#allocation8 + $0x2a8] sm:$0xff] }
  0xf0   :  { %3893 = vmatprep.subr.bf16.mxu0 %v9240_v31  ;;  %4064 = vmatpush1.bf16.msra.mxu1 %v9233_v40  ;;  %v9298_v31 = vcombine.high %v854_v27, %v858_v28  ;;  %v9297_v35 = vcombine.low %v854_v27, %v858_v28  ;;  %v870_v40 = vld [vmem:[#allocation8 + $0x308] sm:$0xff] }
  0xf1   :  { %4065 = vmatprep.subr.bf16.mxu1 %v9242_v7 }
  0xf3   :  { %3894 = vmatpush1.bf16.msra.mxu0 %v9239_v36  ;;  %v9306_v36 = vcombine.high %v862_v33, %v866_v34 }
  0xf4   :  { %3895 = vmatprep.subr.bf16.mxu0 %v9248_v39  ;;  %4066 = vmatpush1.bf16.msra.mxu1 %v9241_v45  ;;  %v873_v39 = vld [vmem:[#allocation8 + $0x320] sm:$0xff] }
  0xf5   :  { %4067 = vmatprep.subr.bf16.mxu1 %v9250_v47  ;;  %v9312_v41 = vcombine.high %v869_v38, %v873_v39  ;;  %v9311_v7 = vcombine.low %v869_v38, %v873_v39  ;;  %v877_v45 = vld [vmem:[#allocation8 + $0x340] sm:$0xff] }
  0xf6   :  { %v9320_v47 = vcombine.high %v877_v45, %v881_v0  ;;  %v9319_v49 = vcombine.low %v877_v45, %v881_v0  ;;  %v910_v45 = vld [vmem:[#allocation8 + $0x448] sm:$0xff] }
  0xf7   :  { %3896 = vmatpush1.bf16.msra.mxu0 %v9247_v43  ;;  %v9313_v43 = vcombine.low %v870_v40, %v874_v42  ;;  %v914_v0 = vld [vmem:[#allocation8 + $0x468] sm:$0xff] }
  0xf8   :  { %3897 = vmatprep.subr.bf16.mxu0 %v9256_v44  ;;  %4068 = vmatpush1.bf16.msra.mxu1 %v9249_v52  ;;  %v9314_v44 = vcombine.high %v870_v40, %v874_v42  ;;  %v885_v52 = vld [vmem:[#allocation8 + $0x380] sm:$0xff] }
  0xf9   :  { %4069 = vmatprep.subr.bf16.mxu1 %v9258_v55  ;;  %v9328_v55 = vcombine.high %v885_v52, %v889_v53 }
  0xfb   :  { %3898 = vmatpush1.bf16.msra.mxu0 %v9255_v48  ;;  %v882_v48 = vld [vmem:[#allocation8 + $0x368] sm:$0xff] }
  0xfc   :  { %3899 = vmatprep.subr.bf16.mxu0 %v9264_v51  ;;  %4070 = vmatpush1.bf16.msra.mxu1 %v9257_v60  ;;  %v9321_v50 = vcombine.low %v878_v46, %v882_v48  ;;  %v9322_v51 = vcombine.high %v878_v46, %v882_v48 }
  0xfd   :  { %4071 = vmatprep.subr.bf16.mxu1 %v9266_v63 }
  0xff   :  { %3900 = vmatpush1.bf16.msra.mxu0 %v9263_v56  ;;  %v890_v56 = vld [vmem:[#allocation8 + $0x3a8] sm:$0xff] }
 0x100   :  { %3901 = vmatprep.subr.bf16.mxu0 %v9272_v59  ;;  %4072 = vmatpush1.bf16.msra.mxu1 %v9265_v5  ;;  %v9327_v59 = vcombine.low %v885_v52, %v889_v53  ;;  %v9330_v60 = vcombine.high %v886_v54, %v890_v56  ;;  %v9329_v63 = vcombine.low %v886_v54, %v890_v56  ;;  %v11146_v5 = vld [vmem:[#allocation8 + $0x400] sm:$0xff]  ;;  %v918_v54 = vld [vmem:[#allocation8 + $0x488] sm:$0xff] }
 0x101   :  { %4073 = vmatprep.subr.bf16.mxu1 %v9274_v9  ;;  %v9344_v9 = vcombine.high %v11146_v5, %v11148_v6  ;;  %v9343_v11 = vcombine.low %v11146_v5, %v11148_v6  ;;  %v921_v53 = vld [vmem:[#allocation8 + $0x4a0] sm:$0xff] }
 0x103   :  { %3902 = vmatpush1.bf16.msra.mxu0 %v9271_v1  ;;  %v9336_v1 = vcombine.high %v893_v57, %v897_v58 }
 0x104   :  { %3903 = vmatprep.subr.bf16.mxu0 %v9280_v4  ;;  %4074 = vmatpush1.bf16.msra.mxu1 %v9273_v14  ;;  %v9337_v4 = vcombine.low %v894_v61, %v898_v62  ;;  %v217_v14 = vlaneseq }
 0x105   :  { %4075 = vmatprep.subr.bf16.mxu1 %v9282_v17  ;;  %v11167_v17 = vld [vmem:[#allocation7] sm:$0xff] }
 0x106   :  { %v11162_v15 = vshrl.u32 %v217_v14, 7  ;;  %v937_v14 = vld [vmem:[#allocation8 + $0x520] sm:$0xff] }
 0x107   :  { %3904 = vmatpush1.bf16.msra.mxu0 %v9279_v10  ;;  %v11154_v10 = vld [vmem:[#allocation8 + $0x428] sm:$0xff] }
 0x108   :  { %3905 = vmatprep.subr.bf16.mxu0 %v9288_v13  ;;  %4076 = vmatpush1.bf16.msra.mxu1 %v9281_v22  ;;  %v9345_v12 = vcombine.low %v11150_v8, %v11154_v10  ;;  %v9346_v13 = vcombine.high %v11150_v8, %v11154_v10  ;;  %v11165_v16 = vsub.s32 0, %v11162_v15  ;;  %v11180_v23 = vsub.s32 3, %v11162_v15 }
 0x109   :  { %4077 = vmatprep.subr.bf16.mxu1 %v9290_v25 }
 0x10a   :  { %v220_v19 = vrot.slane %v11167_v17, %v11165_v16 }
 0x10b   :  { %3906 = vmatpush1.bf16.msra.mxu0 %v9287_v18  ;;  %v11170_v18 = vsub.s32 1, %v11162_v15 }
 0x10c   :  { %3907 = vmatprep.subr.bf16.mxu0 %v9296_v21  ;;  %4078 = vmatpush1.bf16.msra.mxu1 %v9289_v30  ;;  %v11177_v21 = vsub.s32 2, %v11162_v15 }
 0x10d   :  { %4079 = vmatprep.subr.bf16.mxu1 %v9298_v31  ;;  %v224_v20 = vrot.slane %v11167_v17, %v11170_v18 }
 0x10e   :  { %v228_v30 = vrot.slane %v11167_v17, %v11177_v21 }
 0x10f   :  { %3908 = vmatpush1.bf16.msra.mxu0 %v9295_v26 }
 0x110   :  { %3909 = vmatprep.subr.bf16.mxu0 %v9304_v29  ;;  %4080 = vmatpush1.bf16.msra.mxu1 %v9297_v35 }
 0x111   :  { %4081 = vmatprep.subr.bf16.mxu1 %v9306_v36 }
 0x113   :  { %3910 = vmatpush1.bf16.msra.mxu0 %v9303_v32  ;;  %v232_v32 = vrot.slane %v11167_v17, %v11180_v23 }
 0x114   :  { %4082 = vmatpush1.bf16.msra.mxu1 %v9305_v37  ;;  %3911 = vmatprep.subr.bf16.mxu0 %v9312_v41 }
 0x115   :  { %4083 = vmatprep.subr.bf16.mxu1 %v9314_v44  ;;  %v913_v44 = vld [vmem:[#allocation8 + $0x460] sm:$0xff] }
 0x117   :  { %3912 = vmatpush1.bf16.msra.mxu0 %v9311_v7  ;;  %v909_v7 = vld [vmem:[#allocation8 + $0x440] sm:$0xff] }
 0x118   :  { %4084 = vmatpush1.bf16.msra.mxu1 %v9313_v43  ;;  %3913 = vmatprep.subr.bf16.mxu0 %v9320_v47  ;;  %v9351_v58 = vcombine.low %v909_v7, %v913_v44 }
 0x119   :  { %4085 = vmatprep.subr.bf16.mxu1 %v9322_v51  ;;  %v917_v51 = vld [vmem:[#allocation8 + $0x480] sm:$0xff] }
 0x11a   :  { %v9360_v61 = vcombine.high %v917_v51, %v921_v53  ;;  %v9359_v6 = vcombine.low %v917_v51, %v921_v53  ;;  %v957_v53 = vld [vmem:[#allocation8 + $0x5c0] sm:$0xff] }
 0x11b   :  { %3914 = vmatpush1.bf16.msra.mxu0 %v9319_v49  ;;  %v9352_v49 = vcombine.high %v909_v7, %v913_v44  ;;  %v953_v7 = vld [vmem:[#allocation8 + $0x5a0] sm:$0xff]  ;;  %v954_v44 = vld [vmem:[#allocation8 + $0x5a8] sm:$0xff] }
 0x11c   :  { %4086 = vmatpush1.bf16.msra.mxu1 %v9321_v50  ;;  %3915 = vmatprep.subr.bf16.mxu0 %v9328_v55  ;;  %v9354_v50 = vcombine.high %v910_v45, %v914_v0  ;;  %v922_v55 = vld [vmem:[#allocation8 + $0x4a8] sm:$0xff] }
 0x11d   :  { %4087 = vmatprep.subr.bf16.mxu1 %v9330_v60  ;;  %v9362_v62 = vcombine.high %v918_v54, %v922_v55  ;;  %v9361_v8 = vcombine.low %v918_v54, %v922_v55  ;;  %v961_v54 = vld [vmem:[#allocation8 + $0x5e0] sm:$0xff]  ;;  %v958_v55 = vld [vmem:[#allocation8 + $0x5c8] sm:$0xff] }
 0x11f   :  { %3916 = vmatpush1.bf16.msra.mxu0 %v9327_v59  ;;  %v9353_v59 = vcombine.low %v910_v45, %v914_v0 }
 0x120   :  { %4088 = vmatpush1.bf16.msra.mxu1 %v9329_v63  ;;  %3917 = vmatprep.subr.bf16.mxu0 %v9336_v1  ;;  %v925_v63 = vld [vmem:[#allocation8 + $0x4c0] sm:$0xff] }
 0x121   :  { %4089 = vmatprep.subr.bf16.mxu1 %v9338_v2  ;;  %v929_v2 = vld [vmem:[#allocation8 + $0x4e0] sm:$0xff] }
 0x122   :  { %v9368_v10 = vcombine.high %v925_v63, %v929_v2 }
 0x123   :  { %3918 = vmatpush1.bf16.msra.mxu0 %v9335_v3  ;;  %v926_v3 = vld [vmem:[#allocation8 + $0x4c8] sm:$0xff] }
 0x124   :  { %4090 = vmatpush1.bf16.msra.mxu1 %v9337_v4  ;;  %3930 = vmatprep.subr.bf16.mxu0 %v9344_v9  ;;  %v930_v4 = vld [vmem:[#allocation8 + $0x4e8] sm:$0xff]  ;;  %v11199_v9 = vsub.s32 4, %v11162_v15 }
 0x125   :  { %4102 = vmatprep.subr.bf16.mxu1 %v9346_v13  ;;  %v11202_v13 = vsub.s32 5, %v11162_v15 }
 0x199   :  { %v611_v22 = vpop.f32.mrb[0].mxu0  ;;  %v654_v33 = vpop.f32.mrb[0].mxu1 }
 0x19a   :  { %v612_v24 = vadd.f32 %v611_v22, %v220_v19  ;;  %v613_v25 = vpop.f32.mrb[1].mxu0  ;;  %v655_v34 = vadd.f32 %v654_v33, %v228_v30  ;;  %v656_v35 = vpop.f32.mrb[1].mxu1  ;;  %v9367_v22 = vcombine.low %v925_v63, %v929_v2  ;;  %v966_v63 = vld [vmem:[#allocation8 + $0x608] sm:$0xff] }
 0x19b   :  { %v614_v26 = vadd.f32 %v613_v25, %v224_v20  ;;  %v615_v27 = vpop.f32.mrb[2].mxu0  ;;  %v657_v36 = vadd.f32 %v656_v35, %v232_v32  ;;  %v658_v37 = vpop.f32.mrb[2].mxu1  ;;  %v236_v25 = vrot.slane %v11167_v17, %v11199_v9  ;;  %v970_v2 = vld [vmem:[#allocation8 + $0x628] sm:$0xff] }
 0x19c   :  { %10612 = vtanh.f32 %v612_v24  ;;  %v616_v28 = vadd.f32 %v615_v27, %v220_v19  ;;  %v617_v29 = vpop.f32.mrb[3].mxu0  ;;  %v659_v38 = vadd.f32 %v658_v37, %v228_v30  ;;  %v660_v39 = vpop.f32.mrb[3].mxu1  ;;  %v934_v19 = vld [vmem:[#allocation8 + $0x508] sm:$0xff]  ;;  %v9369_v24 = vcombine.low %v926_v3, %v930_v4  ;;  %v945_v30 = vld [vmem:[#allocation8 + $0x560] sm:$0xff] }
 0x19d   :  { %10614 = vtanh.f32 %v614_v26  ;;  %v618_v31 = vadd.f32 %v617_v29, %v224_v20  ;;  %v661_v40 = vadd.f32 %v660_v39, %v232_v32  ;;  %v938_v20 = vld [vmem:[#allocation8 + $0x528] sm:$0xff]  ;;  %v240_v29 = vrot.slane %v11167_v17, %v11202_v13 }
 0x19e   :  { %10616 = vtanh.f32 %v616_v28  ;;  %v9378_v27 = vcombine.high %v934_v19, %v938_v20  ;;  %v941_v28 = vld [vmem:[#allocation8 + $0x540] sm:$0xff]  ;;  %v946_v32 = vld [vmem:[#allocation8 + $0x568] sm:$0xff]  ;;  %v9377_v35 = vcombine.low %v934_v19, %v938_v20 }
 0x19f   :  { %10618 = vtanh.f32 %v618_v31  ;;  %v942_v31 = vld [vmem:[#allocation8 + $0x548] sm:$0xff]  ;;  %v977_v19 = vld [vmem:[#allocation8 + $0x660] sm:$0xff] }
 0x1a0   :  { %10620 = vtanh.f32 %v655_v34  ;;  %v9386_v39 = vcombine.high %v942_v31, %v946_v32  ;;  %v974_v20 = vld [vmem:[#allocation8 + $0x648] sm:$0xff] }
 0x1a1   :  { %10622 = vtanh.f32 %v657_v36 }
 0x1a2   :  { %10624 = vtanh.f32 %v659_v38  ;;  %v9384_v38 = vcombine.high %v941_v28, %v945_v30 }
 0x1a3   :  { %10626 = vtanh.f32 %v661_v40  ;;  %v949_v40 = vld [vmem:[#allocation8 + $0x580] sm:$0xff] }
 0x1a4   :  { %v9392_v51 = vcombine.high %v949_v40, %v953_v7 }
 0x1a6   :  { %v10613_v41 = vpop.eup %10612 }
 0x1a7   :  { %v10615_v42 = vpop.eup %10614 }
 0x1a8   :  { %v10617_v43 = vpop.eup %10616 }
 0x1a9   :  { %v10619_v46 = vpop.eup %10618  ;;  %v11186_v47 = vpack.c.bf16 %v10617_v43, %v10613_v41  ;;  %v950_v43 = vld [vmem:[#allocation8 + $0x588] sm:$0xff] }
 0x1aa   :  { %v11188_v48 = vpack.c.bf16 %v10619_v46, %v10615_v42  ;;  %v10621_v52 = vpop.eup %10620 }
 0x1ab   :  { %v10623_v56 = vpop.eup %10622 }
 0x1ac   :  { %3919 = vmatprep.mubr.bf16.mxu0 %v11188_v48  ;;  %4091 = vmatprep.mubr.bf16.mxu1 %v11188_v48  ;;  %v10625_v57 = vpop.eup %10624 }
 0x1ad   :  { %3920 = vmatmul.mubr.bf16.vlgmr.msra.gmra.mrb[8].mxu0 %v11186_v47  ;;  %4092 = vmatmul.mubr.bf16.vlgmr.msra.gmra.mrb[8].mxu1 %v11186_v47  ;;  %v10627_v60 = vpop.eup %10626  ;;  %v11194_v1 = vpack.c.bf16 %v10625_v57, %v10621_v52  ;;  %v9394_v52 = vcombine.high %v950_v43, %v954_v44  ;;  %v9391_v57 = vcombine.low %v949_v40, %v953_v7  ;;  %v993_v40 = vld [vmem:[#allocation8 + $0x6e0] sm:$0xff] }
 0x1ae   :  { %3931 = vmatpush1.bf16.msra.mxu0 %v9343_v11  ;;  %4103 = vmatpush1.bf16.msra.mxu1 %v9345_v12  ;;  %v11196_v5 = vpack.c.bf16 %v10627_v60, %v10623_v56  ;;  %v9370_v11 = vcombine.high %v926_v3, %v930_v4  ;;  %v933_v12 = vld [vmem:[#allocation8 + $0x500] sm:$0xff]  ;;  %v962_v56 = vld [vmem:[#allocation8 + $0x5e8] sm:$0xff]  ;;  %v9399_v4 = vcombine.low %v957_v53, %v961_v54 }
 0x1af   :  { %3932 = vmatprep.subr.bf16.mxu0 %v9352_v49  ;;  %4104 = vmatprep.subr.bf16.mxu1 %v9354_v50  ;;  %v9376_v26 = vcombine.high %v933_v12, %v937_v14  ;;  %v9375_v34 = vcombine.low %v933_v12, %v937_v14  ;;  %v9383_v49 = vcombine.low %v941_v28, %v945_v30  ;;  %v973_v12 = vld [vmem:[#allocation8 + $0x640] sm:$0xff] }
 0x1b0   :  { %3962 = vmatprep.mubr.bf16.mxu0 %v11196_v5  ;;  %4134 = vmatprep.mubr.bf16.mxu1 %v11196_v5  ;;  %v9385_v50 = vcombine.low %v942_v31, %v946_v32  ;;  %v9402_v60 = vcombine.high %v958_v55, %v962_v56  ;;  %v981_v31 = vld [vmem:[#allocation8 + $0x680] sm:$0xff] }
 0x1b1   :  { %v985_v32 = vld [vmem:[#allocation8 + $0x6a0] sm:$0xff] }
 0x1b2   :  { %3933 = vmatpush1.bf16.msra.mxu0 %v9351_v58  ;;  %4105 = vmatpush1.bf16.msra.mxu1 %v9353_v59  ;;  %v9393_v58 = vcombine.low %v950_v43, %v954_v44  ;;  %v9400_v59 = vcombine.high %v957_v53, %v961_v54  ;;  %v9423_v7 = vcombine.low %v981_v31, %v985_v32  ;;  %v11215_v53 = vsub.s32 6, %v11162_v15 }
 0x1b3   :  { %3934 = vmatprep.subr.bf16.mxu0 %v9360_v61  ;;  %4106 = vmatprep.subr.bf16.mxu1 %v9362_v62  ;;  %v965_v61 = vld [vmem:[#allocation8 + $0x600] sm:$0xff] }
 0x1b4   :  { %v969_v62 = vld [vmem:[#allocation8 + $0x620] sm:$0xff] }
 0x1b6   :  { %3935 = vmatpush1.bf16.msra.mxu0 %v9359_v6  ;;  %4107 = vmatpush1.bf16.msra.mxu1 %v9361_v8  ;;  %v9401_v6 = vcombine.low %v958_v55, %v962_v56  ;;  %v11218_v55 = vsub.s32 7, %v11162_v15 }
 0x1b7   :  { %3936 = vmatprep.subr.bf16.mxu0 %v9368_v10  ;;  %4108 = vmatprep.subr.bf16.mxu1 %v9370_v11  ;;  %v9408_v10 = vcombine.high %v965_v61, %v969_v62  ;;  %v9410_v11 = vcombine.high %v966_v63, %v970_v2 }
 0x1b9   :  { %v697_v33 = vpop.f32.mrb[4].mxu0 }
 0x1ba   :  { %3937 = vmatpush1.bf16.msra.mxu0 %v9367_v22  ;;  %4109 = vmatpush1.bf16.msra.mxu1 %v9369_v24  ;;  %v698_v36 = vadd.f32 %v697_v33, %v236_v25  ;;  %v699_v37 = vpop.f32.mrb[5].mxu0  ;;  %v978_v22 = vld [vmem:[#allocation8 + $0x668] sm:$0xff]  ;;  %v740_v54 = vpop.f32.mrb[4].mxu1 }
 0x1bb   :  { %3938 = vmatprep.subr.bf16.mxu0 %v9376_v26  ;;  %4110 = vmatprep.subr.bf16.mxu1 %v9378_v27  ;;  %v700_v41 = vadd.f32 %v699_v37, %v240_v29  ;;  %v701_v42 = vpop.f32.mrb[6].mxu0  ;;  %v9407_v26 = vcombine.low %v965_v61, %v969_v62  ;;  %v9409_v27 = vcombine.low %v966_v63, %v970_v2  ;;  %v982_v33 = vld [vmem:[#allocation8 + $0x688] sm:$0xff] }
 0x1bc   :  { %10628 = vtanh.f32 %v698_v36  ;;  %v702_v45 = vadd.f32 %v701_v42, %v236_v25  ;;  %v703_v0 = vpop.f32.mrb[7].mxu0  ;;  %v9418_v30 = vcombine.high %v974_v20, %v978_v22  ;;  %v9417_v36 = vcombine.low %v974_v20, %v978_v22  ;;  %v994_v42 = vld [vmem:[#allocation8 + $0x6e8] sm:$0xff]  ;;  %v1017_v22 = vld [vmem:[#allocation8 + $0x7a0] sm:$0xff] }
 0x1bd   :  { %10630 = vtanh.f32 %v700_v41  ;;  %v704_v46 = vadd.f32 %v703_v0, %v240_v29  ;;  %v9416_v29 = vcombine.high %v973_v12, %v977_v19  ;;  %v9424_v37 = vcombine.high %v981_v31, %v985_v32  ;;  %v990_v41 = vld [vmem:[#allocation8 + $0x6c8] sm:$0xff]  ;;  %v997_v0 = vld [vmem:[#allocation8 + $0x700] sm:$0xff] }
 0x1be   :  { %3939 = vmatpush1.bf16.msra.mxu0 %v9375_v34  ;;  %4111 = vmatpush1.bf16.msra.mxu1 %v9377_v35  ;;  %10632 = vtanh.f32 %v702_v45  ;;  %v986_v34 = vld [vmem:[#allocation8 + $0x6a8] sm:$0xff]  ;;  %v9415_v35 = vcombine.low %v973_v12, %v977_v19  ;;  %v9434_v45 = vcombine.high %v990_v41, %v994_v42  ;;  %v244_v63 = vrot.slane %v11167_v17, %v11215_v53  ;;  %v1013_v19 = vld [vmem:[#allocation8 + $0x780] sm:$0xff] }
 0x1bf   :  { %3940 = vmatprep.subr.bf16.mxu0 %v9384_v38  ;;  %4112 = vmatprep.subr.bf16.mxu1 %v9386_v39  ;;  %10634 = vtanh.f32 %v704_v46  ;;  %v9426_v38 = vcombine.high %v982_v33, %v986_v34  ;;  %v989_v39 = vld [vmem:[#allocation8 + $0x6c0] sm:$0xff]  ;;  %v9425_v43 = vcombine.low %v982_v33, %v986_v34  ;;  %v1006_v61 = vld [vmem:[#allocation8 + $0x748] sm:$0xff]  ;;  %v248_v2 = vrot.slane %v11167_v17, %v11218_v55 }
 0x1c0   :  { %v9432_v44 = vcombine.high %v989_v39, %v993_v40  ;;  %v1001_v46 = vld [vmem:[#allocation8 + $0x720] sm:$0xff]  ;;  %v1010_v62 = vld [vmem:[#allocation8 + $0x768] sm:$0xff] }
 0x1c1   :  { %v9440_v56 = vcombine.high %v997_v0, %v1001_v46  ;;  %v1021_v31 = vld [vmem:[#allocation8 + $0x7c0] sm:$0xff]  ;;  %v1022_v33 = vld [vmem:[#allocation8 + $0x7c8] sm:$0xff] }
 0x1c2   :  { %3941 = vmatpush1.bf16.msra.mxu0 %v9383_v49  ;;  %4113 = vmatpush1.bf16.msra.mxu1 %v9385_v50  ;;  %v998_v49 = vld [vmem:[#allocation8 + $0x708] sm:$0xff]  ;;  %v1025_v32 = vld [vmem:[#allocation8 + $0x7e0] sm:$0xff] }
 0x1c3   :  { %3942 = vmatprep.subr.bf16.mxu0 %v9392_v51  ;;  %4114 = vmatprep.subr.bf16.mxu1 %v9394_v52  ;;  %v1002_v50 = vld [vmem:[#allocation8 + $0x728] sm:$0xff]  ;;  %v9431_v51 = vcombine.low %v989_v39, %v993_v40  ;;  %v9433_v52 = vcombine.low %v990_v41, %v994_v42  ;;  %v1029_v39 = vld [vmem:[#allocation8 + $0x800] sm:$0xff] }
 0x1c4   :  { %v1026_v34 = vld [vmem:[#allocation8 + $0x7e8] sm:$0xff]  ;;  %v1033_v40 = vld [vmem:[#allocation8 + $0x820] sm:$0xff] }
 0x1c5   :  { %v1030_v41 = vld [vmem:[#allocation8 + $0x808] sm:$0xff] }
 0x1c6   :  { %v10629_v3 = vpop.eup %10628  ;;  %3943 = vmatpush1.bf16.msra.mxu0 %v9391_v57  ;;  %4115 = vmatpush1.bf16.msra.mxu1 %v9393_v58  ;;  %v9442_v57 = vcombine.high %v998_v49, %v1002_v50  ;;  %v1005_v58 = vld [vmem:[#allocation8 + $0x740] sm:$0xff]  ;;  %v1034_v42 = vld [vmem:[#allocation8 + $0x828] sm:$0xff] }
 0x1c7   :  { %v10631_v8 = vpop.eup %10630  ;;  %3944 = vmatprep.subr.bf16.mxu0 %v9400_v59  ;;  %4116 = vmatprep.subr.bf16.mxu1 %v9402_v60  ;;  %v742_v59 = vpop.f32.mrb[5].mxu1  ;;  %v1009_v60 = vld [vmem:[#allocation8 + $0x760] sm:$0xff] }
 0x1c8   :  { %v10633_v14 = vpop.eup %10632  ;;  %v9448_v12 = vcombine.high %v1005_v58, %v1009_v60  ;;  %v9447_v17 = vcombine.low %v1005_v58, %v1009_v60  ;;  %v9471_v58 = vcombine.low %v1029_v39, %v1033_v40 }
 0x1c9   :  { %v10635_v24 = vpop.eup %10634  ;;  %v11210_v25 = vpack.c.bf16 %v10633_v14, %v10629_v3  ;;  %v744_v3 = vpop.f32.mrb[6].mxu1  ;;  %v9450_v14 = vcombine.high %v1006_v61, %v1010_v62 }
 0x1ca   :  { %3945 = vmatpush1.bf16.msra.mxu0 %v9399_v4  ;;  %4117 = vmatpush1.bf16.msra.mxu1 %v9401_v6  ;;  %v11212_v28 = vpack.c.bf16 %v10635_v24, %v10631_v8  ;;  %v9439_v4 = vcombine.low %v997_v0, %v1001_v46  ;;  %v9441_v6 = vcombine.low %v998_v49, %v1002_v50  ;;  %v746_v15 = vpop.f32.mrb[7].mxu1  ;;  %v1014_v24 = vld [vmem:[#allocation8 + $0x788] sm:$0xff]  ;;  %v1037_v49 = vld [vmem:[#allocation8 + $0x840] sm:$0xff] }
 0x1cb   :  { %3946 = vmatprep.subr.bf16.mxu0 %v9408_v10  ;;  %4118 = vmatprep.subr.bf16.mxu1 %v9410_v11  ;;  %v741_v8 = vadd.f32 %v740_v54, %v244_v63  ;;  %v743_v10 = vadd.f32 %v742_v59, %v248_v2  ;;  %v745_v11 = vadd.f32 %v744_v3, %v244_v63  ;;  %v1042_v54 = vld [vmem:[#allocation8 + $0x868] sm:$0xff]  ;;  %v1045_v63 = vld [vmem:[#allocation8 + $0x880] sm:$0xff] }
 0x1cc   :  { %v747_v20 = vadd.f32 %v746_v15, %v248_v2  ;;  %v9472_v0 = vcombine.high %v1029_v39, %v1033_v40  ;;  %v9474_v46 = vcombine.high %v1030_v41, %v1034_v42  ;;  %v9473_v59 = vcombine.low %v1030_v41, %v1034_v42  ;;  %v1049_v2 = vld [vmem:[#allocation8 + $0x8a0] sm:$0xff]  ;;  %v1046_v3 = vld [vmem:[#allocation8 + $0x888] sm:$0xff] }
 0x1cd   :  { %10636 = vtanh.f32 %v741_v8  ;;  %v9488_v8 = vcombine.high %v1045_v63, %v1049_v2 }
 0x1ce   :  { %3947 = vmatpush1.bf16.msra.mxu0 %v9407_v26  ;;  %4119 = vmatpush1.bf16.msra.mxu1 %v9409_v27  ;;  %v1018_v26 = vld [vmem:[#allocation8 + $0x7a8] sm:$0xff]  ;;  %10638 = vtanh.f32 %v743_v10  ;;  %v9449_v27 = vcombine.low %v1006_v61, %v1010_v62 }
 0x1cf   :  { %3948 = vmatprep.subr.bf16.mxu0 %v9416_v29  ;;  %4120 = vmatprep.subr.bf16.mxu1 %v9418_v30  ;;  %10640 = vtanh.f32 %v745_v11  ;;  %v9456_v29 = vcombine.high %v1013_v19, %v1017_v22  ;;  %v9458_v30 = vcombine.high %v1014_v24, %v1018_v26  ;;  %v1053_v11 = vld [vmem:[#allocation8 + $0x8c0] sm:$0xff] }
 0x1d0   :  { %10642 = vtanh.f32 %v747_v20  ;;  %v9487_v20 = vcombine.low %v1045_v63, %v1049_v2  ;;  %v1093_v63 = vld [vmem:[#allocation8 + $0xa00] sm:$0xff] }
 0x1d1   :  { %v1097_v2 = vld [vmem:[#allocation8 + $0xa20] sm:$0xff] }
 0x1d2   :  { %3949 = vmatpush1.bf16.msra.mxu0 %v9415_v35  ;;  %4121 = vmatpush1.bf16.msra.mxu1 %v9417_v36  ;;  %v9455_v35 = vcombine.low %v1013_v19, %v1017_v22  ;;  %v9457_v36 = vcombine.low %v1014_v24, %v1018_v26  ;;  %v1058_v19 = vld [vmem:[#allocation8 + $0x8e8] sm:$0xff] }
 0x1d3   :  { %3950 = vmatprep.subr.bf16.mxu0 %v9424_v37  ;;  %4122 = vmatprep.subr.bf16.mxu1 %v9426_v38  ;;  %v9464_v37 = vcombine.high %v1021_v31, %v1025_v32  ;;  %v9466_v38 = vcombine.high %v1022_v33, %v1026_v34 }
 0x1d6   :  { %3951 = vmatpush1.bf16.msra.mxu0 %v9423_v7  ;;  %4123 = vmatpush1.bf16.msra.mxu1 %v9425_v43  ;;  %v9463_v43 = vcombine.low %v1021_v31, %v1025_v32 }
 0x1d7   :  { %3952 = vmatprep.subr.bf16.mxu0 %v9432_v44  ;;  %4124 = vmatprep.subr.bf16.mxu1 %v9434_v45  ;;  %v10637_v7 = vpop.eup %10636  ;;  %v9465_v44 = vcombine.low %v1022_v33, %v1026_v34 }
 0x1d8   :  { %v10639_v45 = vpop.eup %10638 }
 0x1d9   :  { %v10641_v50 = vpop.eup %10640 }
 0x1da   :  { %3953 = vmatpush1.bf16.msra.mxu0 %v9431_v51  ;;  %4125 = vmatpush1.bf16.msra.mxu1 %v9433_v52  ;;  %v1041_v51 = vld [vmem:[#allocation8 + $0x860] sm:$0xff]  ;;  %v1038_v52 = vld [vmem:[#allocation8 + $0x848] sm:$0xff] }
 0x1db   :  { %3954 = vmatprep.subr.bf16.mxu0 %v9440_v56  ;;  %4126 = vmatprep.subr.bf16.mxu1 %v9442_v57  ;;  %v10643_v56 = vpop.eup %10642  ;;  %v11224_v57 = vpack.c.bf16 %v10641_v50, %v10637_v7  ;;  %v9480_v61 = vcombine.high %v1037_v49, %v1041_v51  ;;  %v9482_v62 = vcombine.high %v1038_v52, %v1042_v54  ;;  %v1077_v7 = vld [vmem:[#allocation8 + $0x980] sm:$0xff] }
 0x1dc   :  { %v11226_v60 = vpack.c.bf16 %v10643_v56, %v10639_v45  ;;  %v9481_v15 = vcombine.low %v1038_v52, %v1042_v54  ;;  %v1082_v45 = vld [vmem:[#allocation8 + $0x9a8] sm:$0xff]  ;;  %v1089_v52 = vld [vmem:[#allocation8 + $0x9e0] sm:$0xff] }
 0x1dd   :  { %v1086_v54 = vld [vmem:[#allocation8 + $0x9c8] sm:$0xff] }
 0x1de   :  { %3955 = vmatpush1.bf16.msra.mxu0 %v9439_v4  ;;  %4127 = vmatpush1.bf16.msra.mxu1 %v9441_v6  ;;  %v1050_v4 = vld [vmem:[#allocation8 + $0x8a8] sm:$0xff]  ;;  %v9479_v6 = vcombine.low %v1037_v49, %v1041_v51  ;;  %v1085_v51 = vld [vmem:[#allocation8 + $0x9c0] sm:$0xff] }
 0x1df   :  { %3956 = vmatprep.subr.bf16.mxu0 %v9448_v12  ;;  %4128 = vmatprep.subr.bf16.mxu1 %v9450_v14  ;;  %v9490_v10 = vcombine.high %v1046_v3, %v1050_v4  ;;  %v1057_v12 = vld [vmem:[#allocation8 + $0x8e0] sm:$0xff]  ;;  %v1054_v14 = vld [vmem:[#allocation8 + $0x8c8] sm:$0xff]  ;;  %v9489_v22 = vcombine.low %v1046_v3, %v1050_v4 }
 0x1e0   :  { %v9496_v24 = vcombine.high %v1053_v11, %v1057_v12  ;;  %v9498_v26 = vcombine.high %v1054_v14, %v1058_v19  ;;  %v9495_v31 = vcombine.low %v1053_v11, %v1057_v12  ;;  %v9497_v32 = vcombine.low %v1054_v14, %v1058_v19  ;;  %v1090_v56 = vld [vmem:[#allocation8 + $0x9e8] sm:$0xff]  ;;  %v1101_v11 = vld [vmem:[#allocation8 + $0xa40] sm:$0xff] }
 0x1e1   :  { %v1094_v3 = vld [vmem:[#allocation8 + $0xa08] sm:$0xff]  ;;  %v1105_v12 = vld [vmem:[#allocation8 + $0xa60] sm:$0xff] }
 0x1e2   :  { %3957 = vmatpush1.bf16.msra.mxu0 %v9447_v17  ;;  %4129 = vmatpush1.bf16.msra.mxu1 %v9449_v27  ;;  %v1061_v17 = vld [vmem:[#allocation8 + $0x900] sm:$0xff]  ;;  %v1098_v4 = vld [vmem:[#allocation8 + $0xa28] sm:$0xff] }
 0x1e3   :  { %3958 = vmatprep.subr.bf16.mxu0 %v9456_v29  ;;  %4130 = vmatprep.subr.bf16.mxu1 %v9458_v30  ;;  %v1065_v27 = vld [vmem:[#allocation8 + $0x920] sm:$0xff]  ;;  %v1062_v29 = vld [vmem:[#allocation8 + $0x908] sm:$0xff] }
 0x1e4   :  { %v1066_v30 = vld [vmem:[#allocation8 + $0x928] sm:$0xff]  ;;  %v9504_v33 = vcombine.high %v1061_v17, %v1065_v27  ;;  %v9503_v39 = vcombine.low %v1061_v17, %v1065_v27  ;;  %v1109_v17 = vld [vmem:[#allocation8 + $0xa80] sm:$0xff] }
 0x1e5   :  { %v9506_v34 = vcombine.high %v1062_v29, %v1066_v30  ;;  %v9505_v40 = vcombine.low %v1062_v29, %v1066_v30  ;;  %v1102_v14 = vld [vmem:[#allocation8 + $0xa48] sm:$0xff]  ;;  %v1113_v27 = vld [vmem:[#allocation8 + $0xaa0] sm:$0xff] }
 0x1e6   :  { %3959 = vmatpush1.bf16.msra.mxu0 %v9455_v35  ;;  %4131 = vmatpush1.bf16.msra.mxu1 %v9457_v36  ;;  %v1069_v35 = vld [vmem:[#allocation8 + $0x940] sm:$0xff]  ;;  %v1106_v19 = vld [vmem:[#allocation8 + $0xa68] sm:$0xff] }
 0x1e7   :  { %3960 = vmatprep.subr.bf16.mxu0 %v9464_v37  ;;  %4132 = vmatprep.subr.bf16.mxu1 %v9466_v38  ;;  %v1073_v36 = vld [vmem:[#allocation8 + $0x960] sm:$0xff]  ;;  %v1070_v37 = vld [vmem:[#allocation8 + $0x948] sm:$0xff] }
 0x1e8   :  { %v1074_v38 = vld [vmem:[#allocation8 + $0x968] sm:$0xff]  ;;  %v9512_v41 = vcombine.high %v1069_v35, %v1073_v36 }
 0x1e9   :  { %v9514_v42 = vcombine.high %v1070_v37, %v1074_v38  ;;  %v1110_v29 = vld [vmem:[#allocation8 + $0xa88] sm:$0xff] }
 0x1ea   :  { %3961 = vmatpush1.bf16.msra.mxu0 %v9463_v43  ;;  %4133 = vmatpush1.bf16.msra.mxu1 %v9465_v44  ;;  %v1081_v43 = vld [vmem:[#allocation8 + $0x9a0] sm:$0xff]  ;;  %v1078_v44 = vld [vmem:[#allocation8 + $0x988] sm:$0xff] }
 0x1eb   :  { %3973 = vmatprep.subr.bf16.mxu0 %v9472_v0  ;;  %4145 = vmatprep.subr.bf16.mxu1 %v9474_v46  ;;  %v9511_v0 = vcombine.low %v1069_v35, %v1073_v36  ;;  %v9513_v46 = vcombine.low %v1070_v37, %v1074_v38  ;;  %v9520_v49 = vcombine.high %v1077_v7, %v1081_v43  ;;  %v1114_v30 = vld [vmem:[#allocation8 + $0xaa8] sm:$0xff]  ;;  %v1117_v35 = vld [vmem:[#allocation8 + $0xac0] sm:$0xff] }
 0x1ec   :  { %v9522_v50 = vcombine.high %v1078_v44, %v1082_v45  ;;  %v1121_v36 = vld [vmem:[#allocation8 + $0xae0] sm:$0xff]  ;;  %v1118_v37 = vld [vmem:[#allocation8 + $0xac8] sm:$0xff] }
 0x1ed   :  { %3963 = vmatmul.mubr.bf16.vlgmr.msra.gmra.mrb[8].mxu0 %v11194_v1  ;;  %4135 = vmatmul.mubr.bf16.vlgmr.msra.gmra.mrb[8].mxu1 %v11194_v1  ;;  %v1122_v38 = vld [vmem:[#allocation8 + $0xae8] sm:$0xff] }
 0x1ee   :  { %3974 = vmatpush1.bf16.msra.mxu0 %v9471_v58  ;;  %4146 = vmatpush1.bf16.msra.mxu1 %v9473_v59  ;;  %v9519_v58 = vcombine.low %v1077_v7, %v1081_v43  ;;  %v9521_v59 = vcombine.low %v1078_v44, %v1082_v45  ;;  %v1125_v7 = vld [vmem:[#allocation8 + $0xb00] sm:$0xff]  ;;  %v1126_v44 = vld [vmem:[#allocation8 + $0xb08] sm:$0xff] }
 0x1ef   :  { %3975 = vmatprep.subr.bf16.mxu0 %v9480_v61  ;;  %4147 = vmatprep.subr.bf16.mxu1 %v9482_v62  ;;  %v9528_v61 = vcombine.high %v1085_v51, %v1089_v52  ;;  %v9530_v62 = vcombine.high %v1086_v54, %v1090_v56  ;;  %v1129_v43 = vld [vmem:[#allocation8 + $0xb20] sm:$0xff]  ;;  %v1130_v45 = vld [vmem:[#allocation8 + $0xb28] sm:$0xff] }
 0x1f0   :  { %4005 = vmatprep.mubr.bf16.mxu0 %v11212_v28  ;;  %4177 = vmatprep.mubr.bf16.mxu1 %v11212_v28 }
 0x1f2   :  { %3976 = vmatpush1.bf16.msra.mxu0 %v9479_v6  ;;  %4148 = vmatpush1.bf16.msra.mxu1 %v9481_v15  ;;  %v9527_v6 = vcombine.low %v1085_v51, %v1089_v52  ;;  %v9529_v15 = vcombine.low %v1086_v54, %v1090_v56  ;;  %v1133_v51 = vld [vmem:[#allocation8 + $0xb40] sm:$0xff]  ;;  %v1134_v54 = vld [vmem:[#allocation8 + $0xb48] sm:$0xff] }
 0x1f3   :  { %3977 = vmatprep.subr.bf16.mxu0 %v9488_v8  ;;  %4149 = vmatprep.subr.bf16.mxu1 %v9490_v10  ;;  %v9536_v8 = vcombine.high %v1093_v63, %v1097_v2  ;;  %v9538_v10 = vcombine.high %v1094_v3, %v1098_v4  ;;  %v1137_v52 = vld [vmem:[#allocation8 + $0xb60] sm:$0xff]  ;;  %v1138_v56 = vld [vmem:[#allocation8 + $0xb68] sm:$0xff] }
 0x1f6   :  { %3978 = vmatpush1.bf16.msra.mxu0 %v9487_v20  ;;  %4150 = vmatpush1.bf16.msra.mxu1 %v9489_v22  ;;  %v9535_v20 = vcombine.low %v1093_v63, %v1097_v2  ;;  %v9537_v22 = vcombine.low %v1094_v3, %v1098_v4  ;;  %v1141_v63 = vld [vmem:[#allocation8 + $0xb80] sm:$0xff]  ;;  %v1142_v3 = vld [vmem:[#allocation8 + $0xb88] sm:$0xff] }
 0x1f7   :  { %3979 = vmatprep.subr.bf16.mxu0 %v9496_v24  ;;  %4151 = vmatprep.subr.bf16.mxu1 %v9498_v26  ;;  %v9544_v24 = vcombine.high %v1101_v11, %v1105_v12  ;;  %v9546_v26 = vcombine.high %v1102_v14, %v1106_v19  ;;  %v1145_v2 = vld [vmem:[#allocation8 + $0xba0] sm:$0xff]  ;;  %v1146_v4 = vld [vmem:[#allocation8 + $0xba8] sm:$0xff] }
 0x1fa   :  { %3980 = vmatpush1.bf16.msra.mxu0 %v9495_v31  ;;  %4152 = vmatpush1.bf16.msra.mxu1 %v9497_v32  ;;  %v9543_v31 = vcombine.low %v1101_v11, %v1105_v12  ;;  %v9545_v32 = vcombine.low %v1102_v14, %v1106_v19  ;;  %v1149_v11 = vld [vmem:[#allocation8 + $0xbc0] sm:$0xff]  ;;  %v1150_v14 = vld [vmem:[#allocation8 + $0xbc8] sm:$0xff] }
 0x1fb   :  { %3981 = vmatprep.subr.bf16.mxu0 %v9504_v33  ;;  %4153 = vmatprep.subr.bf16.mxu1 %v9506_v34  ;;  %v9552_v33 = vcombine.high %v1109_v17, %v1113_v27  ;;  %v9554_v34 = vcombine.high %v1110_v29, %v1114_v30  ;;  %v1153_v12 = vld [vmem:[#allocation8 + $0xbe0] sm:$0xff]  ;;  %v1154_v19 = vld [vmem:[#allocation8 + $0xbe8] sm:$0xff] }
 0x1fe   :  { %3982 = vmatpush1.bf16.msra.mxu0 %v9503_v39  ;;  %4154 = vmatpush1.bf16.msra.mxu1 %v9505_v40  ;;  %v9551_v39 = vcombine.low %v1109_v17, %v1113_v27  ;;  %v9553_v40 = vcombine.low %v1110_v29, %v1114_v30  ;;  %v1157_v17 = vld [vmem:[#allocation8 + $0xc00] sm:$0xff]  ;;  %v1158_v29 = vld [vmem:[#allocation8 + $0xc08] sm:$0xff] }
 0x1ff   :  { %3983 = vmatprep.subr.bf16.mxu0 %v9512_v41  ;;  %4155 = vmatprep.subr.bf16.mxu1 %v9514_v42  ;;  %v9560_v41 = vcombine.high %v1117_v35, %v1121_v36  ;;  %v9562_v42 = vcombine.high %v1118_v37, %v1122_v38  ;;  %v1161_v27 = vld [vmem:[#allocation8 + $0xc20] sm:$0xff]  ;;  %v1162_v30 = vld [vmem:[#allocation8 + $0xc28] sm:$0xff] }
 0x202   :  { %3984 = vmatpush1.bf16.msra.mxu0 %v9511_v0  ;;  %4156 = vmatpush1.bf16.msra.mxu1 %v9513_v46  ;;  %v9559_v0 = vcombine.low %v1117_v35, %v1121_v36  ;;  %v9561_v46 = vcombine.low %v1118_v37, %v1122_v38  ;;  %v1165_v35 = vld [vmem:[#allocation8 + $0xc40] sm:$0xff]  ;;  %v1166_v37 = vld [vmem:[#allocation8 + $0xc48] sm:$0xff] }
 0x203   :  { %3985 = vmatprep.subr.bf16.mxu0 %v9520_v49  ;;  %4157 = vmatprep.subr.bf16.mxu1 %v9522_v50  ;;  %v9568_v49 = vcombine.high %v1125_v7, %v1129_v43  ;;  %v9570_v50 = vcombine.high %v1126_v44, %v1130_v45  ;;  %v1169_v36 = vld [vmem:[#allocation8 + $0xc60] sm:$0xff]  ;;  %v1170_v38 = vld [vmem:[#allocation8 + $0xc68] sm:$0xff] }
 0x206   :  { %3986 = vmatpush1.bf16.msra.mxu0 %v9519_v58  ;;  %4158 = vmatpush1.bf16.msra.mxu1 %v9521_v59  ;;  %v9567_v58 = vcombine.low %v1125_v7, %v1129_v43  ;;  %v9569_v59 = vcombine.low %v1126_v44, %v1130_v45  ;;  %v1173_v7 = vld [vmem:[#allocation8 + $0xc80] sm:$0xff]  ;;  %v1174_v44 = vld [vmem:[#allocation8 + $0xc88] sm:$0xff] }
 0x207   :  { %3987 = vmatprep.subr.bf16.mxu0 %v9528_v61  ;;  %4159 = vmatprep.subr.bf16.mxu1 %v9530_v62  ;;  %v9576_v61 = vcombine.high %v1133_v51, %v1137_v52  ;;  %v9578_v62 = vcombine.high %v1134_v54, %v1138_v56  ;;  %v1177_v43 = vld [vmem:[#allocation8 + $0xca0] sm:$0xff]  ;;  %v1178_v45 = vld [vmem:[#allocation8 + $0xca8] sm:$0xff] }
 0x20a   :  { %3988 = vmatpush1.bf16.msra.mxu0 %v9527_v6  ;;  %4160 = vmatpush1.bf16.msra.mxu1 %v9529_v15  ;;  %v9575_v6 = vcombine.low %v1133_v51, %v1137_v52  ;;  %v9577_v15 = vcombine.low %v1134_v54, %v1138_v56  ;;  %v1181_v51 = vld [vmem:[#allocation8 + $0xcc0] sm:$0xff]  ;;  %v1182_v54 = vld [vmem:[#allocation8 + $0xcc8] sm:$0xff] }
 0x20b   :  { %3989 = vmatprep.subr.bf16.mxu0 %v9536_v8  ;;  %4161 = vmatprep.subr.bf16.mxu1 %v9538_v10  ;;  %v9584_v8 = vcombine.high %v1141_v63, %v1145_v2  ;;  %v9586_v10 = vcombine.high %v1142_v3, %v1146_v4  ;;  %v1185_v52 = vld [vmem:[#allocation8 + $0xce0] sm:$0xff]  ;;  %v1186_v56 = vld [vmem:[#allocation8 + $0xce8] sm:$0xff] }
 0x20e   :  { %3990 = vmatpush1.bf16.msra.mxu0 %v9535_v20  ;;  %4162 = vmatpush1.bf16.msra.mxu1 %v9537_v22  ;;  %v9583_v20 = vcombine.low %v1141_v63, %v1145_v2  ;;  %v9585_v22 = vcombine.low %v1142_v3, %v1146_v4  ;;  %v1189_v63 = vld [vmem:[#allocation8 + $0xd00] sm:$0xff]  ;;  %v1190_v3 = vld [vmem:[#allocation8 + $0xd08] sm:$0xff] }
 0x20f   :  { %3991 = vmatprep.subr.bf16.mxu0 %v9544_v24  ;;  %4163 = vmatprep.subr.bf16.mxu1 %v9546_v26  ;;  %v9592_v24 = vcombine.high %v1149_v11, %v1153_v12  ;;  %v9594_v26 = vcombine.high %v1150_v14, %v1154_v19  ;;  %v1193_v2 = vld [vmem:[#allocation8 + $0xd20] sm:$0xff]  ;;  %v1194_v4 = vld [vmem:[#allocation8 + $0xd28] sm:$0xff] }
 0x212   :  { %3992 = vmatpush1.bf16.msra.mxu0 %v9543_v31  ;;  %4164 = vmatpush1.bf16.msra.mxu1 %v9545_v32  ;;  %v9591_v31 = vcombine.low %v1149_v11, %v1153_v12  ;;  %v9593_v32 = vcombine.low %v1150_v14, %v1154_v19  ;;  %v1197_v11 = vld [vmem:[#allocation8 + $0xd40] sm:$0xff]  ;;  %v1198_v14 = vld [vmem:[#allocation8 + $0xd48] sm:$0xff] }
 0x213   :  { %3993 = vmatprep.subr.bf16.mxu0 %v9552_v33  ;;  %4165 = vmatprep.subr.bf16.mxu1 %v9554_v34  ;;  %v9600_v33 = vcombine.high %v1157_v17, %v1161_v27  ;;  %v9602_v34 = vcombine.high %v1158_v29, %v1162_v30  ;;  %v1201_v12 = vld [vmem:[#allocation8 + $0xd60] sm:$0xff]  ;;  %v1202_v19 = vld [vmem:[#allocation8 + $0xd68] sm:$0xff] }
 0x216   :  { %3994 = vmatpush1.bf16.msra.mxu0 %v9551_v39  ;;  %4166 = vmatpush1.bf16.msra.mxu1 %v9553_v40  ;;  %v9599_v39 = vcombine.low %v1157_v17, %v1161_v27  ;;  %v9601_v40 = vcombine.low %v1158_v29, %v1162_v30  ;;  %v1205_v17 = vld [vmem:[#allocation8 + $0xd80] sm:$0xff]  ;;  %v1206_v29 = vld [vmem:[#allocation8 + $0xd88] sm:$0xff] }
 0x217   :  { %3995 = vmatprep.subr.bf16.mxu0 %v9560_v41  ;;  %4167 = vmatprep.subr.bf16.mxu1 %v9562_v42  ;;  %v9608_v41 = vcombine.high %v1165_v35, %v1169_v36  ;;  %v9610_v42 = vcombine.high %v1166_v37, %v1170_v38  ;;  %v1209_v27 = vld [vmem:[#allocation8 + $0xda0] sm:$0xff]  ;;  %v1210_v30 = vld [vmem:[#allocation8 + $0xda8] sm:$0xff] }
 0x21a   :  { %3996 = vmatpush1.bf16.msra.mxu0 %v9559_v0  ;;  %4168 = vmatpush1.bf16.msra.mxu1 %v9561_v46  ;;  %v9607_v0 = vcombine.low %v1165_v35, %v1169_v36  ;;  %v9609_v46 = vcombine.low %v1166_v37, %v1170_v38  ;;  %v1213_v35 = vld [vmem:[#allocation8 + $0xdc0] sm:$0xff]  ;;  %v1214_v37 = vld [vmem:[#allocation8 + $0xdc8] sm:$0xff] }
 0x21b   :  { %3997 = vmatprep.subr.bf16.mxu0 %v9568_v49  ;;  %4169 = vmatprep.subr.bf16.mxu1 %v9570_v50  ;;  %v9616_v49 = vcombine.high %v1173_v7, %v1177_v43  ;;  %v9618_v50 = vcombine.high %v1174_v44, %v1178_v45  ;;  %v1217_v36 = vld [vmem:[#allocation8 + $0xde0] sm:$0xff]  ;;  %v1218_v38 = vld [vmem:[#allocation8 + $0xde8] sm:$0xff] }
 0x21e   :  { %3998 = vmatpush1.bf16.msra.mxu0 %v9567_v58  ;;  %4170 = vmatpush1.bf16.msra.mxu1 %v9569_v59  ;;  %v9615_v58 = vcombine.low %v1173_v7, %v1177_v43  ;;  %v9617_v59 = vcombine.low %v1174_v44, %v1178_v45  ;;  %v1221_v7 = vld [vmem:[#allocation8 + $0xe00] sm:$0xff]  ;;  %v1222_v44 = vld [vmem:[#allocation8 + $0xe08] sm:$0xff] }
 0x21f   :  { %3999 = vmatprep.subr.bf16.mxu0 %v9576_v61  ;;  %4171 = vmatprep.subr.bf16.mxu1 %v9578_v62  ;;  %v9624_v61 = vcombine.high %v1181_v51, %v1185_v52  ;;  %v9626_v62 = vcombine.high %v1182_v54, %v1186_v56  ;;  %v1225_v43 = vld [vmem:[#allocation8 + $0xe20] sm:$0xff]  ;;  %v1226_v45 = vld [vmem:[#allocation8 + $0xe28] sm:$0xff] }
 0x222   :  { %4000 = vmatpush1.bf16.msra.mxu0 %v9575_v6  ;;  %4172 = vmatpush1.bf16.msra.mxu1 %v9577_v15  ;;  %v9623_v6 = vcombine.low %v1181_v51, %v1185_v52  ;;  %v9625_v15 = vcombine.low %v1182_v54, %v1186_v56  ;;  %v1229_v51 = vld [vmem:[#allocation8 + $0xe40] sm:$0xff]  ;;  %v1230_v54 = vld [vmem:[#allocation8 + $0xe48] sm:$0xff] }
 0x223   :  { %4001 = vmatprep.subr.bf16.mxu0 %v9584_v8  ;;  %4173 = vmatprep.subr.bf16.mxu1 %v9586_v10  ;;  %v9632_v8 = vcombine.high %v1189_v63, %v1193_v2  ;;  %v9634_v10 = vcombine.high %v1190_v3, %v1194_v4  ;;  %v1233_v52 = vld [vmem:[#allocation8 + $0xe60] sm:$0xff]  ;;  %v1234_v56 = vld [vmem:[#allocation8 + $0xe68] sm:$0xff] }
 0x226   :  { %4002 = vmatpush1.bf16.msra.mxu0 %v9583_v20  ;;  %4174 = vmatpush1.bf16.msra.mxu1 %v9585_v22  ;;  %v9631_v20 = vcombine.low %v1189_v63, %v1193_v2  ;;  %v9633_v22 = vcombine.low %v1190_v3, %v1194_v4  ;;  %v1237_v63 = vld [vmem:[#allocation8 + $0xe80] sm:$0xff]  ;;  %v1238_v3 = vld [vmem:[#allocation8 + $0xe88] sm:$0xff] }
 0x227   :  { %4003 = vmatprep.subr.bf16.mxu0 %v9592_v24  ;;  %4175 = vmatprep.subr.bf16.mxu1 %v9594_v26  ;;  %v9640_v24 = vcombine.high %v1197_v11, %v1201_v12  ;;  %v9642_v26 = vcombine.high %v1198_v14, %v1202_v19  ;;  %v1241_v2 = vld [vmem:[#allocation8 + $0xea0] sm:$0xff]  ;;  %v1242_v4 = vld [vmem:[#allocation8 + $0xea8] sm:$0xff] }
 0x22a   :  { %4004 = vmatpush1.bf16.msra.mxu0 %v9591_v31  ;;  %4176 = vmatpush1.bf16.msra.mxu1 %v9593_v32  ;;  %v9639_v31 = vcombine.low %v1197_v11, %v1201_v12  ;;  %v9641_v32 = vcombine.low %v1198_v14, %v1202_v19  ;;  %v1245_v11 = vld [vmem:[#allocation8 + $0xec0] sm:$0xff]  ;;  %v1246_v14 = vld [vmem:[#allocation8 + $0xec8] sm:$0xff] }
 0x22b   :  { %4016 = vmatprep.subr.bf16.mxu0 %v9600_v33  ;;  %4188 = vmatprep.subr.bf16.mxu1 %v9602_v34  ;;  %v9648_v33 = vcombine.high %v1205_v17, %v1209_v27  ;;  %v9650_v34 = vcombine.high %v1206_v29, %v1210_v30  ;;  %v1249_v12 = vld [vmem:[#allocation8 + $0xee0] sm:$0xff]  ;;  %v1250_v19 = vld [vmem:[#allocation8 + $0xee8] sm:$0xff] }
 0x22d   :  { %4006 = vmatmul.mubr.bf16.vlgmr.msra.gmra.mrb[8].mxu0 %v11210_v25  ;;  %4178 = vmatmul.mubr.bf16.vlgmr.msra.gmra.mrb[8].mxu1 %v11210_v25 }
 0x22e   :  { %4017 = vmatpush1.bf16.msra.mxu0 %v9599_v39  ;;  %4189 = vmatpush1.bf16.msra.mxu1 %v9601_v40  ;;  %v9647_v39 = vcombine.low %v1205_v17, %v1209_v27  ;;  %v9649_v40 = vcombine.low %v1206_v29, %v1210_v30  ;;  %v1253_v17 = vld [vmem:[#allocation8 + $0xf00] sm:$0xff]  ;;  %v1254_v29 = vld [vmem:[#allocation8 + $0xf08] sm:$0xff] }
 0x22f   :  { %4018 = vmatprep.subr.bf16.mxu0 %v9608_v41  ;;  %4190 = vmatprep.subr.bf16.mxu1 %v9610_v42  ;;  %v9656_v41 = vcombine.high %v1213_v35, %v1217_v36  ;;  %v9658_v42 = vcombine.high %v1214_v37, %v1218_v38  ;;  %v1257_v27 = vld [vmem:[#allocation8 + $0xf20] sm:$0xff]  ;;  %v1258_v30 = vld [vmem:[#allocation8 + $0xf28] sm:$0xff] }
 0x230   :  { %4048 = vmatprep.mubr.bf16.mxu0 %v11226_v60  ;;  %4220 = vmatprep.mubr.bf16.mxu1 %v11226_v60 }
 0x232   :  { %4019 = vmatpush1.bf16.msra.mxu0 %v9607_v0  ;;  %4191 = vmatpush1.bf16.msra.mxu1 %v9609_v46  ;;  %v9655_v0 = vcombine.low %v1213_v35, %v1217_v36  ;;  %v9657_v46 = vcombine.low %v1214_v37, %v1218_v38  ;;  %v1261_v35 = vld [vmem:[#allocation8 + $0xf40] sm:$0xff]  ;;  %v1262_v37 = vld [vmem:[#allocation8 + $0xf48] sm:$0xff] }
 0x233   :  { %4020 = vmatprep.subr.bf16.mxu0 %v9616_v49  ;;  %4192 = vmatprep.subr.bf16.mxu1 %v9618_v50  ;;  %v9664_v49 = vcombine.high %v1221_v7, %v1225_v43  ;;  %v9666_v50 = vcombine.high %v1222_v44, %v1226_v45  ;;  %v1265_v36 = vld [vmem:[#allocation8 + $0xf60] sm:$0xff]  ;;  %v1266_v38 = vld [vmem:[#allocation8 + $0xf68] sm:$0xff] }
 0x236   :  { %4021 = vmatpush1.bf16.msra.mxu0 %v9615_v58  ;;  %4193 = vmatpush1.bf16.msra.mxu1 %v9617_v59  ;;  %v9663_v58 = vcombine.low %v1221_v7, %v1225_v43  ;;  %v9665_v59 = vcombine.low %v1222_v44, %v1226_v45  ;;  %v1269_v7 = vld [vmem:[#allocation8 + $0xf80] sm:$0xff]  ;;  %v1270_v44 = vld [vmem:[#allocation8 + $0xf88] sm:$0xff] }
 0x237   :  { %4022 = vmatprep.subr.bf16.mxu0 %v9624_v61  ;;  %4194 = vmatprep.subr.bf16.mxu1 %v9626_v62  ;;  %v9672_v61 = vcombine.high %v1229_v51, %v1233_v52  ;;  %v9674_v62 = vcombine.high %v1230_v54, %v1234_v56  ;;  %v1273_v43 = vld [vmem:[#allocation8 + $0xfa0] sm:$0xff]  ;;  %v1274_v45 = vld [vmem:[#allocation8 + $0xfa8] sm:$0xff] }
 0x23a   :  { %4023 = vmatpush1.bf16.msra.mxu0 %v9623_v6  ;;  %4195 = vmatpush1.bf16.msra.mxu1 %v9625_v15  ;;  %v9671_v6 = vcombine.low %v1229_v51, %v1233_v52  ;;  %v9673_v15 = vcombine.low %v1230_v54, %v1234_v56  ;;  %v1277_v51 = vld [vmem:[#allocation8 + $0xfc0] sm:$0xff]  ;;  %v1278_v54 = vld [vmem:[#allocation8 + $0xfc8] sm:$0xff] }
 0x23b   :  { %4024 = vmatprep.subr.bf16.mxu0 %v9632_v8  ;;  %4196 = vmatprep.subr.bf16.mxu1 %v9634_v10  ;;  %v9680_v8 = vcombine.high %v1237_v63, %v1241_v2  ;;  %v9682_v10 = vcombine.high %v1238_v3, %v1242_v4  ;;  %v1281_v52 = vld [vmem:[#allocation8 + $0xfe0] sm:$0xff]  ;;  %v1282_v56 = vld [vmem:[#allocation8 + $0xfe8] sm:$0xff] }
 0x23e   :  { %4025 = vmatpush1.bf16.msra.mxu0 %v9631_v20  ;;  %4197 = vmatpush1.bf16.msra.mxu1 %v9633_v22  ;;  %v9679_v20 = vcombine.low %v1237_v63, %v1241_v2  ;;  %v9681_v22 = vcombine.low %v1238_v3, %v1242_v4  ;;  %v775_v63 = vld [vmem:[#allocation8 + $0x10] sm:$0xff]  ;;  %v776_v3 = vld [vmem:[#allocation8 + $0x18] sm:$0xff] }
 0x23f   :  { %4026 = vmatprep.subr.bf16.mxu0 %v9640_v24  ;;  %4198 = vmatprep.subr.bf16.mxu1 %v9642_v26  ;;  %v9688_v24 = vcombine.high %v1245_v11, %v1249_v12  ;;  %v9690_v26 = vcombine.high %v1246_v14, %v1250_v19  ;;  %v779_v2 = vld [vmem:[#allocation8 + $0x30] sm:$0xff]  ;;  %v780_v4 = vld [vmem:[#allocation8 + $0x38] sm:$0xff] }
 0x242   :  { %4027 = vmatpush1.bf16.msra.mxu0 %v9639_v31  ;;  %4199 = vmatpush1.bf16.msra.mxu1 %v9641_v32  ;;  %v9687_v31 = vcombine.low %v1245_v11, %v1249_v12  ;;  %v9689_v32 = vcombine.low %v1246_v14, %v1250_v19  ;;  %v783_v11 = vld [vmem:[#allocation8 + $0x50] sm:$0xff]  ;;  %v784_v14 = vld [vmem:[#allocation8 + $0x58] sm:$0xff] }
 0x243   :  { %4028 = vmatprep.subr.bf16.mxu0 %v9648_v33  ;;  %4200 = vmatprep.subr.bf16.mxu1 %v9650_v34  ;;  %v9696_v33 = vcombine.high %v1253_v17, %v1257_v27  ;;  %v9698_v34 = vcombine.high %v1254_v29, %v1258_v30  ;;  %v787_v12 = vld [vmem:[#allocation8 + $0x70] sm:$0xff]  ;;  %v788_v19 = vld [vmem:[#allocation8 + $0x78] sm:$0xff] }
 0x246   :  { %4029 = vmatpush1.bf16.msra.mxu0 %v9647_v39  ;;  %4201 = vmatpush1.bf16.msra.mxu1 %v9649_v40  ;;  %v9695_v39 = vcombine.low %v1253_v17, %v1257_v27  ;;  %v9697_v40 = vcombine.low %v1254_v29, %v1258_v30  ;;  %v791_v17 = vld [vmem:[#allocation8 + $0x90] sm:$0xff]  ;;  %v792_v29 = vld [vmem:[#allocation8 + $0x98] sm:$0xff] }
 0x247   :  { %4030 = vmatprep.subr.bf16.mxu0 %v9656_v41  ;;  %4202 = vmatprep.subr.bf16.mxu1 %v9658_v42  ;;  %v9704_v41 = vcombine.high %v1261_v35, %v1265_v36  ;;  %v9706_v42 = vcombine.high %v1262_v37, %v1266_v38  ;;  %v795_v27 = vld [vmem:[#allocation8 + $0xb0] sm:$0xff]  ;;  %v796_v30 = vld [vmem:[#allocation8 + $0xb8] sm:$0xff] }
 0x24a   :  { %4031 = vmatpush1.bf16.msra.mxu0 %v9655_v0  ;;  %4203 = vmatpush1.bf16.msra.mxu1 %v9657_v46  ;;  %v9703_v0 = vcombine.low %v1261_v35, %v1265_v36  ;;  %v9705_v46 = vcombine.low %v1262_v37, %v1266_v38  ;;  %v799_v35 = vld [vmem:[#allocation8 + $0xd0] sm:$0xff]  ;;  %v800_v37 = vld [vmem:[#allocation8 + $0xd8] sm:$0xff] }
 0x24b   :  { %4032 = vmatprep.subr.bf16.mxu0 %v9664_v49  ;;  %4204 = vmatprep.subr.bf16.mxu1 %v9666_v50  ;;  %v9712_v49 = vcombine.high %v1269_v7, %v1273_v43  ;;  %v9714_v50 = vcombine.high %v1270_v44, %v1274_v45  ;;  %v803_v36 = vld [vmem:[#allocation8 + $0xf0] sm:$0xff]  ;;  %v804_v38 = vld [vmem:[#allocation8 + $0xf8] sm:$0xff] }
 0x24e   :  { %4033 = vmatpush1.bf16.msra.mxu0 %v9663_v58  ;;  %4205 = vmatpush1.bf16.msra.mxu1 %v9665_v59  ;;  %v9711_v58 = vcombine.low %v1269_v7, %v1273_v43  ;;  %v9713_v59 = vcombine.low %v1270_v44, %v1274_v45  ;;  %v807_v7 = vld [vmem:[#allocation8 + $0x110] sm:$0xff]  ;;  %v812_v44 = vld [vmem:[#allocation8 + $0x138] sm:$0xff]  ;;  %v9243_v45 = vcombine.low %v799_v35, %v803_v36 }
 0x24f   :  { %4034 = vmatprep.subr.bf16.mxu0 %v9672_v61  ;;  %4206 = vmatprep.subr.bf16.mxu1 %v9674_v62  ;;  %v9720_v61 = vcombine.high %v1277_v51, %v1281_v52  ;;  %v9722_v62 = vcombine.high %v1278_v54, %v1282_v56  ;;  %v811_v43 = vld [vmem:[#allocation8 + $0x130] sm:$0xff] }
 0x252   :  { %4035 = vmatpush1.bf16.msra.mxu0 %v9671_v6  ;;  %4207 = vmatpush1.bf16.msra.mxu1 %v9673_v15  ;;  %v9719_v6 = vcombine.low %v1277_v51, %v1281_v52  ;;  %v9721_v15 = vcombine.low %v1278_v54, %v1282_v56  ;;  %v819_v51 = vld [vmem:[#allocation8 + $0x170] sm:$0xff]  ;;  %v816_v52 = vld [vmem:[#allocation8 + $0x158] sm:$0xff]  ;;  %v9251_v56 = vcombine.low %v807_v7, %v811_v43 }
 0x253   :  { %4036 = vmatprep.subr.bf16.mxu0 %v9680_v8  ;;  %4208 = vmatprep.subr.bf16.mxu1 %v9682_v10  ;;  %v9220_v8 = vcombine.high %v775_v63, %v779_v2  ;;  %v9222_v10 = vcombine.high %v776_v3, %v780_v4  ;;  %v820_v54 = vld [vmem:[#allocation8 + $0x178] sm:$0xff] }
 0x256   :  { %4037 = vmatpush1.bf16.msra.mxu0 %v9679_v20  ;;  %4209 = vmatpush1.bf16.msra.mxu1 %v9681_v22  ;;  %v9219_v20 = vcombine.low %v775_v63, %v779_v2  ;;  %v9221_v22 = vcombine.low %v776_v3, %v780_v4  ;;  %v827_v63 = vld [vmem:[#allocation8 + $0x1b0] sm:$0xff]  ;;  %v824_v2 = vld [vmem:[#allocation8 + $0x198] sm:$0xff] }
 0x257   :  { %4038 = vmatprep.subr.bf16.mxu0 %v9688_v24  ;;  %4210 = vmatprep.subr.bf16.mxu1 %v9690_v26  ;;  %v9228_v24 = vcombine.high %v783_v11, %v787_v12  ;;  %v9230_v26 = vcombine.high %v784_v14, %v788_v19  ;;  %v828_v3 = vld [vmem:[#allocation8 + $0x1b8] sm:$0xff] }
 0x25a   :  { %4039 = vmatpush1.bf16.msra.mxu0 %v9687_v31  ;;  %4211 = vmatpush1.bf16.msra.mxu1 %v9689_v32  ;;  %v9227_v31 = vcombine.low %v783_v11, %v787_v12  ;;  %v9229_v32 = vcombine.low %v784_v14, %v788_v19  ;;  %v835_v11 = vld [vmem:[#allocation8 + $0x1f0] sm:$0xff]  ;;  %v832_v12 = vld [vmem:[#allocation8 + $0x1d8] sm:$0xff] }
 0x25b   :  { %4040 = vmatprep.subr.bf16.mxu0 %v9696_v33  ;;  %4212 = vmatprep.subr.bf16.mxu1 %v9698_v34  ;;  %v9236_v33 = vcombine.high %v791_v17, %v795_v27  ;;  %v9238_v34 = vcombine.high %v792_v29, %v796_v30  ;;  %v836_v14 = vld [vmem:[#allocation8 + $0x1f8] sm:$0xff] }
 0x25e   :  { %4041 = vmatpush1.bf16.msra.mxu0 %v9695_v39  ;;  %4213 = vmatpush1.bf16.msra.mxu1 %v9697_v40  ;;  %v9235_v39 = vcombine.low %v791_v17, %v795_v27  ;;  %v9237_v40 = vcombine.low %v792_v29, %v796_v30  ;;  %v843_v17 = vld [vmem:[#allocation8 + $0x230] sm:$0xff]  ;;  %v840_v27 = vld [vmem:[#allocation8 + $0x218] sm:$0xff] }
 0x25f   :  { %4042 = vmatprep.subr.bf16.mxu0 %v9704_v41  ;;  %4214 = vmatprep.subr.bf16.mxu1 %v9706_v42  ;;  %v9244_v41 = vcombine.high %v799_v35, %v803_v36  ;;  %v9246_v42 = vcombine.high %v800_v37, %v804_v38  ;;  %v844_v29 = vld [vmem:[#allocation8 + $0x238] sm:$0xff]  ;;  %v851_v35 = vld [vmem:[#allocation8 + $0x270] sm:$0xff] }
 0x260   :  { %v848_v36 = vld [vmem:[#allocation8 + $0x258] sm:$0xff] }
 0x262   :  { %4043 = vmatpush1.bf16.msra.mxu0 %v9703_v0  ;;  %4215 = vmatpush1.bf16.msra.mxu1 %v9705_v46  ;;  %v9245_v0 = vcombine.low %v800_v37, %v804_v38  ;;  %v9252_v46 = vcombine.high %v807_v7, %v811_v43  ;;  %v852_v37 = vld [vmem:[#allocation8 + $0x278] sm:$0xff]  ;;  %v859_v7 = vld [vmem:[#allocation8 + $0x2b0] sm:$0xff] }
 0x263   :  { %4044 = vmatprep.subr.bf16.mxu0 %v9712_v49  ;;  %4216 = vmatprep.subr.bf16.mxu1 %v9714_v50  ;;  %v815_v50 = vld [vmem:[#allocation8 + $0x150] sm:$0xff]  ;;  %v856_v43 = vld [vmem:[#allocation8 + $0x298] sm:$0xff] }
 0x264   :  { %v9259_v4 = vcombine.low %v815_v50, %v819_v51 }
 0x266   :  { %4045 = vmatpush1.bf16.msra.mxu0 %v9711_v58  ;;  %4217 = vmatpush1.bf16.msra.mxu1 %v9713_v59  ;;  %v9260_v59 = vcombine.high %v815_v50, %v819_v51  ;;  %v867_v50 = vld [vmem:[#allocation8 + $0x2f0] sm:$0xff]  ;;  %v864_v51 = vld [vmem:[#allocation8 + $0x2d8] sm:$0xff] }
 0x267   :  { %4046 = vmatprep.subr.bf16.mxu0 %v9720_v61  ;;  %4218 = vmatprep.subr.bf16.mxu1 %v9722_v62  ;;  %v9262_v61 = vcombine.high %v816_v52, %v820_v54  ;;  %v823_v62 = vld [vmem:[#allocation8 + $0x190] sm:$0xff] }
 0x268   :  { %v9267_v19 = vcombine.low %v823_v62, %v827_v63 }
 0x26a   :  { %4047 = vmatpush1.bf16.msra.mxu0 %v9719_v6  ;;  %4219 = vmatpush1.bf16.msra.mxu1 %v9721_v15  ;;  %v9261_v6 = vcombine.low %v816_v52, %v820_v54  ;;  %v9268_v15 = vcombine.high %v823_v62, %v827_v63  ;;  %v868_v52 = vld [vmem:[#allocation8 + $0x2f8] sm:$0xff]  ;;  %v875_v62 = vld [vmem:[#allocation8 + $0x330] sm:$0xff] }
 0x26b   :  { %4231 = vmatprep.subr.bf16.mxu0 %v9220_v8  ;;  %4403 = vmatprep.subr.bf16.mxu1 %v9222_v10  ;;  %v9270_v8 = vcombine.high %v824_v2, %v828_v3  ;;  %v831_v10 = vld [vmem:[#allocation8 + $0x1d0] sm:$0xff]  ;;  %v872_v63 = vld [vmem:[#allocation8 + $0x318] sm:$0xff] }
 0x26c   :  { %v9275_v30 = vcombine.low %v831_v10, %v835_v11 }
 0x26d   :  { %4049 = vmatmul.mubr.bf16.vlgmr.msra.gmra.mrb[8].mxu0 %v11224_v57  ;;  %4221 = vmatmul.mubr.bf16.vlgmr.msra.gmra.mrb[8].mxu1 %v11224_v57 }
 0x26e   :  { %4232 = vmatpush1.bf16.msra.mxu0 %v9219_v20  ;;  %4263 = vmatprep.mubr.bf16.mxu0 %v11188_v48  ;;  %v9269_v20 = vcombine.low %v824_v2, %v828_v3  ;;  %v876_v2 = vld [vmem:[#allocation8 + $0x338] sm:$0xff] }
 0x26f   :  { %4404 = vmatpush1.bf16.msra.mxu1 %v9221_v22  ;;  %4435 = vmatprep.mubr.bf16.mxu1 %v11188_v48  ;;  %v808_v48 = vld [vmem:[#allocation8 + $0x118] sm:$0xff]  ;;  %v9276_v22 = vcombine.high %v831_v10, %v835_v11  ;;  %v883_v10 = vld [vmem:[#allocation8 + $0x370] sm:$0xff] }
 0x270   :  { %4233 = vmatprep.subr.bf16.mxu0 %v9228_v24  ;;  %4405 = vmatprep.subr.bf16.mxu1 %v9230_v26  ;;  %v9254_v49 = vcombine.high %v808_v48, %v812_v44  ;;  %v9253_v58 = vcombine.low %v808_v48, %v812_v44  ;;  %v9278_v24 = vcombine.high %v832_v12, %v836_v14  ;;  %v839_v26 = vld [vmem:[#allocation8 + $0x210] sm:$0xff]  ;;  %v860_v48 = vld [vmem:[#allocation8 + $0x2b8] sm:$0xff] }
 0x271   :  { %v9283_v38 = vcombine.low %v839_v26, %v843_v17  ;;  %v880_v11 = vld [vmem:[#allocation8 + $0x358] sm:$0xff] }
 0x272   :  { %4234 = vmatpush1.bf16.msra.mxu0 %v9227_v31  ;;  %v9277_v31 = vcombine.low %v832_v12, %v836_v14  ;;  %v884_v12 = vld [vmem:[#allocation8 + $0x378] sm:$0xff] }
 0x273   :  { %4406 = vmatpush1.bf16.msra.mxu1 %v9229_v32  ;;  %4235 = vmatprep.subr.bf16.mxu0 %v9236_v33  ;;  %v9284_v32 = vcombine.high %v839_v26, %v843_v17  ;;  %v9286_v33 = vcombine.high %v840_v27, %v844_v29  ;;  %v891_v26 = vld [vmem:[#allocation8 + $0x3b0] sm:$0xff]  ;;  %v888_v17 = vld [vmem:[#allocation8 + $0x398] sm:$0xff] }
 0x274   :  { %4407 = vmatprep.subr.bf16.mxu1 %v9238_v34  ;;  %v847_v34 = vld [vmem:[#allocation8 + $0x250] sm:$0xff] }
 0x275   :  { %v9291_v44 = vcombine.low %v847_v34, %v851_v35 }
 0x276   :  { %4236 = vmatpush1.bf16.msra.mxu0 %v9235_v39  ;;  %v9285_v39 = vcombine.low %v840_v27, %v844_v29  ;;  %v892_v27 = vld [vmem:[#allocation8 + $0x3b8] sm:$0xff] }
 0x277   :  { %4408 = vmatpush1.bf16.msra.mxu1 %v9237_v40  ;;  %4237 = vmatprep.subr.bf16.mxu0 %v9244_v41  ;;  %v9292_v40 = vcombine.high %v847_v34, %v851_v35  ;;  %v9294_v41 = vcombine.high %v848_v36, %v852_v37  ;;  %v899_v34 = vld [vmem:[#allocation8 + $0x3f0] sm:$0xff]  ;;  %v896_v35 = vld [vmem:[#allocation8 + $0x3d8] sm:$0xff] }
 0x278   :  { %4409 = vmatprep.subr.bf16.mxu1 %v9246_v42  ;;  %v855_v42 = vld [vmem:[#allocation8 + $0x290] sm:$0xff] }
 0x279   :  { %v9299_v54 = vcombine.low %v855_v42, %v859_v7 }
 0x27a   :  { %4238 = vmatpush1.bf16.msra.mxu0 %v9243_v45  ;;  %v9293_v45 = vcombine.low %v848_v36, %v852_v37  ;;  %v900_v36 = vld [vmem:[#allocation8 + $0x3f8] sm:$0xff] }
 0x27b   :  { %4410 = vmatpush1.bf16.msra.mxu1 %v9245_v0  ;;  %4239 = vmatprep.subr.bf16.mxu0 %v9252_v46  ;;  %v9300_v0 = vcombine.high %v855_v42, %v859_v7  ;;  %v9302_v46 = vcombine.high %v856_v43, %v860_v48  ;;  %v907_v42 = vld [vmem:[#allocation8 + $0x430] sm:$0xff]  ;;  %v904_v7 = vld [vmem:[#allocation8 + $0x418] sm:$0xff] }
 0x27c   :  { %4411 = vmatprep.subr.bf16.mxu1 %v9254_v49  ;;  %v863_v49 = vld [vmem:[#allocation8 + $0x2d0] sm:$0xff] }
 0x27d   :  { %v9307_v3 = vcombine.low %v863_v49, %v867_v50 }
 0x27e   :  { %4240 = vmatpush1.bf16.msra.mxu0 %v9251_v56  ;;  %v9301_v56 = vcombine.low %v856_v43, %v860_v48  ;;  %v908_v43 = vld [vmem:[#allocation8 + $0x438] sm:$0xff] }
 0x27f   :  { %4412 = vmatpush1.bf16.msra.mxu1 %v9253_v58  ;;  %4241 = vmatprep.subr.bf16.mxu0 %v9260_v59  ;;  %v9308_v58 = vcombine.high %v863_v49, %v867_v50  ;;  %v9310_v59 = vcombine.high %v864_v51, %v868_v52  ;;  %v915_v49 = vld [vmem:[#allocation8 + $0x470] sm:$0xff] }
 0x280   :  { %4413 = vmatprep.subr.bf16.mxu1 %v9262_v61  ;;  %v871_v61 = vld [vmem:[#allocation8 + $0x310] sm:$0xff] }
 0x281   :  { %v9315_v14 = vcombine.low %v871_v61, %v875_v62 }
 0x282   :  { %4242 = vmatpush1.bf16.msra.mxu0 %v9259_v4  ;;  %v9309_v4 = vcombine.low %v864_v51, %v868_v52  ;;  %v912_v51 = vld [vmem:[#allocation8 + $0x458] sm:$0xff] }
 0x283   :  { %4414 = vmatpush1.bf16.msra.mxu1 %v9261_v6  ;;  %4243 = vmatprep.subr.bf16.mxu0 %v9268_v15  ;;  %v9316_v6 = vcombine.high %v871_v61, %v875_v62  ;;  %v9318_v15 = vcombine.high %v872_v63, %v876_v2  ;;  %v916_v52 = vld [vmem:[#allocation8 + $0x478] sm:$0xff] }
 0x284   :  { %4415 = vmatprep.subr.bf16.mxu1 %v9270_v8  ;;  %v879_v8 = vld [vmem:[#allocation8 + $0x350] sm:$0xff]  ;;  %v9358_v61 = vcombine.high %v912_v51, %v916_v52  ;;  %v920_v62 = vld [vmem:[#allocation8 + $0x498] sm:$0xff] }
 0x285   :  { %v9323_v29 = vcombine.low %v879_v8, %v883_v10 }
 0x286   :  { %4244 = vmatpush1.bf16.msra.mxu0 %v9267_v19  ;;  %v9317_v19 = vcombine.low %v872_v63, %v876_v2  ;;  %v924_v63 = vld [vmem:[#allocation8 + $0x4b8] sm:$0xff] }
 0x287   :  { %4416 = vmatpush1.bf16.msra.mxu1 %v9269_v20  ;;  %4245 = vmatprep.subr.bf16.mxu0 %v9276_v22  ;;  %v9324_v20 = vcombine.high %v879_v8, %v883_v10  ;;  %v9326_v22 = vcombine.high %v880_v11, %v884_v12  ;;  %v931_v8 = vld [vmem:[#allocation8 + $0x4f0] sm:$0xff]  ;;  %v928_v10 = vld [vmem:[#allocation8 + $0x4d8] sm:$0xff] }
 0x288   :  { %4417 = vmatprep.subr.bf16.mxu1 %v9278_v24  ;;  %v887_v24 = vld [vmem:[#allocation8 + $0x390] sm:$0xff] }
 0x289   :  { %v9331_v37 = vcombine.low %v887_v24, %v891_v26 }
 0x28a   :  { %4246 = vmatpush1.bf16.msra.mxu0 %v9275_v30  ;;  %v9325_v30 = vcombine.low %v880_v11, %v884_v12  ;;  %v932_v11 = vld [vmem:[#allocation8 + $0x4f8] sm:$0xff] }
 0x28b   :  { %4418 = vmatpush1.bf16.msra.mxu1 %v9277_v31  ;;  %4247 = vmatprep.subr.bf16.mxu0 %v9284_v32  ;;  %v9332_v31 = vcombine.high %v887_v24, %v891_v26  ;;  %v9334_v32 = vcombine.high %v888_v17, %v892_v27  ;;  %v936_v24 = vld [vmem:[#allocation8 + $0x518] sm:$0xff] }
 0x28c   :  { %4419 = vmatprep.subr.bf16.mxu1 %v9286_v33  ;;  %v895_v33 = vld [vmem:[#allocation8 + $0x3d0] sm:$0xff]  ;;  %v940_v26 = vld [vmem:[#allocation8 + $0x538] sm:$0xff] }
 0x28d   :  { %v9339_v48 = vcombine.low %v895_v33, %v899_v34 }
 0x28e   :  { %4248 = vmatpush1.bf16.msra.mxu0 %v9283_v38  ;;  %v9333_v38 = vcombine.low %v888_v17, %v892_v27  ;;  %v9373_v17 = vcombine.low %v928_v10, %v932_v11 }
 0x28f   :  { %4420 = vmatpush1.bf16.msra.mxu1 %v9285_v39  ;;  %4249 = vmatprep.subr.bf16.mxu0 %v9292_v40  ;;  %v9340_v39 = vcombine.high %v895_v33, %v899_v34  ;;  %v9342_v40 = vcombine.high %v896_v35, %v900_v36  ;;  %v948_v33 = vld [vmem:[#allocation8 + $0x578] sm:$0xff] }
 0x290   :  { %4421 = vmatprep.subr.bf16.mxu1 %v9294_v41  ;;  %v903_v41 = vld [vmem:[#allocation8 + $0x410] sm:$0xff] }
 0x291   :  { %v9347_v50 = vcombine.low %v903_v41, %v907_v42 }
 0x292   :  { %4250 = vmatpush1.bf16.msra.mxu0 %v9291_v44  ;;  %v9341_v44 = vcombine.low %v896_v35, %v900_v36  ;;  %v9381_v35 = vcombine.low %v936_v24, %v940_v26 }
 0x293   :  { %4422 = vmatpush1.bf16.msra.mxu1 %v9293_v45  ;;  %4251 = vmatprep.subr.bf16.mxu0 %v9300_v0  ;;  %v9348_v45 = vcombine.high %v903_v41, %v907_v42  ;;  %v9350_v0 = vcombine.high %v904_v7, %v908_v43  ;;  %v956_v41 = vld [vmem:[#allocation8 + $0x5b8] sm:$0xff] }
 0x294   :  { %4423 = vmatprep.subr.bf16.mxu1 %v9302_v46  ;;  %v911_v46 = vld [vmem:[#allocation8 + $0x450] sm:$0xff] }
 0x295   :  { %v9355_v2 = vcombine.low %v911_v46, %v915_v49 }
 0x296   :  { %4252 = vmatpush1.bf16.msra.mxu0 %v9299_v54  ;;  %v9349_v54 = vcombine.low %v904_v7, %v908_v43 }
 0x297   :  { %4424 = vmatpush1.bf16.msra.mxu1 %v9301_v56  ;;  %4253 = vmatprep.subr.bf16.mxu0 %v9308_v58  ;;  %v9356_v56 = vcombine.high %v911_v46, %v915_v49  ;;  %v919_v58 = vld [vmem:[#allocation8 + $0x490] sm:$0xff]  ;;  %v964_v46 = vld [vmem:[#allocation8 + $0x5f8] sm:$0xff] }
 0x298   :  { %4425 = vmatprep.subr.bf16.mxu1 %v9310_v59  ;;  %v923_v59 = vld [vmem:[#allocation8 + $0x4b0] sm:$0xff] }
 0x299   :  { %v9363_v12 = vcombine.low %v919_v58, %v923_v59 }
 0x29a   :  { %4254 = vmatpush1.bf16.msra.mxu0 %v9307_v3  ;;  %v9357_v3 = vcombine.low %v912_v51, %v916_v52 }
 0x29b   :  { %4426 = vmatpush1.bf16.msra.mxu1 %v9309_v4  ;;  %4255 = vmatprep.subr.bf16.mxu0 %v9316_v6  ;;  %v9364_v4 = vcombine.high %v919_v58, %v923_v59  ;;  %v9366_v6 = vcombine.high %v920_v62, %v924_v63  ;;  %v968_v58 = vld [vmem:[#allocation8 + $0x618] sm:$0xff] }
 0x29c   :  { %4427 = vmatprep.subr.bf16.mxu1 %v9318_v15  ;;  %v927_v15 = vld [vmem:[#allocation8 + $0x4d0] sm:$0xff]  ;;  %v972_v59 = vld [vmem:[#allocation8 + $0x638] sm:$0xff] }
 0x29e   :  { %4256 = vmatpush1.bf16.msra.mxu0 %v9315_v14  ;;  %v9372_v14 = vcombine.high %v927_v15, %v931_v8 }
 0x29f   :  { %4428 = vmatpush1.bf16.msra.mxu1 %v9317_v19  ;;  %4257 = vmatprep.subr.bf16.mxu0 %v9324_v20  ;;  %v9374_v19 = vcombine.high %v928_v10, %v932_v11  ;;  %v935_v20 = vld [vmem:[#allocation8 + $0x510] sm:$0xff]  ;;  %v9413_v10 = vcombine.low %v968_v58, %v972_v59 }
 0x2a0   :  { %4429 = vmatprep.subr.bf16.mxu1 %v9326_v22  ;;  %v939_v22 = vld [vmem:[#allocation8 + $0x530] sm:$0xff] }
 0x2a1   :  { %v9380_v27 = vcombine.high %v935_v20, %v939_v22  ;;  %v9379_v34 = vcombine.low %v935_v20, %v939_v22  ;;  %v988_v20 = vld [vmem:[#allocation8 + $0x6b8] sm:$0xff] }
 0x2a2   :  { %4258 = vmatpush1.bf16.msra.mxu0 %v9323_v29  ;;  %v9382_v29 = vcombine.high %v936_v24, %v940_v26 }
 0x2a3   :  { %4430 = vmatpush1.bf16.msra.mxu1 %v9325_v30  ;;  %4259 = vmatprep.subr.bf16.mxu0 %v9332_v31  ;;  %v943_v30 = vld [vmem:[#allocation8 + $0x550] sm:$0xff] }
 0x2a4   :  { %4431 = vmatprep.subr.bf16.mxu1 %v9334_v32  ;;  %v947_v31 = vld [vmem:[#allocation8 + $0x570] sm:$0xff]  ;;  %v944_v32 = vld [vmem:[#allocation8 + $0x558] sm:$0xff] }
 0x2a5   :  { %v9388_v36 = vcombine.high %v943_v30, %v947_v31  ;;  %v9387_v42 = vcombine.low %v943_v30, %v947_v31  ;;  %v9389_v7 = vcombine.low %v944_v32, %v948_v33  ;;  %v996_v30 = vld [vmem:[#allocation8 + $0x6f8] sm:$0xff] }
 0x2a6   :  { %4260 = vmatpush1.bf16.msra.mxu0 %v9331_v37  ;;  %v9390_v37 = vcombine.high %v944_v32, %v948_v33 }
 0x2a7   :  { %4432 = vmatpush1.bf16.msra.mxu1 %v9333_v38  ;;  %4261 = vmatprep.subr.bf16.mxu0 %v9340_v39  ;;  %v951_v38 = vld [vmem:[#allocation8 + $0x590] sm:$0xff] }
 0x2a8   :  { %4433 = vmatprep.subr.bf16.mxu1 %v9342_v40  ;;  %v955_v39 = vld [vmem:[#allocation8 + $0x5b0] sm:$0xff]  ;;  %v952_v40 = vld [vmem:[#allocation8 + $0x598] sm:$0xff] }
 0x2a9   :  { %v9396_v43 = vcombine.high %v951_v38, %v955_v39  ;;  %v9395_v49 = vcombine.low %v951_v38, %v955_v39  ;;  %v1004_v38 = vld [vmem:[#allocation8 + $0x738] sm:$0xff] }
 0x2aa   :  { %4262 = vmatpush1.bf16.msra.mxu0 %v9339_v48  ;;  %v9398_v48 = vcombine.high %v952_v40, %v956_v41 }
 0x2ab   :  { %4434 = vmatpush1.bf16.msra.mxu1 %v9341_v44  ;;  %4274 = vmatprep.subr.bf16.mxu0 %v9348_v45  ;;  %v959_v44 = vld [vmem:[#allocation8 + $0x5d0] sm:$0xff] }
 0x2ac   :  { %4446 = vmatprep.subr.bf16.mxu1 %v9350_v0  ;;  %v963_v45 = vld [vmem:[#allocation8 + $0x5f0] sm:$0xff]  ;;  %v960_v0 = vld [vmem:[#allocation8 + $0x5d8] sm:$0xff] }
 0x2ad   :  { %4264 = vmatmul.mubr.bf16.vlgmr.msra.gmra.mrb[12].mxu0 %v11186_v47  ;;  %v9404_v51 = vcombine.high %v959_v44, %v963_v45  ;;  %v9406_v52 = vcombine.high %v960_v0, %v964_v46 }
 0x2ae   :  { %4436 = vmatmul.mubr.bf16.vlgmr.msra.gmra.mrb[12].mxu1 %v11186_v47  ;;  %4275 = vmatpush1.bf16.msra.mxu0 %v9347_v50  ;;  %v9365_v47 = vcombine.low %v920_v62, %v924_v63  ;;  %v9397_v50 = vcombine.low %v952_v40, %v956_v41  ;;  %v9405_v62 = vcombine.low %v960_v0, %v964_v46 }
 0x2af   :  { %4306 = vmatprep.mubr.bf16.mxu0 %v11196_v5  ;;  %4447 = vmatpush1.bf16.msra.mxu1 %v9349_v54  ;;  %v967_v54 = vld [vmem:[#allocation8 + $0x610] sm:$0xff] }
 0x2b0   :  { %4478 = vmatprep.mubr.bf16.mxu1 %v11196_v5  ;;  %4276 = vmatprep.subr.bf16.mxu0 %v9356_v56  ;;  %v9371_v5 = vcombine.low %v927_v15, %v931_v8  ;;  %v971_v56 = vld [vmem:[#allocation8 + $0x630] sm:$0xff]  ;;  %v980_v15 = vld [vmem:[#allocation8 + $0x678] sm:$0xff] }
 0x2b1   :  { %4448 = vmatprep.subr.bf16.mxu1 %v9358_v61  ;;  %v9403_v61 = vcombine.low %v959_v44, %v963_v45  ;;  %v9412_v63 = vcombine.high %v967_v54, %v971_v56  ;;  %v9411_v8 = vcombine.low %v967_v54, %v971_v56  ;;  %v1012_v44 = vld [vmem:[#allocation8 + $0x778] sm:$0xff] }
 0x2b2   :  { %4277 = vmatpush1.bf16.msra.mxu0 %v9355_v2  ;;  %v9414_v2 = vcombine.high %v968_v58, %v972_v59  ;;  %v1020_v54 = vld [vmem:[#allocation8 + $0x7b8] sm:$0xff] }
 0x2b3   :  { %4449 = vmatpush1.bf16.msra.mxu1 %v9357_v3  ;;  %4278 = vmatprep.subr.bf16.mxu0 %v9364_v4  ;;  %v975_v3 = vld [vmem:[#allocation8 + $0x650] sm:$0xff] }
 0x2b4   :  { %4450 = vmatprep.subr.bf16.mxu1 %v9366_v6  ;;  %v979_v4 = vld [vmem:[#allocation8 + $0x670] sm:$0xff]  ;;  %v976_v6 = vld [vmem:[#allocation8 + $0x658] sm:$0xff] }
 0x2b5   :  { %v9420_v11 = vcombine.high %v975_v3, %v979_v4  ;;  %v9419_v22 = vcombine.low %v975_v3, %v979_v4  ;;  %v9421_v24 = vcombine.low %v976_v6, %v980_v15  ;;  %v1028_v3 = vld [vmem:[#allocation8 + $0x7f8] sm:$0xff] }
 0x2b6   :  { %4279 = vmatpush1.bf16.msra.mxu0 %v9363_v12  ;;  %v9422_v12 = vcombine.high %v976_v6, %v980_v15 }
 0x2b7   :  { %4451 = vmatpush1.bf16.msra.mxu1 %v9365_v47  ;;  %4280 = vmatprep.subr.bf16.mxu0 %v9372_v14  ;;  %v983_v47 = vld [vmem:[#allocation8 + $0x690] sm:$0xff] }
 0x2b8   :  { %4452 = vmatprep.subr.bf16.mxu1 %v9374_v19  ;;  %v987_v14 = vld [vmem:[#allocation8 + $0x6b0] sm:$0xff]  ;;  %v984_v19 = vld [vmem:[#allocation8 + $0x698] sm:$0xff] }
 0x2b9   :  { %v9428_v26 = vcombine.high %v983_v47, %v987_v14  ;;  %v9427_v31 = vcombine.low %v983_v47, %v987_v14  ;;  %v9429_v32 = vcombine.low %v984_v19, %v988_v20  ;;  %v1036_v47 = vld [vmem:[#allocation8 + $0x838] sm:$0xff] }
 0x2ba   :  { %4281 = vmatpush1.bf16.msra.mxu0 %v9371_v5  ;;  %v9430_v5 = vcombine.high %v984_v19, %v988_v20 }
 0x2bb   :  { %4453 = vmatpush1.bf16.msra.mxu1 %v9373_v17  ;;  %4282 = vmatprep.subr.bf16.mxu0 %v9380_v27  ;;  %v991_v17 = vld [vmem:[#allocation8 + $0x6d0] sm:$0xff] }
 0x2bc   :  { %4454 = vmatprep.subr.bf16.mxu1 %v9382_v29  ;;  %v995_v27 = vld [vmem:[#allocation8 + $0x6f0] sm:$0xff]  ;;  %v992_v29 = vld [vmem:[#allocation8 + $0x6d8] sm:$0xff] }
 0x2bd   :  { %v9436_v33 = vcombine.high %v991_v17, %v995_v27  ;;  %v9435_v39 = vcombine.low %v991_v17, %v995_v27  ;;  %v9437_v40 = vcombine.low %v992_v29, %v996_v30  ;;  %v1040_v17 = vld [vmem:[#allocation8 + $0x858] sm:$0xff] }
 0x2be   :  { %4283 = vmatpush1.bf16.msra.mxu0 %v9379_v34  ;;  %v9438_v34 = vcombine.high %v992_v29, %v996_v30  ;;  %v1044_v27 = vld [vmem:[#allocation8 + $0x878] sm:$0xff] }
 0x2bf   :  { %4455 = vmatpush1.bf16.msra.mxu1 %v9381_v35  ;;  %4284 = vmatprep.subr.bf16.mxu0 %v9388_v36  ;;  %v999_v35 = vld [vmem:[#allocation8 + $0x710] sm:$0xff] }
 0x2c0   :  { %4456 = vmatprep.subr.bf16.mxu1 %v9390_v37  ;;  %v1003_v36 = vld [vmem:[#allocation8 + $0x730] sm:$0xff]  ;;  %v1000_v37 = vld [vmem:[#allocation8 + $0x718] sm:$0xff] }
 0x2c1   :  { %v9444_v41 = vcombine.high %v999_v35, %v1003_v36  ;;  %v9443_v45 = vcombine.low %v999_v35, %v1003_v36  ;;  %v9445_v0 = vcombine.low %v1000_v37, %v1004_v38  ;;  %v1052_v35 = vld [vmem:[#allocation8 + $0x8b8] sm:$0xff] }
 0x2c2   :  { %4285 = vmatpush1.bf16.msra.mxu0 %v9387_v42  ;;  %v9446_v42 = vcombine.high %v1000_v37, %v1004_v38  ;;  %v9485_v37 = vcombine.low %v1040_v17, %v1044_v27 }
 0x2c3   :  { %4457 = vmatpush1.bf16.msra.mxu1 %v9389_v7  ;;  %4286 = vmatprep.subr.bf16.mxu0 %v9396_v43  ;;  %v1007_v7 = vld [vmem:[#allocation8 + $0x750] sm:$0xff] }
 0x2c4   :  { %4458 = vmatprep.subr.bf16.mxu1 %v9398_v48  ;;  %v1011_v43 = vld [vmem:[#allocation8 + $0x770] sm:$0xff]  ;;  %v1008_v48 = vld [vmem:[#allocation8 + $0x758] sm:$0xff] }
 0x2c5   :  { %v9452_v46 = vcombine.high %v1007_v7, %v1011_v43  ;;  %v9451_v56 = vcombine.low %v1007_v7, %v1011_v43  ;;  %v9453_v58 = vcombine.low %v1008_v48, %v1012_v44  ;;  %v1060_v7 = vld [vmem:[#allocation8 + $0x8f8] sm:$0xff] }
 0x2c6   :  { %4287 = vmatpush1.bf16.msra.mxu0 %v9395_v49  ;;  %v9454_v49 = vcombine.high %v1008_v48, %v1012_v44 }
 0x2c7   :  { %4459 = vmatpush1.bf16.msra.mxu1 %v9397_v50  ;;  %4288 = vmatprep.subr.bf16.mxu0 %v9404_v51  ;;  %v1015_v50 = vld [vmem:[#allocation8 + $0x790] sm:$0xff] }
 0x2c8   :  { %4460 = vmatprep.subr.bf16.mxu1 %v9406_v52  ;;  %v1019_v51 = vld [vmem:[#allocation8 + $0x7b0] sm:$0xff]  ;;  %v1016_v52 = vld [vmem:[#allocation8 + $0x798] sm:$0xff] }
 0x2c9   :  { %v9460_v59 = vcombine.high %v1015_v50, %v1019_v51  ;;  %v9459_v4 = vcombine.low %v1015_v50, %v1019_v51  ;;  %v9461_v6 = vcombine.low %v1016_v52, %v1020_v54 }
 0x2ca   :  { %4289 = vmatpush1.bf16.msra.mxu0 %v9403_v61  ;;  %v9462_v61 = vcombine.high %v1016_v52, %v1020_v54  ;;  %v1071_v54 = vld [vmem:[#allocation8 + $0x950] sm:$0xff] }
 0x2cb   :  { %4461 = vmatpush1.bf16.msra.mxu1 %v9405_v62  ;;  %4290 = vmatprep.subr.bf16.mxu0 %v9412_v63  ;;  %v1023_v62 = vld [vmem:[#allocation8 + $0x7d0] sm:$0xff] }
 0x2cc   :  { %4462 = vmatprep.subr.bf16.mxu1 %v9414_v2  ;;  %v1027_v63 = vld [vmem:[#allocation8 + $0x7f0] sm:$0xff]  ;;  %v1024_v2 = vld [vmem:[#allocation8 + $0x7d8] sm:$0xff] }
 0x2cd   :  { %v9468_v15 = vcombine.high %v1023_v62, %v1027_v63  ;;  %v9467_v14 = vcombine.low %v1023_v62, %v1027_v63  ;;  %v9469_v19 = vcombine.low %v1024_v2, %v1028_v3 }
 0x2ce   :  { %4291 = vmatpush1.bf16.msra.mxu0 %v9411_v8  ;;  %v9470_v8 = vcombine.high %v1024_v2, %v1028_v3  ;;  %v1079_v3 = vld [vmem:[#allocation8 + $0x990] sm:$0xff] }
 0x2cf   :  { %4463 = vmatpush1.bf16.msra.mxu1 %v9413_v10  ;;  %4292 = vmatprep.subr.bf16.mxu0 %v9420_v11  ;;  %v1031_v10 = vld [vmem:[#allocation8 + $0x810] sm:$0xff] }
 0x2d0   :  { %4464 = vmatprep.subr.bf16.mxu1 %v9422_v12  ;;  %v1035_v11 = vld [vmem:[#allocation8 + $0x830] sm:$0xff]  ;;  %v1032_v12 = vld [vmem:[#allocation8 + $0x818] sm:$0xff] }
 0x2d1   :  { %v9476_v20 = vcombine.high %v1031_v10, %v1035_v11  ;;  %v9477_v29 = vcombine.low %v1032_v12, %v1036_v47 }
 0x2d2   :  { %4293 = vmatpush1.bf16.msra.mxu0 %v9419_v22  ;;  %v9478_v22 = vcombine.high %v1032_v12, %v1036_v47  ;;  %v1087_v47 = vld [vmem:[#allocation8 + $0x9d0] sm:$0xff] }
 0x2d3   :  { %4465 = vmatpush1.bf16.msra.mxu1 %v9421_v24  ;;  %4294 = vmatprep.subr.bf16.mxu0 %v9428_v26  ;;  %v1039_v24 = vld [vmem:[#allocation8 + $0x850] sm:$0xff] }
 0x2d4   :  { %4466 = vmatprep.subr.bf16.mxu1 %v9430_v5  ;;  %v1043_v26 = vld [vmem:[#allocation8 + $0x870] sm:$0xff]  ;;  %v9475_v5 = vcombine.low %v1031_v10, %v1035_v11 }
 0x2d5   :  { %v9484_v30 = vcombine.high %v1039_v24, %v1043_v26  ;;  %v9483_v36 = vcombine.low %v1039_v24, %v1043_v26 }
 0x2d6   :  { %4295 = vmatpush1.bf16.msra.mxu0 %v9427_v31  ;;  %v1047_v31 = vld [vmem:[#allocation8 + $0x890] sm:$0xff] }
 0x2d7   :  { %4467 = vmatpush1.bf16.msra.mxu1 %v9429_v32  ;;  %4296 = vmatprep.subr.bf16.mxu0 %v9436_v33  ;;  %v1051_v32 = vld [vmem:[#allocation8 + $0x8b0] sm:$0xff]  ;;  %v9486_v33 = vcombine.high %v1040_v17, %v1044_v27 }
 0x2d8   :  { %4468 = vmatprep.subr.bf16.mxu1 %v9438_v34  ;;  %v1048_v34 = vld [vmem:[#allocation8 + $0x898] sm:$0xff]  ;;  %v9492_v38 = vcombine.high %v1047_v31, %v1051_v32  ;;  %v9491_v43 = vcombine.low %v1047_v31, %v1051_v32  ;;  %v1095_v17 = vld [vmem:[#allocation8 + $0xa10] sm:$0xff] }
 0x2d9   :  { %v1099_v27 = vld [vmem:[#allocation8 + $0xa30] sm:$0xff] }
 0x2da   :  { %4297 = vmatpush1.bf16.msra.mxu0 %v9435_v39  ;;  %v9494_v39 = vcombine.high %v1048_v34, %v1052_v35 }
 0x2db   :  { %4469 = vmatpush1.bf16.msra.mxu1 %v9437_v40  ;;  %4298 = vmatprep.subr.bf16.mxu0 %v9444_v41  ;;  %v1055_v40 = vld [vmem:[#allocation8 + $0x8d0] sm:$0xff] }
 0x2dc   :  { %4470 = vmatprep.subr.bf16.mxu1 %v9446_v42  ;;  %v1059_v41 = vld [vmem:[#allocation8 + $0x8f0] sm:$0xff]  ;;  %v1056_v42 = vld [vmem:[#allocation8 + $0x8d8] sm:$0xff] }
 0x2dd   :  { %v9500_v48 = vcombine.high %v1055_v40, %v1059_v41  ;;  %v9502_v44 = vcombine.high %v1056_v42, %v1060_v7  ;;  %v9501_v50 = vcombine.low %v1056_v42, %v1060_v7  ;;  %v1111_v7 = vld [vmem:[#allocation8 + $0xa90] sm:$0xff] }
 0x2de   :  { %4299 = vmatpush1.bf16.msra.mxu0 %v9443_v45  ;;  %v1063_v45 = vld [vmem:[#allocation8 + $0x910] sm:$0xff] }
 0x2df   :  { %4471 = vmatpush1.bf16.msra.mxu1 %v9445_v0  ;;  %4300 = vmatprep.subr.bf16.mxu0 %v9452_v46  ;;  %v1067_v0 = vld [vmem:[#allocation8 + $0x930] sm:$0xff]  ;;  %v1064_v46 = vld [vmem:[#allocation8 + $0x918] sm:$0xff] }
 0x2e0   :  { %4472 = vmatprep.subr.bf16.mxu1 %v9454_v49  ;;  %v1068_v49 = vld [vmem:[#allocation8 + $0x938] sm:$0xff]  ;;  %v9508_v51 = vcombine.high %v1063_v45, %v1067_v0 }
 0x2e1   :  { %v9510_v52 = vcombine.high %v1064_v46, %v1068_v49  ;;  %v9509_v62 = vcombine.low %v1064_v46, %v1068_v49  ;;  %v1119_v49 = vld [vmem:[#allocation8 + $0xad0] sm:$0xff] }
 0x2e2   :  { %4301 = vmatpush1.bf16.msra.mxu0 %v9451_v56  ;;  %v1075_v56 = vld [vmem:[#allocation8 + $0x970] sm:$0xff] }
 0x2e3   :  { %4473 = vmatpush1.bf16.msra.mxu1 %v9453_v58  ;;  %4302 = vmatprep.subr.bf16.mxu0 %v9460_v59  ;;  %v1072_v58 = vld [vmem:[#allocation8 + $0x958] sm:$0xff]  ;;  %v9516_v63 = vcombine.high %v1071_v54, %v1075_v56 }
 0x2e4   :  { %4474 = vmatprep.subr.bf16.mxu1 %v9462_v61  ;;  %v1076_v59 = vld [vmem:[#allocation8 + $0x978] sm:$0xff]  ;;  %v9507_v61 = vcombine.low %v1063_v45, %v1067_v0 }
 0x2e5   :  { %v9518_v2 = vcombine.high %v1072_v58, %v1076_v59  ;;  %v9517_v10 = vcombine.low %v1072_v58, %v1076_v59  ;;  %v1127_v59 = vld [vmem:[#allocation8 + $0xb10] sm:$0xff] }
 0x2e6   :  { %4303 = vmatpush1.bf16.msra.mxu0 %v9459_v4  ;;  %v1083_v4 = vld [vmem:[#allocation8 + $0x9b0] sm:$0xff] }
 0x2e7   :  { %4475 = vmatpush1.bf16.msra.mxu1 %v9461_v6  ;;  %4304 = vmatprep.subr.bf16.mxu0 %v9468_v15  ;;  %v1080_v6 = vld [vmem:[#allocation8 + $0x998] sm:$0xff]  ;;  %v9524_v11 = vcombine.high %v1079_v3, %v1083_v4 }
 0x2e8   :  { %4476 = vmatprep.subr.bf16.mxu1 %v9470_v8  ;;  %v1084_v15 = vld [vmem:[#allocation8 + $0x9b8] sm:$0xff]  ;;  %v9515_v8 = vcombine.low %v1071_v54, %v1075_v56 }
 0x2e9   :  { %v9526_v12 = vcombine.high %v1080_v6, %v1084_v15  ;;  %v9525_v24 = vcombine.low %v1080_v6, %v1084_v15  ;;  %v1135_v15 = vld [vmem:[#allocation8 + $0xb50] sm:$0xff] }
 0x2ea   :  { %4305 = vmatpush1.bf16.msra.mxu0 %v9467_v14  ;;  %v1091_v14 = vld [vmem:[#allocation8 + $0x9f0] sm:$0xff] }
 0x2eb   :  { %4477 = vmatpush1.bf16.msra.mxu1 %v9469_v19  ;;  %4317 = vmatprep.subr.bf16.mxu0 %v9476_v20  ;;  %v1088_v19 = vld [vmem:[#allocation8 + $0x9d8] sm:$0xff]  ;;  %v9532_v26 = vcombine.high %v1087_v47, %v1091_v14  ;;  %v9531_v31 = vcombine.low %v1087_v47, %v1091_v14 }
 0x2ec   :  { %4489 = vmatprep.subr.bf16.mxu1 %v9478_v22  ;;  %v1092_v20 = vld [vmem:[#allocation8 + $0x9f8] sm:$0xff]  ;;  %v9523_v22 = vcombine.low %v1079_v3, %v1083_v4 }
 0x2ed   :  { %4307 = vmatmul.mubr.bf16.vlgmr.msra.gmra.mrb[12].mxu0 %v11194_v1  ;;  %v9533_v32 = vcombine.low %v1088_v19, %v1092_v20 }
 0x2ee   :  { %4479 = vmatmul.mubr.bf16.vlgmr.msra.gmra.mrb[12].mxu1 %v11194_v1  ;;  %4318 = vmatpush1.bf16.msra.mxu0 %v9475_v5  ;;  %v9493_v1 = vcombine.low %v1048_v34, %v1052_v35  ;;  %v9534_v5 = vcombine.high %v1088_v19, %v1092_v20  ;;  %v1103_v35 = vld [vmem:[#allocation8 + $0xa50] sm:$0xff] }
 0x2ef   :  { %4349 = vmatprep.mubr.bf16.mxu0 %v11212_v28  ;;  %4490 = vmatpush1.bf16.msra.mxu1 %v9477_v29  ;;  %v1096_v29 = vld [vmem:[#allocation8 + $0xa18] sm:$0xff]  ;;  %v1143_v20 = vld [vmem:[#allocation8 + $0xb90] sm:$0xff] }
 0x2f0   :  { %4521 = vmatprep.mubr.bf16.mxu1 %v11212_v28  ;;  %4319 = vmatprep.subr.bf16.mxu0 %v9484_v30  ;;  %v9499_v28 = vcombine.low %v1055_v40, %v1059_v41  ;;  %v1100_v30 = vld [vmem:[#allocation8 + $0xa38] sm:$0xff] }
 0x2f1   :  { %4491 = vmatprep.subr.bf16.mxu1 %v9486_v33  ;;  %v9540_v33 = vcombine.high %v1095_v17, %v1099_v27  ;;  %v9542_v34 = vcombine.high %v1096_v29, %v1100_v30  ;;  %v9541_v40 = vcombine.low %v1096_v29, %v1100_v30  ;;  %v1151_v30 = vld [vmem:[#allocation8 + $0xbd0] sm:$0xff] }
 0x2f2   :  { %4320 = vmatpush1.bf16.msra.mxu0 %v9483_v36  ;;  %v1107_v36 = vld [vmem:[#allocation8 + $0xa70] sm:$0xff] }
 0x2f3   :  { %4492 = vmatpush1.bf16.msra.mxu1 %v9485_v37  ;;  %4321 = vmatprep.subr.bf16.mxu0 %v9492_v38  ;;  %v1104_v37 = vld [vmem:[#allocation8 + $0xa58] sm:$0xff]  ;;  %v9548_v41 = vcombine.high %v1103_v35, %v1107_v36 }
 0x2f4   :  { %4493 = vmatprep.subr.bf16.mxu1 %v9494_v39  ;;  %v1108_v38 = vld [vmem:[#allocation8 + $0xa78] sm:$0xff]  ;;  %v9539_v39 = vcombine.low %v1095_v17, %v1099_v27 }
 0x2f5   :  { %v9550_v42 = vcombine.high %v1104_v37, %v1108_v38  ;;  %v9549_v45 = vcombine.low %v1104_v37, %v1108_v38  ;;  %v1159_v38 = vld [vmem:[#allocation8 + $0xc10] sm:$0xff] }
 0x2f6   :  { %4322 = vmatpush1.bf16.msra.mxu0 %v9491_v43  ;;  %v1115_v43 = vld [vmem:[#allocation8 + $0xab0] sm:$0xff] }
 0x2f7   :  { %4494 = vmatpush1.bf16.msra.mxu1 %v9493_v1  ;;  %4323 = vmatprep.subr.bf16.mxu0 %v9500_v48  ;;  %v1112_v1 = vld [vmem:[#allocation8 + $0xa98] sm:$0xff]  ;;  %v9556_v0 = vcombine.high %v1111_v7, %v1115_v43 }
 0x2f8   :  { %4495 = vmatprep.subr.bf16.mxu1 %v9502_v44  ;;  %v1116_v48 = vld [vmem:[#allocation8 + $0xab8] sm:$0xff]  ;;  %v9547_v44 = vcombine.low %v1103_v35, %v1107_v36 }
 0x2f9   :  { %v9558_v46 = vcombine.high %v1112_v1, %v1116_v48  ;;  %v9557_v54 = vcombine.low %v1112_v1, %v1116_v48  ;;  %v1167_v48 = vld [vmem:[#allocation8 + $0xc50] sm:$0xff] }
 0x2fa   :  { %4324 = vmatpush1.bf16.msra.mxu0 %v9499_v28  ;;  %v1123_v28 = vld [vmem:[#allocation8 + $0xaf0] sm:$0xff] }
 0x2fb   :  { %4496 = vmatpush1.bf16.msra.mxu1 %v9501_v50  ;;  %4325 = vmatprep.subr.bf16.mxu0 %v9508_v51  ;;  %v1120_v50 = vld [vmem:[#allocation8 + $0xad8] sm:$0xff]  ;;  %v9564_v56 = vcombine.high %v1119_v49, %v1123_v28 }
 0x2fc   :  { %4497 = vmatprep.subr.bf16.mxu1 %v9510_v52  ;;  %v1124_v51 = vld [vmem:[#allocation8 + $0xaf8] sm:$0xff]  ;;  %v9555_v52 = vcombine.low %v1111_v7, %v1115_v43 }
 0x2fd   :  { %v9566_v58 = vcombine.high %v1120_v50, %v1124_v51  ;;  %v9565_v3 = vcombine.low %v1120_v50, %v1124_v51  ;;  %v1175_v50 = vld [vmem:[#allocation8 + $0xc90] sm:$0xff] }
 0x2fe   :  { %4326 = vmatpush1.bf16.msra.mxu0 %v9507_v61  ;;  %v1131_v61 = vld [vmem:[#allocation8 + $0xb30] sm:$0xff] }
 0x2ff   :  { %4498 = vmatpush1.bf16.msra.mxu1 %v9509_v62  ;;  %4327 = vmatprep.subr.bf16.mxu0 %v9516_v63  ;;  %v1128_v62 = vld [vmem:[#allocation8 + $0xb18] sm:$0xff]  ;;  %v9572_v4 = vcombine.high %v1127_v59, %v1131_v61  ;;  %v1179_v51 = vld [vmem:[#allocation8 + $0xcb0] sm:$0xff] }
 0x300   :  { %4499 = vmatprep.subr.bf16.mxu1 %v9518_v2  ;;  %v1132_v63 = vld [vmem:[#allocation8 + $0xb38] sm:$0xff]  ;;  %v9563_v2 = vcombine.low %v1119_v49, %v1123_v28 }
 0x301   :  { %v9574_v6 = vcombine.high %v1128_v62, %v1132_v63  ;;  %v9573_v47 = vcombine.low %v1128_v62, %v1132_v63  ;;  %v1183_v63 = vld [vmem:[#allocation8 + $0xcd0] sm:$0xff] }
 0x302   :  { %4328 = vmatpush1.bf16.msra.mxu0 %v9515_v8  ;;  %v1139_v8 = vld [vmem:[#allocation8 + $0xb70] sm:$0xff] }
 0x303   :  { %4500 = vmatpush1.bf16.msra.mxu1 %v9517_v10  ;;  %4329 = vmatprep.subr.bf16.mxu0 %v9524_v11  ;;  %v1136_v10 = vld [vmem:[#allocation8 + $0xb58] sm:$0xff]  ;;  %v9580_v14 = vcombine.high %v1135_v15, %v1139_v8 }
 0x304   :  { %4501 = vmatprep.subr.bf16.mxu1 %v9526_v12  ;;  %v1140_v11 = vld [vmem:[#allocation8 + $0xb78] sm:$0xff]  ;;  %v9571_v12 = vcombine.low %v1127_v59, %v1131_v61  ;;  %v9620_v61 = vcombine.high %v1175_v50, %v1179_v51 }
 0x305   :  { %v9582_v19 = vcombine.high %v1136_v10, %v1140_v11  ;;  %v9581_v17 = vcombine.low %v1136_v10, %v1140_v11  ;;  %v1191_v10 = vld [vmem:[#allocation8 + $0xd10] sm:$0xff] }
 0x306   :  { %4330 = vmatpush1.bf16.msra.mxu0 %v9523_v22  ;;  %v1147_v22 = vld [vmem:[#allocation8 + $0xbb0] sm:$0xff] }
 0x307   :  { %4502 = vmatpush1.bf16.msra.mxu1 %v9525_v24  ;;  %4331 = vmatprep.subr.bf16.mxu0 %v9532_v26  ;;  %v1144_v24 = vld [vmem:[#allocation8 + $0xb98] sm:$0xff]  ;;  %v9588_v27 = vcombine.high %v1143_v20, %v1147_v22  ;;  %v1195_v11 = vld [vmem:[#allocation8 + $0xd30] sm:$0xff] }
 0x308   :  { %4503 = vmatprep.subr.bf16.mxu1 %v9534_v5  ;;  %v1148_v26 = vld [vmem:[#allocation8 + $0xbb8] sm:$0xff]  ;;  %v9579_v5 = vcombine.low %v1135_v15, %v1139_v8 }
 0x309   :  { %v9590_v29 = vcombine.high %v1144_v24, %v1148_v26  ;;  %v9589_v35 = vcombine.low %v1144_v24, %v1148_v26  ;;  %v1203_v24 = vld [vmem:[#allocation8 + $0xd70] sm:$0xff]  ;;  %v1200_v26 = vld [vmem:[#allocation8 + $0xd58] sm:$0xff] }
 0x30a   :  { %4332 = vmatpush1.bf16.msra.mxu0 %v9531_v31  ;;  %v1155_v31 = vld [vmem:[#allocation8 + $0xbf0] sm:$0xff] }
 0x30b   :  { %4504 = vmatpush1.bf16.msra.mxu1 %v9533_v32  ;;  %4333 = vmatprep.subr.bf16.mxu0 %v9540_v33  ;;  %v1152_v32 = vld [vmem:[#allocation8 + $0xbd8] sm:$0xff]  ;;  %v9596_v36 = vcombine.high %v1151_v30, %v1155_v31 }
 0x30c   :  { %4505 = vmatprep.subr.bf16.mxu1 %v9542_v34  ;;  %v1156_v33 = vld [vmem:[#allocation8 + $0xbf8] sm:$0xff]  ;;  %v9587_v34 = vcombine.low %v1143_v20, %v1147_v22  ;;  %v1199_v22 = vld [vmem:[#allocation8 + $0xd50] sm:$0xff] }
 0x30d   :  { %v9598_v37 = vcombine.high %v1152_v32, %v1156_v33  ;;  %v9597_v7 = vcombine.low %v1152_v32, %v1156_v33  ;;  %v1207_v32 = vld [vmem:[#allocation8 + $0xd90] sm:$0xff] }
 0x30e   :  { %4334 = vmatpush1.bf16.msra.mxu0 %v9539_v39  ;;  %v1163_v39 = vld [vmem:[#allocation8 + $0xc30] sm:$0xff] }
 0x30f   :  { %4506 = vmatpush1.bf16.msra.mxu1 %v9541_v40  ;;  %4335 = vmatprep.subr.bf16.mxu0 %v9548_v41  ;;  %v1160_v40 = vld [vmem:[#allocation8 + $0xc18] sm:$0xff]  ;;  %v9604_v43 = vcombine.high %v1159_v38, %v1163_v39  ;;  %v1211_v33 = vld [vmem:[#allocation8 + $0xdb0] sm:$0xff] }
 0x310   :  { %4507 = vmatprep.subr.bf16.mxu1 %v9550_v42  ;;  %v1164_v41 = vld [vmem:[#allocation8 + $0xc38] sm:$0xff]  ;;  %v9595_v42 = vcombine.low %v1151_v30, %v1155_v31  ;;  %v9644_v30 = vcombine.high %v1199_v22, %v1203_v24 }
 0x311   :  { %v9606_v1 = vcombine.high %v1160_v40, %v1164_v41  ;;  %v9605_v49 = vcombine.low %v1160_v40, %v1164_v41  ;;  %v9643_v40 = vcombine.low %v1199_v22, %v1203_v24  ;;  %v1232_v22 = vld [vmem:[#allocation8 + $0xe58] sm:$0xff] }
 0x312   :  { %4336 = vmatpush1.bf16.msra.mxu0 %v9547_v44  ;;  %v1171_v44 = vld [vmem:[#allocation8 + $0xc70] sm:$0xff]  ;;  %v1236_v24 = vld [vmem:[#allocation8 + $0xe78] sm:$0xff] }
 0x313   :  { %4508 = vmatpush1.bf16.msra.mxu1 %v9549_v45  ;;  %4337 = vmatprep.subr.bf16.mxu0 %v9556_v0  ;;  %v9603_v45 = vcombine.low %v1159_v38, %v1163_v39  ;;  %v1168_v0 = vld [vmem:[#allocation8 + $0xc58] sm:$0xff]  ;;  %v9612_v28 = vcombine.high %v1167_v48, %v1171_v44 }
 0x314   :  { %4509 = vmatprep.subr.bf16.mxu1 %v9558_v46  ;;  %v1172_v46 = vld [vmem:[#allocation8 + $0xc78] sm:$0xff] }
 0x315   :  { %v9613_v59 = vcombine.low %v1168_v0, %v1172_v46 }
 0x316   :  { %4338 = vmatpush1.bf16.msra.mxu0 %v9555_v52  ;;  %v9614_v52 = vcombine.high %v1168_v0, %v1172_v46 }
 0x317   :  { %4510 = vmatpush1.bf16.msra.mxu1 %v9557_v54  ;;  %4339 = vmatprep.subr.bf16.mxu0 %v9564_v56  ;;  %v1176_v54 = vld [vmem:[#allocation8 + $0xc98] sm:$0xff] }
 0x318   :  { %4511 = vmatprep.subr.bf16.mxu1 %v9566_v58  ;;  %v1180_v56 = vld [vmem:[#allocation8 + $0xcb8] sm:$0xff]  ;;  %v9611_v58 = vcombine.low %v1167_v48, %v1171_v44  ;;  %v1215_v48 = vld [vmem:[#allocation8 + $0xdd0] sm:$0xff] }
 0x319   :  { %v9622_v62 = vcombine.high %v1176_v54, %v1180_v56  ;;  %v1219_v44 = vld [vmem:[#allocation8 + $0xdf0] sm:$0xff] }
 0x31a   :  { %4340 = vmatpush1.bf16.msra.mxu0 %v9563_v2  ;;  %v1187_v2 = vld [vmem:[#allocation8 + $0xcf0] sm:$0xff] }
 0x31b   :  { %4512 = vmatpush1.bf16.msra.mxu1 %v9565_v3  ;;  %4341 = vmatprep.subr.bf16.mxu0 %v9572_v4  ;;  %v1184_v3 = vld [vmem:[#allocation8 + $0xcd8] sm:$0xff]  ;;  %v9628_v15 = vcombine.high %v1183_v63, %v1187_v2 }
 0x31c   :  { %4513 = vmatprep.subr.bf16.mxu1 %v9574_v6  ;;  %v1188_v4 = vld [vmem:[#allocation8 + $0xcf8] sm:$0xff]  ;;  %v9619_v6 = vcombine.low %v1175_v50, %v1179_v51 }
 0x31d   :  { %v9630_v8 = vcombine.high %v1184_v3, %v1188_v4  ;;  %v1220_v50 = vld [vmem:[#allocation8 + $0xdf8] sm:$0xff] }
 0x31e   :  { %4342 = vmatpush1.bf16.msra.mxu0 %v9571_v12  ;;  %v1192_v12 = vld [vmem:[#allocation8 + $0xd18] sm:$0xff] }
 0x31f   :  { %4514 = vmatpush1.bf16.msra.mxu1 %v9573_v47  ;;  %4343 = vmatprep.subr.bf16.mxu0 %v9580_v14  ;;  %v1196_v47 = vld [vmem:[#allocation8 + $0xd38] sm:$0xff]  ;;  %v9629_v14 = vcombine.low %v1184_v3, %v1188_v4 }
 0x320   :  { %4515 = vmatprep.subr.bf16.mxu1 %v9582_v19  ;;  %v9636_v19 = vcombine.high %v1191_v10, %v1195_v11  ;;  %v9638_v20 = vcombine.high %v1192_v12, %v1196_v47 }
 0x322   :  { %4344 = vmatpush1.bf16.msra.mxu0 %v9579_v5  ;;  %v1204_v5 = vld [vmem:[#allocation8 + $0xd78] sm:$0xff] }
 0x323   :  { %4516 = vmatpush1.bf16.msra.mxu1 %v9581_v17  ;;  %4345 = vmatprep.subr.bf16.mxu0 %v9588_v27  ;;  %v9635_v17 = vcombine.low %v1191_v10, %v1195_v11  ;;  %v1285_v27 = vld [vmem:[#allocation10] sm:$0xff]  ;;  %v9646_v31 = vcombine.high %v1200_v26, %v1204_v5  ;;  %v9645_v41 = vcombine.low %v1200_v26, %v1204_v5  ;;  %v1228_v10 = vld [vmem:[#allocation8 + $0xe38] sm:$0xff] }
 0x324   :  { %4517 = vmatprep.subr.bf16.mxu1 %v9590_v29  ;;  %v9637_v29 = vcombine.low %v1192_v12, %v1196_v47  ;;  %v1294_v38 = vrot.slane %v1285_v27, %v11170_v18  ;;  %v1302_v39 = vrot.slane %v1285_v27, %v11180_v23  ;;  %v9659_v12 = vcombine.low %v1215_v48, %v1219_v44 }
 0x326   :  { %4346 = vmatpush1.bf16.msra.mxu0 %v9587_v34  ;;  %v1290_v34 = vrot.slane %v1285_v27, %v11165_v16 }
 0x327   :  { %4518 = vmatpush1.bf16.msra.mxu1 %v9589_v35  ;;  %4347 = vmatprep.subr.bf16.mxu0 %v9596_v36  ;;  %v1298_v35 = vrot.slane %v1285_v27, %v11177_v21  ;;  %v1208_v36 = vld [vmem:[#allocation8 + $0xd98] sm:$0xff]  ;;  %v9678_v27 = vcombine.high %v1232_v22, %v1236_v24 }
 0x328   :  { %4519 = vmatprep.subr.bf16.mxu1 %v9598_v37  ;;  %v1212_v37 = vld [vmem:[#allocation8 + $0xdb8] sm:$0xff] }
 0x32a   :  { %4348 = vmatpush1.bf16.msra.mxu0 %v9595_v42  ;;  %v9652_v42 = vcombine.high %v1207_v32, %v1211_v33 }
 0x32b   :  { %4520 = vmatpush1.bf16.msra.mxu1 %v9597_v7  ;;  %4360 = vmatprep.subr.bf16.mxu0 %v9604_v43 }
 0x32c   :  { %4532 = vmatprep.subr.bf16.mxu1 %v9606_v1  ;;  %v9654_v1 = vcombine.high %v1208_v36, %v1212_v37 }
 0x32d   :  { %4350 = vmatmul.mubr.bf16.vlgmr.msra.gmra.mrb[12].mxu0 %v11210_v25 }
 0x32e   :  { %4522 = vmatmul.mubr.bf16.vlgmr.msra.gmra.mrb[12].mxu1 %v11210_v25  ;;  %4361 = vmatpush1.bf16.msra.mxu0 %v9603_v45  ;;  %v9621_v25 = vcombine.low %v1176_v54, %v1180_v56 }
 0x32f   :  { %4392 = vmatprep.mubr.bf16.mxu0 %v11226_v60  ;;  %4533 = vmatpush1.bf16.msra.mxu1 %v9605_v49 }
 0x330   :  { %4564 = vmatprep.mubr.bf16.mxu1 %v11226_v60  ;;  %4362 = vmatprep.subr.bf16.mxu0 %v9612_v28  ;;  %v9627_v60 = vcombine.low %v1183_v63, %v1187_v2  ;;  %v1216_v28 = vld [vmem:[#allocation8 + $0xdd8] sm:$0xff]  ;;  %v9653_v63 = vcombine.low %v1208_v36, %v1212_v37  ;;  %v9660_v2 = vcombine.high %v1215_v48, %v1219_v44 }
 0x331   :  { %4534 = vmatprep.subr.bf16.mxu1 %v9614_v52  ;;  %v9662_v4 = vcombine.high %v1216_v28, %v1220_v50  ;;  %v9661_v47 = vcombine.low %v1216_v28, %v1220_v50  ;;  %v9677_v37 = vcombine.low %v1232_v22, %v1236_v24 }
 0x332   :  { %4363 = vmatpush1.bf16.msra.mxu0 %v9611_v58  ;;  %v9651_v58 = vcombine.low %v1207_v32, %v1211_v33  ;;  %v1240_v32 = vld [vmem:[#allocation8 + $0xe98] sm:$0xff] }
 0x333   :  { %4535 = vmatpush1.bf16.msra.mxu1 %v9613_v59  ;;  %4364 = vmatprep.subr.bf16.mxu0 %v9620_v61  ;;  %v1244_v33 = vld [vmem:[#allocation8 + $0xeb8] sm:$0xff] }
 0x334   :  { %4536 = vmatprep.subr.bf16.mxu1 %v9622_v62 }
 0x336   :  { %4365 = vmatpush1.bf16.msra.mxu0 %v9619_v6  ;;  %v1223_v6 = vld [vmem:[#allocation8 + $0xe10] sm:$0xff] }
 0x337   :  { %4537 = vmatpush1.bf16.msra.mxu1 %v9621_v25  ;;  %4366 = vmatprep.subr.bf16.mxu0 %v9628_v15  ;;  %v1227_v25 = vld [vmem:[#allocation8 + $0xe30] sm:$0xff] }
 0x338   :  { %4538 = vmatprep.subr.bf16.mxu1 %v9630_v8  ;;  %v1224_v8 = vld [vmem:[#allocation8 + $0xe18] sm:$0xff]  ;;  %v9667_v26 = vcombine.low %v1223_v6, %v1227_v25 }
 0x339   :  { %v9669_v5 = vcombine.low %v1224_v8, %v1228_v10 }
 0x33a   :  { %4367 = vmatpush1.bf16.msra.mxu0 %v9627_v60  ;;  %v9668_v60 = vcombine.high %v1223_v6, %v1227_v25  ;;  %v1267_v6 = vld [vmem:[#allocation8 + $0xf70] sm:$0xff]  ;;  %v1264_v25 = vld [vmem:[#allocation8 + $0xf58] sm:$0xff] }
 0x33b   :  { %4539 = vmatpush1.bf16.msra.mxu1 %v9629_v14  ;;  %4368 = vmatprep.subr.bf16.mxu0 %v9636_v19  ;;  %v9670_v14 = vcombine.high %v1224_v8, %v1228_v10  ;;  %v1231_v19 = vld [vmem:[#allocation8 + $0xe50] sm:$0xff] }
 0x33c   :  { %4540 = vmatprep.subr.bf16.mxu1 %v9638_v20  ;;  %v1235_v20 = vld [vmem:[#allocation8 + $0xe70] sm:$0xff] }
 0x33e   :  { %4369 = vmatpush1.bf16.msra.mxu0 %v9635_v17  ;;  %v9676_v17 = vcombine.high %v1231_v19, %v1235_v20 }
 0x33f   :  { %4541 = vmatpush1.bf16.msra.mxu1 %v9637_v29  ;;  %4370 = vmatprep.subr.bf16.mxu0 %v9644_v30  ;;  %v1239_v29 = vld [vmem:[#allocation8 + $0xe90] sm:$0xff] }
 0x340   :  { %v4050_v7 = vpop.f32.mrb[8].mxu0  ;;  %v4222_v43 = vpop.f32.mrb[8].mxu1  ;;  %4542 = vmatprep.subr.bf16.mxu1 %v9646_v31  ;;  %v1243_v30 = vld [vmem:[#allocation8 + $0xeb0] sm:$0xff] }
 0x341   :  { %v10403_v45 = vadd.f32 %v4050_v7, %v1290_v34  ;;  %v10407_v0 = vadd.f32 %v4222_v43, %v1298_v35  ;;  %v4052_v46 = vpop.f32.mrb[9].mxu0  ;;  %v4224_v49 = vpop.f32.mrb[9].mxu1  ;;  %v1248_v43 = vld [vmem:[#allocation8 + $0xed8] sm:$0xff]  ;;  %v9683_v44 = vcombine.low %v1239_v29, %v1243_v30 }
 0x342   :  { %v10404_v51 = vadd.f32 %v4052_v46, %v1294_v38  ;;  %v10408_v52 = vadd.f32 %v4224_v49, %v1302_v39  ;;  %v4054_v54 = vpop.f32.mrb[10].mxu0  ;;  %v4226_v56 = vpop.f32.mrb[10].mxu1  ;;  %4371 = vmatpush1.bf16.msra.mxu0 %v9643_v40  ;;  %v9686_v40 = vcombine.high %v1240_v32, %v1244_v33  ;;  %v9685_v46 = vcombine.low %v1240_v32, %v1244_v33 }
 0x343   :  { %10644 = vtanh.f32 %v10403_v45  ;;  %v10405_v59 = vadd.f32 %v4054_v54, %v1290_v34  ;;  %4543 = vmatpush1.bf16.msra.mxu1 %v9645_v41  ;;  %v4056_v61 = vpop.f32.mrb[11].mxu0  ;;  %v4228_v62 = vpop.f32.mrb[11].mxu1  ;;  %4372 = vmatprep.subr.bf16.mxu0 %v9652_v42  ;;  %v10409_v3 = vadd.f32 %v4226_v56, %v1298_v35  ;;  %v9675_v35 = vcombine.low %v1231_v19, %v1235_v20  ;;  %v1247_v41 = vld [vmem:[#allocation8 + $0xed0] sm:$0xff]  ;;  %v1276_v19 = vld [vmem:[#allocation8 + $0xfb8] sm:$0xff] }
 0x344   :  { %10646 = vtanh.f32 %v10407_v0  ;;  %4544 = vmatprep.subr.bf16.mxu1 %v9654_v1  ;;  %v10406_v15 = vadd.f32 %v4056_v61, %v1294_v38  ;;  %v10410_v11 = vadd.f32 %v4228_v62, %v1302_v39  ;;  %v9684_v38 = vcombine.high %v1239_v29, %v1243_v30  ;;  %v1251_v42 = vld [vmem:[#allocation8 + $0xef0] sm:$0xff]  ;;  %v1252_v1 = vld [vmem:[#allocation8 + $0xef8] sm:$0xff] }
 0x345   :  { %10648 = vtanh.f32 %v10404_v51  ;;  %v9692_v49 = vcombine.high %v1247_v41, %v1251_v42  ;;  %v9694_v51 = vcombine.high %v1248_v43, %v1252_v1  ;;  %v1259_v54 = vld [vmem:[#allocation8 + $0xf30] sm:$0xff]  ;;  %v9691_v62 = vcombine.low %v1247_v41, %v1251_v42  ;;  %v1284_v29 = vld [vmem:[#allocation8 + $0xff8] sm:$0xff]  ;;  %v4607_v42 = vld [vmem:[#allocation11 + $0x40] sm:$0xff] }
 0x346   :  { %10650 = vtanh.f32 %v10408_v52  ;;  %4373 = vmatpush1.bf16.msra.mxu0 %v9651_v58  ;;  %v1255_v52 = vld [vmem:[#allocation8 + $0xf10] sm:$0xff]  ;;  %v1256_v58 = vld [vmem:[#allocation8 + $0xf18] sm:$0xff] }
 0x347   :  { %10652 = vtanh.f32 %v10405_v59  ;;  %4545 = vmatpush1.bf16.msra.mxu1 %v9653_v63  ;;  %4374 = vmatprep.subr.bf16.mxu0 %v9660_v2  ;;  %v1260_v59 = vld [vmem:[#allocation8 + $0xf38] sm:$0xff]  ;;  %v9693_v63 = vcombine.low %v1248_v43, %v1252_v1  ;;  %v9700_v2 = vcombine.high %v1255_v52, %v1259_v54  ;;  %v9699_v8 = vcombine.low %v1255_v52, %v1259_v54  ;;  %v4608_v1 = vld [vmem:[#allocation11 + $0x48] sm:$0xff] }
 0x348   :  { %10654 = vtanh.f32 %v10409_v3  ;;  %4546 = vmatprep.subr.bf16.mxu1 %v9662_v4  ;;  %v9702_v3 = vcombine.high %v1256_v58, %v1260_v59  ;;  %v1263_v4 = vld [vmem:[#allocation8 + $0xf50] sm:$0xff]  ;;  %v9701_v10 = vcombine.low %v1256_v58, %v1260_v59 }
 0x349   :  { %10656 = vtanh.f32 %v10406_v15  ;;  %v1268_v15 = vld [vmem:[#allocation8 + $0xf78] sm:$0xff]  ;;  %v9707_v20 = vcombine.low %v1263_v4, %v1267_v6  ;;  %v4620_v52 = vld [vmem:[#allocation11 + $0xa8] sm:$0xff] }
 0x34a   :  { %10658 = vtanh.f32 %v10410_v11  ;;  %4375 = vmatpush1.bf16.msra.mxu0 %v9659_v12  ;;  %v9708_v11 = vcombine.high %v1263_v4, %v1267_v6  ;;  %v9710_v12 = vcombine.high %v1264_v25, %v1268_v15  ;;  %v9709_v22 = vcombine.low %v1264_v25, %v1268_v15  ;;  %v4628_v4 = vld [vmem:[#allocation11 + $0xe8] sm:$0xff] }
 0x34b   :  { %4547 = vmatpush1.bf16.msra.mxu1 %v9661_v47  ;;  %4376 = vmatprep.subr.bf16.mxu0 %v9668_v60  ;;  %v1271_v47 = vld [vmem:[#allocation8 + $0xf90] sm:$0xff] }
 0x34c   :  { %4548 = vmatprep.subr.bf16.mxu1 %v9670_v14  ;;  %v1275_v60 = vld [vmem:[#allocation8 + $0xfb0] sm:$0xff]  ;;  %v1272_v14 = vld [vmem:[#allocation8 + $0xf98] sm:$0xff] }
 0x34d   :  { %v10645_v31 = vpop.eup %10644  ;;  %v9716_v24 = vcombine.high %v1271_v47, %v1275_v60  ;;  %v9715_v30 = vcombine.low %v1271_v47, %v1275_v60 }
 0x34e   :  { %v10647_v34 = vpop.eup %10646  ;;  %4377 = vmatpush1.bf16.msra.mxu0 %v9667_v26  ;;  %v9718_v26 = vcombine.high %v1272_v14, %v1276_v19 }
 0x34f   :  { %v10649_v36 = vpop.eup %10648  ;;  %4549 = vmatpush1.bf16.msra.mxu1 %v9669_v5  ;;  %4378 = vmatprep.subr.bf16.mxu0 %v9676_v17  ;;  %v1279_v5 = vld [vmem:[#allocation8 + $0xfd0] sm:$0xff] }
 0x350   :  { %v10651_v39 = vpop.eup %10650  ;;  %4550 = vmatprep.subr.bf16.mxu1 %v9678_v27  ;;  %v1283_v17 = vld [vmem:[#allocation8 + $0xff0] sm:$0xff]  ;;  %v1280_v27 = vld [vmem:[#allocation8 + $0xfd8] sm:$0xff] }
 0x351   :  { %v10653_v7 = vpop.eup %10652  ;;  %v9724_v32 = vcombine.high %v1279_v5, %v1283_v17  ;;  %v9726_v33 = vcombine.high %v1280_v27, %v1284_v29 }
 0x352   :  { %v10655_v48 = vpop.eup %10654  ;;  %4379 = vmatpush1.bf16.msra.mxu0 %v9675_v35  ;;  %v11256_v45 = vpack.c.bf16 %v10653_v7, %v10645_v31  ;;  %v9717_v31 = vcombine.low %v1272_v14, %v1276_v19  ;;  %v4603_v35 = vld [vmem:[#allocation11 + $0x20] sm:$0xff] }
 0x353   :  { %v10657_v0 = vpop.eup %10656  ;;  %4551 = vmatpush1.bf16.msra.mxu1 %v9677_v37  ;;  %4380 = vmatprep.subr.bf16.mxu0 %v9684_v38  ;;  %v11258_v28 = vpack.c.bf16 %v10655_v48, %v10647_v34  ;;  %v4599_v34 = vld [vmem:[#allocation11] sm:$0xff]  ;;  %v4604_v37 = vld [vmem:[#allocation11 + $0x28] sm:$0xff]  ;;  %v9723_v38 = vcombine.low %v1279_v5, %v1283_v17 }
 0x354   :  { %v10659_v50 = vpop.eup %10658  ;;  %4552 = vmatprep.subr.bf16.mxu1 %v9686_v40  ;;  %v11260_v56 = vpack.c.bf16 %v10657_v0, %v10649_v36  ;;  %v4600_v36 = vld [vmem:[#allocation11 + $0x8] sm:$0xff]  ;;  %v9728_v40 = vcombine.high %v4599_v34, %v4603_v35  ;;  %v4611_v7 = vld [vmem:[#allocation11 + $0x60] sm:$0xff]  ;;  %v9727_v43 = vcombine.low %v4599_v34, %v4603_v35 }
 0x355   :  { %v11262_v61 = vpack.c.bf16 %v10659_v50, %v10651_v39  ;;  %v9725_v39 = vcombine.low %v1280_v27, %v1284_v29  ;;  %v9730_v41 = vcombine.high %v4600_v36, %v4604_v37  ;;  %v4612_v48 = vld [vmem:[#allocation11 + $0x68] sm:$0xff]  ;;  %v9736_v0 = vcombine.high %v4607_v42, %v4611_v7 }
 0x356   :  { %4381 = vmatpush1.bf16.msra.mxu0 %v9683_v44  ;;  %v9729_v44 = vcombine.low %v4600_v36, %v4604_v37  ;;  %v9738_v50 = vcombine.high %v4608_v1, %v4612_v48  ;;  %v9735_v54 = vcombine.low %v4607_v42, %v4611_v7  ;;  %v9737_v58 = vcombine.low %v4608_v1, %v4612_v48  ;;  %v4663_v48 = vld [vmem:[#allocation11 + $0x200] sm:$0xff] }
 0x357   :  { %4553 = vmatpush1.bf16.msra.mxu1 %v9685_v46  ;;  %4382 = vmatprep.subr.bf16.mxu0 %v9692_v49  ;;  %v4615_v46 = vld [vmem:[#allocation11 + $0x80] sm:$0xff] }
 0x358   :  { %4554 = vmatprep.subr.bf16.mxu1 %v9694_v51  ;;  %v4619_v49 = vld [vmem:[#allocation11 + $0xa0] sm:$0xff]  ;;  %v4616_v51 = vld [vmem:[#allocation11 + $0x88] sm:$0xff] }
 0x359   :  { %v9744_v59 = vcombine.high %v4615_v46, %v4619_v49  ;;  %v9743_v6 = vcombine.low %v4615_v46, %v4619_v49  ;;  %v4668_v46 = vld [vmem:[#allocation11 + $0x228] sm:$0xff] }
 0x35a   :  { %4383 = vmatpush1.bf16.msra.mxu0 %v9691_v62  ;;  %v9746_v62 = vcombine.high %v4616_v51, %v4620_v52 }
 0x35b   :  { %4555 = vmatpush1.bf16.msra.mxu1 %v9693_v63  ;;  %4384 = vmatprep.subr.bf16.mxu0 %v9700_v2  ;;  %v4623_v63 = vld [vmem:[#allocation11 + $0xc0] sm:$0xff] }
 0x35c   :  { %4556 = vmatprep.subr.bf16.mxu1 %v9702_v3  ;;  %v4627_v2 = vld [vmem:[#allocation11 + $0xe0] sm:$0xff]  ;;  %v4624_v3 = vld [vmem:[#allocation11 + $0xc8] sm:$0xff] }
 0x35d   :  { %v9752_v25 = vcombine.high %v4623_v63, %v4627_v2  ;;  %v9754_v15 = vcombine.high %v4624_v3, %v4628_v4  ;;  %v9751_v47 = vcombine.low %v4623_v63, %v4627_v2  ;;  %v9753_v60 = vcombine.low %v4624_v3, %v4628_v4 }
 0x35e   :  { %4385 = vmatpush1.bf16.msra.mxu0 %v9699_v8  ;;  %v4631_v8 = vld [vmem:[#allocation11 + $0x100] sm:$0xff] }
 0x35f   :  { %4557 = vmatpush1.bf16.msra.mxu1 %v9701_v10  ;;  %4386 = vmatprep.subr.bf16.mxu0 %v9708_v11  ;;  %v4635_v10 = vld [vmem:[#allocation11 + $0x120] sm:$0xff]  ;;  %v4632_v11 = vld [vmem:[#allocation11 + $0x108] sm:$0xff] }
 0x360   :  { %4558 = vmatprep.subr.bf16.mxu1 %v9710_v12  ;;  %v4636_v12 = vld [vmem:[#allocation11 + $0x128] sm:$0xff]  ;;  %v9760_v14 = vcombine.high %v4631_v8, %v4635_v10  ;;  %v9759_v5 = vcombine.low %v4631_v8, %v4635_v10 }
 0x361   :  { %v9762_v19 = vcombine.high %v4632_v11, %v4636_v12  ;;  %v9761_v17 = vcombine.low %v4632_v11, %v4636_v12 }
 0x362   :  { %4387 = vmatpush1.bf16.msra.mxu0 %v9707_v20  ;;  %v4639_v20 = vld [vmem:[#allocation11 + $0x140] sm:$0xff] }
 0x363   :  { %4559 = vmatpush1.bf16.msra.mxu1 %v9709_v22  ;;  %4388 = vmatprep.subr.bf16.mxu0 %v9716_v24  ;;  %v4643_v22 = vld [vmem:[#allocation11 + $0x160] sm:$0xff]  ;;  %v4640_v24 = vld [vmem:[#allocation11 + $0x148] sm:$0xff] }
 0x364   :  { %4560 = vmatprep.subr.bf16.mxu1 %v9718_v26  ;;  %v4644_v26 = vld [vmem:[#allocation11 + $0x168] sm:$0xff]  ;;  %v9768_v27 = vcombine.high %v4639_v20, %v4643_v22  ;;  %v9767_v34 = vcombine.low %v4639_v20, %v4643_v22 }
 0x365   :  { %v9770_v29 = vcombine.high %v4640_v24, %v4644_v26  ;;  %v9769_v35 = vcombine.low %v4640_v24, %v4644_v26 }
 0x366   :  { %4389 = vmatpush1.bf16.msra.mxu0 %v9715_v30  ;;  %v4647_v30 = vld [vmem:[#allocation11 + $0x180] sm:$0xff] }
 0x367   :  { %4561 = vmatpush1.bf16.msra.mxu1 %v9717_v31  ;;  %4390 = vmatprep.subr.bf16.mxu0 %v9724_v32  ;;  %v4651_v31 = vld [vmem:[#allocation11 + $0x1a0] sm:$0xff]  ;;  %v4648_v32 = vld [vmem:[#allocation11 + $0x188] sm:$0xff] }
 0x368   :  { %4562 = vmatprep.subr.bf16.mxu1 %v9726_v33  ;;  %v4652_v33 = vld [vmem:[#allocation11 + $0x1a8] sm:$0xff]  ;;  %v9776_v36 = vcombine.high %v4647_v30, %v4651_v31  ;;  %v9775_v42 = vcombine.low %v4647_v30, %v4651_v31 }
 0x369   :  { %v9778_v37 = vcombine.high %v4648_v32, %v4652_v33  ;;  %v9777_v7 = vcombine.low %v4648_v32, %v4652_v33 }
 0x36a   :  { %4391 = vmatpush1.bf16.msra.mxu0 %v9723_v38  ;;  %v4655_v38 = vld [vmem:[#allocation11 + $0x1c0] sm:$0xff] }
 0x36b   :  { %4563 = vmatpush1.bf16.msra.mxu1 %v9725_v39  ;;  %7713 = vmatprep.subr.bf16.mxu0 %v9728_v40  ;;  %v4659_v39 = vld [vmem:[#allocation11 + $0x1e0] sm:$0xff]  ;;  %v4656_v40 = vld [vmem:[#allocation11 + $0x1c8] sm:$0xff] }
 0x36c   :  { %7885 = vmatprep.subr.bf16.mxu1 %v9730_v41  ;;  %v4660_v41 = vld [vmem:[#allocation11 + $0x1e8] sm:$0xff]  ;;  %v9783_v49 = vcombine.low %v4655_v38, %v4659_v39 }
 0x36d   :  { %4393 = vmatmul.mubr.bf16.vlgmr.msra.gmra.mrb[12].mxu0 %v11224_v57  ;;  %v9786_v1 = vcombine.high %v4656_v40, %v4660_v41 }
 0x36e   :  { %4565 = vmatmul.mubr.bf16.vlgmr.msra.gmra.mrb[12].mxu1 %v11224_v57  ;;  %7714 = vmatpush1.bf16.msra.mxu0 %v9727_v43  ;;  %v9745_v57 = vcombine.low %v4616_v51, %v4620_v52  ;;  %v9784_v43 = vcombine.high %v4655_v38, %v4659_v39 }
 0x36f   :  { %7745 = vmatprep.mubr.bf16.mxu0 %v11260_v56  ;;  %7886 = vmatpush1.bf16.msra.mxu1 %v9729_v44  ;;  %v4667_v44 = vld [vmem:[#allocation11 + $0x220] sm:$0xff] }
 0x370   :  { %7917 = vmatprep.mubr.bf16.mxu1 %v11260_v56  ;;  %7715 = vmatprep.subr.bf16.mxu0 %v9736_v0  ;;  %v4664_v0 = vld [vmem:[#allocation11 + $0x208] sm:$0xff]  ;;  %v9792_v51 = vcombine.high %v4663_v48, %v4667_v44  ;;  %v9791_v63 = vcombine.low %v4663_v48, %v4667_v44 }
 0x371   :  { %7887 = vmatprep.subr.bf16.mxu1 %v9738_v50  ;;  %v9785_v50 = vcombine.low %v4656_v40, %v4660_v41  ;;  %v9794_v52 = vcombine.high %v4664_v0, %v4668_v46  ;;  %v9793_v2 = vcombine.low %v4664_v0, %v4668_v46 }
 0x372   :  { %7716 = vmatpush1.bf16.msra.mxu0 %v9735_v54  ;;  %v4671_v54 = vld [vmem:[#allocation11 + $0x240] sm:$0xff] }
 0x373   :  { %7888 = vmatpush1.bf16.msra.mxu1 %v9737_v58  ;;  %7717 = vmatprep.subr.bf16.mxu0 %v9744_v59  ;;  %v4675_v58 = vld [vmem:[#allocation11 + $0x260] sm:$0xff]  ;;  %v4672_v59 = vld [vmem:[#allocation11 + $0x248] sm:$0xff] }
 0x374   :  { %7889 = vmatprep.subr.bf16.mxu1 %v9746_v62  ;;  %v4676_v62 = vld [vmem:[#allocation11 + $0x268] sm:$0xff]  ;;  %v9800_v3 = vcombine.high %v4671_v54, %v4675_v58  ;;  %v9799_v8 = vcombine.low %v4671_v54, %v4675_v58 }
 0x375   :  { %v9802_v4 = vcombine.high %v4672_v59, %v4676_v62  ;;  %v9801_v10 = vcombine.low %v4672_v59, %v4676_v62 }
 0x376   :  { %7718 = vmatpush1.bf16.msra.mxu0 %v9743_v6  ;;  %v4679_v6 = vld [vmem:[#allocation11 + $0x280] sm:$0xff] }
 0x377   :  { %7890 = vmatpush1.bf16.msra.mxu1 %v9745_v57  ;;  %7719 = vmatprep.subr.bf16.mxu0 %v9752_v25  ;;  %v4683_v57 = vld [vmem:[#allocation11 + $0x2a0] sm:$0xff]  ;;  %v4680_v25 = vld [vmem:[#allocation11 + $0x288] sm:$0xff] }
 0x378   :  { %7891 = vmatprep.subr.bf16.mxu1 %v9754_v15  ;;  %v4684_v15 = vld [vmem:[#allocation11 + $0x2a8] sm:$0xff]  ;;  %v9808_v11 = vcombine.high %v4679_v6, %v4683_v57  ;;  %v9807_v20 = vcombine.low %v4679_v6, %v4683_v57 }
 0x379   :  { %v9810_v12 = vcombine.high %v4680_v25, %v4684_v15  ;;  %v9809_v22 = vcombine.low %v4680_v25, %v4684_v15 }
 0x37a   :  { %7720 = vmatpush1.bf16.msra.mxu0 %v9751_v47  ;;  %v4687_v47 = vld [vmem:[#allocation11 + $0x2c0] sm:$0xff] }
 0x37b   :  { %7892 = vmatpush1.bf16.msra.mxu1 %v9753_v60  ;;  %7721 = vmatprep.subr.bf16.mxu0 %v9760_v14  ;;  %v4691_v60 = vld [vmem:[#allocation11 + $0x2e0] sm:$0xff]  ;;  %v4688_v14 = vld [vmem:[#allocation11 + $0x2c8] sm:$0xff] }
 0x37c   :  { %7893 = vmatprep.subr.bf16.mxu1 %v9762_v19  ;;  %v4692_v19 = vld [vmem:[#allocation11 + $0x2e8] sm:$0xff]  ;;  %v9816_v24 = vcombine.high %v4687_v47, %v4691_v60  ;;  %v9815_v30 = vcombine.low %v4687_v47, %v4691_v60 }
 0x37d   :  { %v9818_v26 = vcombine.high %v4688_v14, %v4692_v19  ;;  %v9817_v31 = vcombine.low %v4688_v14, %v4692_v19  ;;  %v4740_v47 = vld [vmem:[#allocation11 + $0x468] sm:$0xff]  ;;  %v4743_v19 = vld [vmem:[#allocation11 + $0x480] sm:$0xff] }
 0x37e   :  { %7722 = vmatpush1.bf16.msra.mxu0 %v9759_v5  ;;  %v4695_v5 = vld [vmem:[#allocation11 + $0x300] sm:$0xff] }
 0x37f   :  { %7894 = vmatpush1.bf16.msra.mxu1 %v9761_v17  ;;  %7723 = vmatprep.subr.bf16.mxu0 %v9768_v27  ;;  %v4699_v17 = vld [vmem:[#allocation11 + $0x320] sm:$0xff]  ;;  %v4696_v27 = vld [vmem:[#allocation11 + $0x308] sm:$0xff] }
 0x380   :  { %7895 = vmatprep.subr.bf16.mxu1 %v9770_v29  ;;  %v4700_v29 = vld [vmem:[#allocation11 + $0x328] sm:$0xff]  ;;  %v9824_v32 = vcombine.high %v4695_v5, %v4699_v17  ;;  %v9823_v38 = vcombine.low %v4695_v5, %v4699_v17 }
 0x381   :  { %v9826_v33 = vcombine.high %v4696_v27, %v4700_v29  ;;  %v9825_v39 = vcombine.low %v4696_v27, %v4700_v29 }
 0x382   :  { %7724 = vmatpush1.bf16.msra.mxu0 %v9767_v34  ;;  %v4703_v34 = vld [vmem:[#allocation11 + $0x340] sm:$0xff] }
 0x383   :  { %7896 = vmatpush1.bf16.msra.mxu1 %v9769_v35  ;;  %7725 = vmatprep.subr.bf16.mxu0 %v9776_v36  ;;  %v4707_v35 = vld [vmem:[#allocation11 + $0x360] sm:$0xff]  ;;  %v4704_v36 = vld [vmem:[#allocation11 + $0x348] sm:$0xff] }
 0x384   :  { %7897 = vmatprep.subr.bf16.mxu1 %v9778_v37  ;;  %v4708_v37 = vld [vmem:[#allocation11 + $0x368] sm:$0xff]  ;;  %v9832_v40 = vcombine.high %v4703_v34, %v4707_v35  ;;  %v9831_v48 = vcombine.low %v4703_v34, %v4707_v35 }
 0x385   :  { %v9834_v41 = vcombine.high %v4704_v36, %v4708_v37  ;;  %v9833_v44 = vcombine.low %v4704_v36, %v4708_v37 }
 0x386   :  { %7726 = vmatpush1.bf16.msra.mxu0 %v9775_v42  ;;  %v4711_v42 = vld [vmem:[#allocation11 + $0x380] sm:$0xff] }
 0x387   :  { %7898 = vmatpush1.bf16.msra.mxu1 %v9777_v7  ;;  %7727 = vmatprep.subr.bf16.mxu0 %v9784_v43  ;;  %v4715_v7 = vld [vmem:[#allocation11 + $0x3a0] sm:$0xff]  ;;  %v4712_v43 = vld [vmem:[#allocation11 + $0x388] sm:$0xff] }
 0x388   :  { %7899 = vmatprep.subr.bf16.mxu1 %v9786_v1  ;;  %v4716_v1 = vld [vmem:[#allocation11 + $0x3a8] sm:$0xff]  ;;  %v9840_v0 = vcombine.high %v4711_v42, %v4715_v7  ;;  %v9839_v54 = vcombine.low %v4711_v42, %v4715_v7 }
 0x389   :  { %v9842_v46 = vcombine.high %v4712_v43, %v4716_v1  ;;  %v9841_v58 = vcombine.low %v4712_v43, %v4716_v1 }
 0x38a   :  { %7728 = vmatpush1.bf16.msra.mxu0 %v9783_v49  ;;  %v4719_v49 = vld [vmem:[#allocation11 + $0x3c0] sm:$0xff] }
 0x38b   :  { %7900 = vmatpush1.bf16.msra.mxu1 %v9785_v50  ;;  %7729 = vmatprep.subr.bf16.mxu0 %v9792_v51  ;;  %v4723_v50 = vld [vmem:[#allocation11 + $0x3e0] sm:$0xff]  ;;  %v4720_v51 = vld [vmem:[#allocation11 + $0x3c8] sm:$0xff] }
 0x38c   :  { %7901 = vmatprep.subr.bf16.mxu1 %v9794_v52  ;;  %v4724_v52 = vld [vmem:[#allocation11 + $0x3e8] sm:$0xff]  ;;  %v9848_v59 = vcombine.high %v4719_v49, %v4723_v50  ;;  %v9847_v6 = vcombine.low %v4719_v49, %v4723_v50 }
 0x38d   :  { %v9850_v62 = vcombine.high %v4720_v51, %v4724_v52  ;;  %v9849_v57 = vcombine.low %v4720_v51, %v4724_v52 }
 0x38e   :  { %7730 = vmatpush1.bf16.msra.mxu0 %v9791_v63  ;;  %v4727_v63 = vld [vmem:[#allocation11 + $0x400] sm:$0xff] }
 0x38f   :  { %7902 = vmatpush1.bf16.msra.mxu1 %v9793_v2  ;;  %7731 = vmatprep.subr.bf16.mxu0 %v9800_v3  ;;  %v4731_v2 = vld [vmem:[#allocation11 + $0x420] sm:$0xff]  ;;  %v4728_v3 = vld [vmem:[#allocation11 + $0x408] sm:$0xff] }
 0x390   :  { %7903 = vmatprep.subr.bf16.mxu1 %v9802_v4  ;;  %v4732_v4 = vld [vmem:[#allocation11 + $0x428] sm:$0xff]  ;;  %v9856_v25 = vcombine.high %v4727_v63, %v4731_v2 }
 0x391   :  { %v9858_v15 = vcombine.high %v4728_v3, %v4732_v4  ;;  %v9857_v60 = vcombine.low %v4728_v3, %v4732_v4 }
 0x392   :  { %7732 = vmatpush1.bf16.msra.mxu0 %v9799_v8  ;;  %v4735_v8 = vld [vmem:[#allocation11 + $0x440] sm:$0xff] }
 0x393   :  { %7904 = vmatpush1.bf16.msra.mxu1 %v9801_v10  ;;  %7733 = vmatprep.subr.bf16.mxu0 %v9808_v11  ;;  %v4739_v10 = vld [vmem:[#allocation11 + $0x460] sm:$0xff]  ;;  %v9855_v11 = vcombine.low %v4727_v63, %v4731_v2 }
 0x394   :  { %7905 = vmatprep.subr.bf16.mxu1 %v9810_v12  ;;  %v4736_v12 = vld [vmem:[#allocation11 + $0x448] sm:$0xff]  ;;  %v9864_v14 = vcombine.high %v4735_v8, %v4739_v10  ;;  %v9863_v5 = vcombine.low %v4735_v8, %v4739_v10 }
 0x395   :  { %v9865_v17 = vcombine.low %v4736_v12, %v4740_v47 }
 0x396   :  { %7734 = vmatpush1.bf16.msra.mxu0 %v9807_v20  ;;  %v4747_v20 = vld [vmem:[#allocation11 + $0x4a0] sm:$0xff] }
 0x397   :  { %7906 = vmatpush1.bf16.msra.mxu1 %v9809_v22  ;;  %7735 = vmatprep.subr.bf16.mxu0 %v9816_v24  ;;  %v9866_v22 = vcombine.high %v4736_v12, %v4740_v47  ;;  %v4744_v24 = vld [vmem:[#allocation11 + $0x488] sm:$0xff]  ;;  %v9872_v27 = vcombine.high %v4743_v19, %v4747_v20  ;;  %v9871_v34 = vcombine.low %v4743_v19, %v4747_v20  ;;  %v4791_v47 = vld [vmem:[#allocation11 + $0x600] sm:$0xff] }
 0x398   :  { %7907 = vmatprep.subr.bf16.mxu1 %v9818_v26  ;;  %v4748_v26 = vld [vmem:[#allocation11 + $0x4a8] sm:$0xff] }
 0x399   :  { %v9874_v29 = vcombine.high %v4744_v24, %v4748_v26  ;;  %v9873_v35 = vcombine.low %v4744_v24, %v4748_v26  ;;  %v4796_v19 = vld [vmem:[#allocation11 + $0x628] sm:$0xff] }
 0x39a   :  { %7736 = vmatpush1.bf16.msra.mxu0 %v9815_v30  ;;  %v4751_v30 = vld [vmem:[#allocation11 + $0x4c0] sm:$0xff] }
 0x39b   :  { %7908 = vmatpush1.bf16.msra.mxu1 %v9817_v31  ;;  %7737 = vmatprep.subr.bf16.mxu0 %v9824_v32  ;;  %v4755_v31 = vld [vmem:[#allocation11 + $0x4e0] sm:$0xff]  ;;  %v4752_v32 = vld [vmem:[#allocation11 + $0x4c8] sm:$0xff] }
 0x39c   :  { %7909 = vmatprep.subr.bf16.mxu1 %v9826_v33  ;;  %v4756_v33 = vld [vmem:[#allocation11 + $0x4e8] sm:$0xff]  ;;  %v9880_v36 = vcombine.high %v4751_v30, %v4755_v31  ;;  %v9879_v42 = vcombine.low %v4751_v30, %v4755_v31 }
 0x39d   :  { %v9882_v37 = vcombine.high %v4752_v32, %v4756_v33  ;;  %v9881_v7 = vcombine.low %v4752_v32, %v4756_v33 }
 0x39e   :  { %7738 = vmatpush1.bf16.msra.mxu0 %v9823_v38  ;;  %v4759_v38 = vld [vmem:[#allocation11 + $0x500] sm:$0xff] }
 0x39f   :  { %7910 = vmatpush1.bf16.msra.mxu1 %v9825_v39  ;;  %7739 = vmatprep.subr.bf16.mxu0 %v9832_v40  ;;  %v4763_v39 = vld [vmem:[#allocation11 + $0x520] sm:$0xff]  ;;  %v4760_v40 = vld [vmem:[#allocation11 + $0x508] sm:$0xff] }
 0x3a0   :  { %7911 = vmatprep.subr.bf16.mxu1 %v9834_v41  ;;  %v4764_v41 = vld [vmem:[#allocation11 + $0x528] sm:$0xff]  ;;  %v9888_v43 = vcombine.high %v4759_v38, %v4763_v39  ;;  %v9887_v49 = vcombine.low %v4759_v38, %v4763_v39 }
 0x3a1   :  { %v9890_v1 = vcombine.high %v4760_v40, %v4764_v41  ;;  %v9889_v50 = vcombine.low %v4760_v40, %v4764_v41 }
 0x3a2   :  { %7740 = vmatpush1.bf16.msra.mxu0 %v9831_v48  ;;  %v4767_v48 = vld [vmem:[#allocation11 + $0x540] sm:$0xff] }
 0x3a3   :  { %7912 = vmatpush1.bf16.msra.mxu1 %v9833_v44  ;;  %7741 = vmatprep.subr.bf16.mxu0 %v9840_v0  ;;  %v4771_v44 = vld [vmem:[#allocation11 + $0x560] sm:$0xff]  ;;  %v4768_v0 = vld [vmem:[#allocation11 + $0x548] sm:$0xff] }
 0x3a4   :  { %7913 = vmatprep.subr.bf16.mxu1 %v9842_v46  ;;  %v4772_v46 = vld [vmem:[#allocation11 + $0x568] sm:$0xff]  ;;  %v9896_v51 = vcombine.high %v4767_v48, %v4771_v44  ;;  %v9895_v63 = vcombine.low %v4767_v48, %v4771_v44 }
 0x3a5   :  { %v9898_v52 = vcombine.high %v4768_v0, %v4772_v46  ;;  %v9897_v2 = vcombine.low %v4768_v0, %v4772_v46 }
 0x3a6   :  { %7742 = vmatpush1.bf16.msra.mxu0 %v9839_v54  ;;  %v4775_v54 = vld [vmem:[#allocation11 + $0x580] sm:$0xff] }
 0x3a7   :  { %7914 = vmatpush1.bf16.msra.mxu1 %v9841_v58  ;;  %7743 = vmatprep.subr.bf16.mxu0 %v9848_v59  ;;  %v4779_v58 = vld [vmem:[#allocation11 + $0x5a0] sm:$0xff]  ;;  %v4776_v59 = vld [vmem:[#allocation11 + $0x588] sm:$0xff] }
 0x3a8   :  { %7915 = vmatprep.subr.bf16.mxu1 %v9850_v62  ;;  %v4780_v62 = vld [vmem:[#allocation11 + $0x5a8] sm:$0xff]  ;;  %v9904_v3 = vcombine.high %v4775_v54, %v4779_v58  ;;  %v9903_v8 = vcombine.low %v4775_v54, %v4779_v58 }
 0x3a9   :  { %v9906_v4 = vcombine.high %v4776_v59, %v4780_v62  ;;  %v9905_v10 = vcombine.low %v4776_v59, %v4780_v62 }
 0x3aa   :  { %7744 = vmatpush1.bf16.msra.mxu0 %v9847_v6  ;;  %v4783_v6 = vld [vmem:[#allocation11 + $0x5c0] sm:$0xff] }
 0x3ab   :  { %7916 = vmatpush1.bf16.msra.mxu1 %v9849_v57  ;;  %7756 = vmatprep.subr.bf16.mxu0 %v9856_v25  ;;  %v4787_v57 = vld [vmem:[#allocation11 + $0x5e0] sm:$0xff]  ;;  %v4784_v25 = vld [vmem:[#allocation11 + $0x5c8] sm:$0xff] }
 0x3ac   :  { %7928 = vmatprep.subr.bf16.mxu1 %v9858_v15  ;;  %v4788_v15 = vld [vmem:[#allocation11 + $0x5e8] sm:$0xff]  ;;  %v9911_v20 = vcombine.low %v4783_v6, %v4787_v57 }
 0x3ad   :  { %7746 = vmatmul.mubr.bf16.vlgmr.msra.gmra.mrb[16].mxu0 %v11256_v45  ;;  %v9914_v12 = vcombine.high %v4784_v25, %v4788_v15 }
 0x3ae   :  { %7918 = vmatmul.mubr.bf16.vlgmr.msra.gmra.mrb[16].mxu1 %v11256_v45  ;;  %7757 = vmatpush1.bf16.msra.mxu0 %v9855_v11  ;;  %v9912_v11 = vcombine.high %v4783_v6, %v4787_v57 }
 0x3af   :  { %7788 = vmatprep.mubr.bf16.mxu0 %v11262_v61  ;;  %7929 = vmatpush1.bf16.msra.mxu1 %v9857_v60  ;;  %v4795_v60 = vld [vmem:[#allocation11 + $0x620] sm:$0xff] }
 0x3b0   :  { %7960 = vmatprep.mubr.bf16.mxu1 %v11262_v61  ;;  %7758 = vmatprep.subr.bf16.mxu0 %v9864_v14  ;;  %v4792_v14 = vld [vmem:[#allocation11 + $0x608] sm:$0xff]  ;;  %v9920_v24 = vcombine.high %v4791_v47, %v4795_v60  ;;  %v9919_v30 = vcombine.low %v4791_v47, %v4795_v60 }
 0x3b1   :  { %7930 = vmatprep.subr.bf16.mxu1 %v9866_v22  ;;  %v9913_v22 = vcombine.low %v4784_v25, %v4788_v15  ;;  %v9922_v26 = vcombine.high %v4792_v14, %v4796_v19  ;;  %v9921_v31 = vcombine.low %v4792_v14, %v4796_v19 }
 0x3b2   :  { %7759 = vmatpush1.bf16.msra.mxu0 %v9863_v5  ;;  %v4799_v5 = vld [vmem:[#allocation11 + $0x640] sm:$0xff] }
 0x3b3   :  { %7931 = vmatpush1.bf16.msra.mxu1 %v9865_v17  ;;  %7760 = vmatprep.subr.bf16.mxu0 %v9872_v27  ;;  %v4803_v17 = vld [vmem:[#allocation11 + $0x660] sm:$0xff]  ;;  %v4800_v27 = vld [vmem:[#allocation11 + $0x648] sm:$0xff] }
 0x3b4   :  { %7932 = vmatprep.subr.bf16.mxu1 %v9874_v29  ;;  %v4804_v29 = vld [vmem:[#allocation11 + $0x668] sm:$0xff]  ;;  %v9928_v32 = vcombine.high %v4799_v5, %v4803_v17  ;;  %v9927_v38 = vcombine.low %v4799_v5, %v4803_v17 }
 0x3b5   :  { %v9930_v33 = vcombine.high %v4800_v27, %v4804_v29  ;;  %v9929_v39 = vcombine.low %v4800_v27, %v4804_v29 }
 0x3b6   :  { %7761 = vmatpush1.bf16.msra.mxu0 %v9871_v34  ;;  %v4807_v34 = vld [vmem:[#allocation11 + $0x680] sm:$0xff] }
 0x3b7   :  { %7933 = vmatpush1.bf16.msra.mxu1 %v9873_v35  ;;  %7762 = vmatprep.subr.bf16.mxu0 %v9880_v36  ;;  %v4811_v35 = vld [vmem:[#allocation11 + $0x6a0] sm:$0xff]  ;;  %v4808_v36 = vld [vmem:[#allocation11 + $0x688] sm:$0xff] }
 0x3b8   :  { %7934 = vmatprep.subr.bf16.mxu1 %v9882_v37  ;;  %v4812_v37 = vld [vmem:[#allocation11 + $0x6a8] sm:$0xff]  ;;  %v9936_v40 = vcombine.high %v4807_v34, %v4811_v35  ;;  %v9935_v48 = vcombine.low %v4807_v34, %v4811_v35 }
 0x3b9   :  { %v9938_v41 = vcombine.high %v4808_v36, %v4812_v37  ;;  %v9937_v44 = vcombine.low %v4808_v36, %v4812_v37 }
 0x3ba   :  { %7763 = vmatpush1.bf16.msra.mxu0 %v9879_v42  ;;  %v4815_v42 = vld [vmem:[#allocation11 + $0x6c0] sm:$0xff] }
 0x3bb   :  { %7935 = vmatpush1.bf16.msra.mxu1 %v9881_v7  ;;  %7764 = vmatprep.subr.bf16.mxu0 %v9888_v43  ;;  %v4819_v7 = vld [vmem:[#allocation11 + $0x6e0] sm:$0xff]  ;;  %v4816_v43 = vld [vmem:[#allocation11 + $0x6c8] sm:$0xff] }
 0x3bc   :  { %7936 = vmatprep.subr.bf16.mxu1 %v9890_v1  ;;  %v4820_v1 = vld [vmem:[#allocation11 + $0x6e8] sm:$0xff]  ;;  %v9944_v0 = vcombine.high %v4815_v42, %v4819_v7  ;;  %v9943_v54 = vcombine.low %v4815_v42, %v4819_v7 }
 0x3bd   :  { %v9946_v46 = vcombine.high %v4816_v43, %v4820_v1  ;;  %v9945_v58 = vcombine.low %v4816_v43, %v4820_v1 }
 0x3be   :  { %7765 = vmatpush1.bf16.msra.mxu0 %v9887_v49  ;;  %v4823_v49 = vld [vmem:[#allocation11 + $0x700] sm:$0xff] }
 0x3bf   :  { %7937 = vmatpush1.bf16.msra.mxu1 %v9889_v50  ;;  %7766 = vmatprep.subr.bf16.mxu0 %v9896_v51  ;;  %v4827_v50 = vld [vmem:[#allocation11 + $0x720] sm:$0xff]  ;;  %v4824_v51 = vld [vmem:[#allocation11 + $0x708] sm:$0xff] }
 0x3c0   :  { %7938 = vmatprep.subr.bf16.mxu1 %v9898_v52  ;;  %v4828_v52 = vld [vmem:[#allocation11 + $0x728] sm:$0xff]  ;;  %v9952_v59 = vcombine.high %v4823_v49, %v4827_v50  ;;  %v9951_v6 = vcombine.low %v4823_v49, %v4827_v50 }
 0x3c1   :  { %v9954_v62 = vcombine.high %v4824_v51, %v4828_v52  ;;  %v9953_v57 = vcombine.low %v4824_v51, %v4828_v52 }
 0x3c2   :  { %7767 = vmatpush1.bf16.msra.mxu0 %v9895_v63  ;;  %v4831_v63 = vld [vmem:[#allocation11 + $0x740] sm:$0xff] }
 0x3c3   :  { %7939 = vmatpush1.bf16.msra.mxu1 %v9897_v2  ;;  %7768 = vmatprep.subr.bf16.mxu0 %v9904_v3  ;;  %v4835_v2 = vld [vmem:[#allocation11 + $0x760] sm:$0xff]  ;;  %v4832_v3 = vld [vmem:[#allocation11 + $0x748] sm:$0xff] }
 0x3c4   :  { %7940 = vmatprep.subr.bf16.mxu1 %v9906_v4  ;;  %v4836_v4 = vld [vmem:[#allocation11 + $0x768] sm:$0xff]  ;;  %v9960_v25 = vcombine.high %v4831_v63, %v4835_v2  ;;  %v9959_v47 = vcombine.low %v4831_v63, %v4835_v2 }
 0x3c5   :  { %v9962_v15 = vcombine.high %v4832_v3, %v4836_v4  ;;  %v9961_v60 = vcombine.low %v4832_v3, %v4836_v4 }
 0x3c6   :  { %7769 = vmatpush1.bf16.msra.mxu0 %v9903_v8  ;;  %v4839_v8 = vld [vmem:[#allocation11 + $0x780] sm:$0xff] }
 0x3c7   :  { %7941 = vmatpush1.bf16.msra.mxu1 %v9905_v10  ;;  %7770 = vmatprep.subr.bf16.mxu0 %v9912_v11  ;;  %v4843_v10 = vld [vmem:[#allocation11 + $0x7a0] sm:$0xff]  ;;  %v4840_v11 = vld [vmem:[#allocation11 + $0x788] sm:$0xff] }
 0x3c8   :  { %7942 = vmatprep.subr.bf16.mxu1 %v9914_v12  ;;  %v4844_v12 = vld [vmem:[#allocation11 + $0x7a8] sm:$0xff]  ;;  %v9968_v14 = vcombine.high %v4839_v8, %v4843_v10  ;;  %v9967_v5 = vcombine.low %v4839_v8, %v4843_v10 }
 0x3c9   :  { %v9970_v19 = vcombine.high %v4840_v11, %v4844_v12  ;;  %v9969_v17 = vcombine.low %v4840_v11, %v4844_v12 }
 0x3ca   :  { %7771 = vmatpush1.bf16.msra.mxu0 %v9911_v20  ;;  %v4847_v20 = vld [vmem:[#allocation11 + $0x7c0] sm:$0xff] }
 0x3cb   :  { %7943 = vmatpush1.bf16.msra.mxu1 %v9913_v22  ;;  %7772 = vmatprep.subr.bf16.mxu0 %v9920_v24  ;;  %v4851_v22 = vld [vmem:[#allocation11 + $0x7e0] sm:$0xff]  ;;  %v4848_v24 = vld [vmem:[#allocation11 + $0x7c8] sm:$0xff] }
 0x3cc   :  { %7944 = vmatprep.subr.bf16.mxu1 %v9922_v26  ;;  %v4852_v26 = vld [vmem:[#allocation11 + $0x7e8] sm:$0xff]  ;;  %v9976_v27 = vcombine.high %v4847_v20, %v4851_v22  ;;  %v9975_v34 = vcombine.low %v4847_v20, %v4851_v22 }
 0x3cd   :  { %v9978_v29 = vcombine.high %v4848_v24, %v4852_v26  ;;  %v9977_v35 = vcombine.low %v4848_v24, %v4852_v26 }
 0x3ce   :  { %7773 = vmatpush1.bf16.msra.mxu0 %v9919_v30  ;;  %v4855_v30 = vld [vmem:[#allocation11 + $0x800] sm:$0xff] }
 0x3cf   :  { %7945 = vmatpush1.bf16.msra.mxu1 %v9921_v31  ;;  %7774 = vmatprep.subr.bf16.mxu0 %v9928_v32  ;;  %v4859_v31 = vld [vmem:[#allocation11 + $0x820] sm:$0xff]  ;;  %v4856_v32 = vld [vmem:[#allocation11 + $0x808] sm:$0xff] }
 0x3d0   :  { %7946 = vmatprep.subr.bf16.mxu1 %v9930_v33  ;;  %v4860_v33 = vld [vmem:[#allocation11 + $0x828] sm:$0xff]  ;;  %v9984_v36 = vcombine.high %v4855_v30, %v4859_v31  ;;  %v9983_v42 = vcombine.low %v4855_v30, %v4859_v31 }
 0x3d1   :  { %v9986_v37 = vcombine.high %v4856_v32, %v4860_v33  ;;  %v9985_v7 = vcombine.low %v4856_v32, %v4860_v33 }
 0x3d2   :  { %7775 = vmatpush1.bf16.msra.mxu0 %v9927_v38  ;;  %v4863_v38 = vld [vmem:[#allocation11 + $0x840] sm:$0xff] }
 0x3d3   :  { %7947 = vmatpush1.bf16.msra.mxu1 %v9929_v39  ;;  %7776 = vmatprep.subr.bf16.mxu0 %v9936_v40  ;;  %v4867_v39 = vld [vmem:[#allocation11 + $0x860] sm:$0xff]  ;;  %v4864_v40 = vld [vmem:[#allocation11 + $0x848] sm:$0xff] }
 0x3d4   :  { %7948 = vmatprep.subr.bf16.mxu1 %v9938_v41  ;;  %v4868_v41 = vld [vmem:[#allocation11 + $0x868] sm:$0xff]  ;;  %v9992_v43 = vcombine.high %v4863_v38, %v4867_v39  ;;  %v9991_v49 = vcombine.low %v4863_v38, %v4867_v39 }
 0x3d5   :  { %v9994_v1 = vcombine.high %v4864_v40, %v4868_v41  ;;  %v9993_v50 = vcombine.low %v4864_v40, %v4868_v41 }
 0x3d6   :  { %7777 = vmatpush1.bf16.msra.mxu0 %v9935_v48  ;;  %v4871_v48 = vld [vmem:[#allocation11 + $0x880] sm:$0xff] }
 0x3d7   :  { %7949 = vmatpush1.bf16.msra.mxu1 %v9937_v44  ;;  %7778 = vmatprep.subr.bf16.mxu0 %v9944_v0  ;;  %v4875_v44 = vld [vmem:[#allocation11 + $0x8a0] sm:$0xff]  ;;  %v4872_v0 = vld [vmem:[#allocation11 + $0x888] sm:$0xff] }
 0x3d8   :  { %7950 = vmatprep.subr.bf16.mxu1 %v9946_v46  ;;  %v4876_v46 = vld [vmem:[#allocation11 + $0x8a8] sm:$0xff]  ;;  %v10000_v51 = vcombine.high %v4871_v48, %v4875_v44  ;;  %v9999_v63 = vcombine.low %v4871_v48, %v4875_v44 }
 0x3d9   :  { %v10002_v52 = vcombine.high %v4872_v0, %v4876_v46  ;;  %v10001_v2 = vcombine.low %v4872_v0, %v4876_v46 }
 0x3da   :  { %7779 = vmatpush1.bf16.msra.mxu0 %v9943_v54  ;;  %v4879_v54 = vld [vmem:[#allocation11 + $0x8c0] sm:$0xff] }
 0x3db   :  { %7951 = vmatpush1.bf16.msra.mxu1 %v9945_v58  ;;  %7780 = vmatprep.subr.bf16.mxu0 %v9952_v59  ;;  %v4883_v58 = vld [vmem:[#allocation11 + $0x8e0] sm:$0xff]  ;;  %v4880_v59 = vld [vmem:[#allocation11 + $0x8c8] sm:$0xff] }
 0x3dc   :  { %7952 = vmatprep.subr.bf16.mxu1 %v9954_v62  ;;  %v4884_v62 = vld [vmem:[#allocation11 + $0x8e8] sm:$0xff]  ;;  %v10008_v3 = vcombine.high %v4879_v54, %v4883_v58  ;;  %v10007_v8 = vcombine.low %v4879_v54, %v4883_v58 }
 0x3dd   :  { %v10010_v4 = vcombine.high %v4880_v59, %v4884_v62  ;;  %v10009_v10 = vcombine.low %v4880_v59, %v4884_v62 }
 0x3de   :  { %7781 = vmatpush1.bf16.msra.mxu0 %v9951_v6  ;;  %v4887_v6 = vld [vmem:[#allocation11 + $0x900] sm:$0xff] }
 0x3df   :  { %7953 = vmatpush1.bf16.msra.mxu1 %v9953_v57  ;;  %7782 = vmatprep.subr.bf16.mxu0 %v9960_v25  ;;  %v4891_v57 = vld [vmem:[#allocation11 + $0x920] sm:$0xff]  ;;  %v4888_v25 = vld [vmem:[#allocation11 + $0x908] sm:$0xff] }
 0x3e0   :  { %7954 = vmatprep.subr.bf16.mxu1 %v9962_v15  ;;  %v4892_v15 = vld [vmem:[#allocation11 + $0x928] sm:$0xff]  ;;  %v10016_v11 = vcombine.high %v4887_v6, %v4891_v57  ;;  %v10015_v20 = vcombine.low %v4887_v6, %v4891_v57 }
 0x3e1   :  { %v10018_v12 = vcombine.high %v4888_v25, %v4892_v15  ;;  %v10017_v22 = vcombine.low %v4888_v25, %v4892_v15 }
 0x3e2   :  { %7783 = vmatpush1.bf16.msra.mxu0 %v9959_v47  ;;  %v4895_v47 = vld [vmem:[#allocation11 + $0x940] sm:$0xff] }
 0x3e3   :  { %7955 = vmatpush1.bf16.msra.mxu1 %v9961_v60  ;;  %7784 = vmatprep.subr.bf16.mxu0 %v9968_v14  ;;  %v4899_v60 = vld [vmem:[#allocation11 + $0x960] sm:$0xff]  ;;  %v4896_v14 = vld [vmem:[#allocation11 + $0x948] sm:$0xff] }
 0x3e4   :  { %7956 = vmatprep.subr.bf16.mxu1 %v9970_v19  ;;  %v4900_v19 = vld [vmem:[#allocation11 + $0x968] sm:$0xff]  ;;  %v10024_v24 = vcombine.high %v4895_v47, %v4899_v60  ;;  %v10023_v30 = vcombine.low %v4895_v47, %v4899_v60 }
 0x3e5   :  { %v10026_v26 = vcombine.high %v4896_v14, %v4900_v19  ;;  %v10025_v31 = vcombine.low %v4896_v14, %v4900_v19 }
 0x3e6   :  { %7785 = vmatpush1.bf16.msra.mxu0 %v9967_v5  ;;  %v4903_v5 = vld [vmem:[#allocation11 + $0x980] sm:$0xff] }
 0x3e7   :  { %7957 = vmatpush1.bf16.msra.mxu1 %v9969_v17  ;;  %7786 = vmatprep.subr.bf16.mxu0 %v9976_v27  ;;  %v4907_v17 = vld [vmem:[#allocation11 + $0x9a0] sm:$0xff]  ;;  %v4904_v27 = vld [vmem:[#allocation11 + $0x988] sm:$0xff] }
 0x3e8   :  { %7958 = vmatprep.subr.bf16.mxu1 %v9978_v29  ;;  %v4908_v29 = vld [vmem:[#allocation11 + $0x9a8] sm:$0xff]  ;;  %v10032_v32 = vcombine.high %v4903_v5, %v4907_v17  ;;  %v10031_v38 = vcombine.low %v4903_v5, %v4907_v17 }
 0x3e9   :  { %v10034_v33 = vcombine.high %v4904_v27, %v4908_v29  ;;  %v10033_v39 = vcombine.low %v4904_v27, %v4908_v29 }
 0x3ea   :  { %7787 = vmatpush1.bf16.msra.mxu0 %v9975_v34  ;;  %v4911_v34 = vld [vmem:[#allocation11 + $0x9c0] sm:$0xff] }
 0x3eb   :  { %7959 = vmatpush1.bf16.msra.mxu1 %v9977_v35  ;;  %7799 = vmatprep.subr.bf16.mxu0 %v9984_v36  ;;  %v4915_v35 = vld [vmem:[#allocation11 + $0x9e0] sm:$0xff]  ;;  %v4912_v36 = vld [vmem:[#allocation11 + $0x9c8] sm:$0xff] }
 0x3ec   :  { %7971 = vmatprep.subr.bf16.mxu1 %v9986_v37  ;;  %v4916_v37 = vld [vmem:[#allocation11 + $0x9e8] sm:$0xff]  ;;  %v10040_v40 = vcombine.high %v4911_v34, %v4915_v35  ;;  %v10039_v48 = vcombine.low %v4911_v34, %v4915_v35 }
 0x3ed   :  { %7789 = vmatmul.mubr.bf16.vlgmr.msra.gmra.mrb[16].mxu0 %v11258_v28  ;;  %v10042_v41 = vcombine.high %v4912_v36, %v4916_v37  ;;  %v10041_v44 = vcombine.low %v4912_v36, %v4916_v37 }
 0x3ee   :  { %7961 = vmatmul.mubr.bf16.vlgmr.msra.gmra.mrb[16].mxu1 %v11258_v28  ;;  %7800 = vmatpush1.bf16.msra.mxu0 %v9983_v42  ;;  %v4919_v42 = vld [vmem:[#allocation11 + $0xa00] sm:$0xff] }
 0x3ef   :  { %7972 = vmatpush1.bf16.msra.mxu1 %v9985_v7  ;;  %7801 = vmatprep.subr.bf16.mxu0 %v9992_v43  ;;  %v4923_v7 = vld [vmem:[#allocation11 + $0xa20] sm:$0xff]  ;;  %v4920_v43 = vld [vmem:[#allocation11 + $0xa08] sm:$0xff] }
 0x3f0   :  { %7973 = vmatprep.subr.bf16.mxu1 %v9994_v1  ;;  %v4924_v1 = vld [vmem:[#allocation11 + $0xa28] sm:$0xff]  ;;  %v10048_v0 = vcombine.high %v4919_v42, %v4923_v7  ;;  %v10047_v54 = vcombine.low %v4919_v42, %v4923_v7 }
 0x3f1   :  { %v10050_v46 = vcombine.high %v4920_v43, %v4924_v1  ;;  %v10049_v58 = vcombine.low %v4920_v43, %v4924_v1 }
 0x3f2   :  { %7802 = vmatpush1.bf16.msra.mxu0 %v9991_v49  ;;  %v4927_v49 = vld [vmem:[#allocation11 + $0xa40] sm:$0xff] }
 0x3f3   :  { %7974 = vmatpush1.bf16.msra.mxu1 %v9993_v50  ;;  %7803 = vmatprep.subr.bf16.mxu0 %v10000_v51  ;;  %v4931_v50 = vld [vmem:[#allocation11 + $0xa60] sm:$0xff]  ;;  %v4928_v51 = vld [vmem:[#allocation11 + $0xa48] sm:$0xff] }
 0x3f4   :  { %7975 = vmatprep.subr.bf16.mxu1 %v10002_v52  ;;  %v4932_v52 = vld [vmem:[#allocation11 + $0xa68] sm:$0xff]  ;;  %v10056_v59 = vcombine.high %v4927_v49, %v4931_v50  ;;  %v10055_v6 = vcombine.low %v4927_v49, %v4931_v50 }
 0x3f5   :  { %v10058_v62 = vcombine.high %v4928_v51, %v4932_v52  ;;  %v10057_v57 = vcombine.low %v4928_v51, %v4932_v52 }
 0x3f6   :  { %7804 = vmatpush1.bf16.msra.mxu0 %v9999_v63  ;;  %v4935_v63 = vld [vmem:[#allocation11 + $0xa80] sm:$0xff] }
 0x3f7   :  { %7976 = vmatpush1.bf16.msra.mxu1 %v10001_v2  ;;  %7805 = vmatprep.subr.bf16.mxu0 %v10008_v3  ;;  %v4939_v2 = vld [vmem:[#allocation11 + $0xaa0] sm:$0xff]  ;;  %v4936_v3 = vld [vmem:[#allocation11 + $0xa88] sm:$0xff] }
 0x3f8   :  { %7977 = vmatprep.subr.bf16.mxu1 %v10010_v4  ;;  %v4940_v4 = vld [vmem:[#allocation11 + $0xaa8] sm:$0xff]  ;;  %v10064_v25 = vcombine.high %v4935_v63, %v4939_v2  ;;  %v10063_v47 = vcombine.low %v4935_v63, %v4939_v2 }
 0x3f9   :  { %v10066_v15 = vcombine.high %v4936_v3, %v4940_v4  ;;  %v10065_v60 = vcombine.low %v4936_v3, %v4940_v4 }
 0x3fa   :  { %7806 = vmatpush1.bf16.msra.mxu0 %v10007_v8  ;;  %v4943_v8 = vld [vmem:[#allocation11 + $0xac0] sm:$0xff] }
 0x3fb   :  { %7978 = vmatpush1.bf16.msra.mxu1 %v10009_v10  ;;  %7807 = vmatprep.subr.bf16.mxu0 %v10016_v11  ;;  %v4947_v10 = vld [vmem:[#allocation11 + $0xae0] sm:$0xff]  ;;  %v4944_v11 = vld [vmem:[#allocation11 + $0xac8] sm:$0xff] }
 0x3fc   :  { %7979 = vmatprep.subr.bf16.mxu1 %v10018_v12  ;;  %v4948_v12 = vld [vmem:[#allocation11 + $0xae8] sm:$0xff]  ;;  %v10072_v14 = vcombine.high %v4943_v8, %v4947_v10  ;;  %v10071_v5 = vcombine.low %v4943_v8, %v4947_v10 }
 0x3fd   :  { %v10074_v19 = vcombine.high %v4944_v11, %v4948_v12  ;;  %v10073_v17 = vcombine.low %v4944_v11, %v4948_v12 }
 0x3fe   :  { %7808 = vmatpush1.bf16.msra.mxu0 %v10015_v20  ;;  %v4951_v20 = vld [vmem:[#allocation11 + $0xb00] sm:$0xff] }
 0x3ff   :  { %7980 = vmatpush1.bf16.msra.mxu1 %v10017_v22  ;;  %7809 = vmatprep.subr.bf16.mxu0 %v10024_v24  ;;  %v4955_v22 = vld [vmem:[#allocation11 + $0xb20] sm:$0xff]  ;;  %v4952_v24 = vld [vmem:[#allocation11 + $0xb08] sm:$0xff] }
 0x400   :  { %7981 = vmatprep.subr.bf16.mxu1 %v10026_v26  ;;  %v4956_v26 = vld [vmem:[#allocation11 + $0xb28] sm:$0xff]  ;;  %v10080_v27 = vcombine.high %v4951_v20, %v4955_v22  ;;  %v10079_v34 = vcombine.low %v4951_v20, %v4955_v22 }
 0x401   :  { %v10082_v29 = vcombine.high %v4952_v24, %v4956_v26  ;;  %v10081_v35 = vcombine.low %v4952_v24, %v4956_v26 }
 0x402   :  { %7810 = vmatpush1.bf16.msra.mxu0 %v10023_v30  ;;  %v4959_v30 = vld [vmem:[#allocation11 + $0xb40] sm:$0xff] }
 0x403   :  { %7982 = vmatpush1.bf16.msra.mxu1 %v10025_v31  ;;  %7811 = vmatprep.subr.bf16.mxu0 %v10032_v32  ;;  %v4963_v31 = vld [vmem:[#allocation11 + $0xb60] sm:$0xff]  ;;  %v4960_v32 = vld [vmem:[#allocation11 + $0xb48] sm:$0xff] }
 0x404   :  { %7983 = vmatprep.subr.bf16.mxu1 %v10034_v33  ;;  %v4964_v33 = vld [vmem:[#allocation11 + $0xb68] sm:$0xff]  ;;  %v10088_v36 = vcombine.high %v4959_v30, %v4963_v31  ;;  %v10087_v42 = vcombine.low %v4959_v30, %v4963_v31 }
 0x405   :  { %v10090_v37 = vcombine.high %v4960_v32, %v4964_v33  ;;  %v10089_v7 = vcombine.low %v4960_v32, %v4964_v33 }
 0x406   :  { %7812 = vmatpush1.bf16.msra.mxu0 %v10031_v38  ;;  %v4967_v38 = vld [vmem:[#allocation11 + $0xb80] sm:$0xff] }
 0x407   :  { %7984 = vmatpush1.bf16.msra.mxu1 %v10033_v39  ;;  %7813 = vmatprep.subr.bf16.mxu0 %v10040_v40  ;;  %v4971_v39 = vld [vmem:[#allocation11 + $0xba0] sm:$0xff]  ;;  %v4968_v40 = vld [vmem:[#allocation11 + $0xb88] sm:$0xff] }
 0x408   :  { %7985 = vmatprep.subr.bf16.mxu1 %v10042_v41  ;;  %v4972_v41 = vld [vmem:[#allocation11 + $0xba8] sm:$0xff]  ;;  %v10096_v43 = vcombine.high %v4967_v38, %v4971_v39  ;;  %v10095_v49 = vcombine.low %v4967_v38, %v4971_v39  ;;  %v4991_v38 = vld [vmem:[#allocation11 + $0xc40] sm:$0xff] }
 0x409   :  { %v10098_v1 = vcombine.high %v4968_v40, %v4972_v41  ;;  %v10097_v50 = vcombine.low %v4968_v40, %v4972_v41  ;;  %v4995_v40 = vld [vmem:[#allocation11 + $0xc60] sm:$0xff]  ;;  %v4992_v41 = vld [vmem:[#allocation11 + $0xc48] sm:$0xff] }
 0x40a   :  { %7814 = vmatpush1.bf16.msra.mxu0 %v10039_v48  ;;  %v4975_v48 = vld [vmem:[#allocation11 + $0xbc0] sm:$0xff] }
 0x40b   :  { %7986 = vmatpush1.bf16.msra.mxu1 %v10041_v44  ;;  %7815 = vmatprep.subr.bf16.mxu0 %v10048_v0  ;;  %v4979_v44 = vld [vmem:[#allocation11 + $0xbe0] sm:$0xff]  ;;  %v4976_v0 = vld [vmem:[#allocation11 + $0xbc8] sm:$0xff] }
 0x40c   :  { %7987 = vmatprep.subr.bf16.mxu1 %v10050_v46  ;;  %v4980_v46 = vld [vmem:[#allocation11 + $0xbe8] sm:$0xff]  ;;  %v10104_v51 = vcombine.high %v4975_v48, %v4979_v44  ;;  %v10103_v63 = vcombine.low %v4975_v48, %v4979_v44 }
 0x40d   :  { %v10106_v52 = vcombine.high %v4976_v0, %v4980_v46  ;;  %v10105_v2 = vcombine.low %v4976_v0, %v4980_v46  ;;  %v4999_v46 = vld [vmem:[#allocation11 + $0xc80] sm:$0xff] }
 0x40e   :  { %7816 = vmatpush1.bf16.msra.mxu0 %v10047_v54  ;;  %v11274_v54 = vld [vmem:[#allocation11 + $0xc00] sm:$0xff] }
 0x40f   :  { %7988 = vmatpush1.bf16.msra.mxu1 %v10049_v58  ;;  %7817 = vmatprep.subr.bf16.mxu0 %v10056_v59  ;;  %v11276_v58 = vld [vmem:[#allocation11 + $0xc20] sm:$0xff]  ;;  %v11278_v59 = vld [vmem:[#allocation11 + $0xc08] sm:$0xff] }
 0x410   :  { %7989 = vmatprep.subr.bf16.mxu1 %v10058_v62  ;;  %v11280_v62 = vld [vmem:[#allocation11 + $0xc28] sm:$0xff]  ;;  %v10112_v3 = vcombine.high %v11274_v54, %v11276_v58  ;;  %v10111_v48 = vcombine.low %v11274_v54, %v11276_v58  ;;  %v10119_v54 = vcombine.low %v4991_v38, %v4995_v40 }
 0x411   :  { %v10114_v4 = vcombine.high %v11278_v59, %v11280_v62  ;;  %v10113_v44 = vcombine.low %v11278_v59, %v11280_v62 }
 0x412   :  { %7818 = vmatpush1.bf16.msra.mxu0 %v10055_v6  ;;  %v10716_v6 = vld [vmem:[#allocation10] sm:$0xff] }
 0x413   :  { %7990 = vmatpush1.bf16.msra.mxu1 %v10057_v57  ;;  %7819 = vmatprep.subr.bf16.mxu0 %v10064_v25  ;;  %v1306_v57 = vrot.slane %v10716_v6, %v11199_v9  ;;  %v1314_v25 = vrot.slane %v10716_v6, %v11215_v53  ;;  %v1318_v8 = vrot.slane %v10716_v6, %v11218_v55 }
 0x414   :  { %7991 = vmatprep.subr.bf16.mxu1 %v10066_v15  ;;  %v1310_v15 = vrot.slane %v10716_v6, %v11202_v13  ;;  %v5012_v6 = vld [vmem:[#allocation11 + $0xce8] sm:$0xff] }
 0x416   :  { %7820 = vmatpush1.bf16.msra.mxu0 %v10063_v47 }
 0x417   :  { %7992 = vmatpush1.bf16.msra.mxu1 %v10065_v60  ;;  %7821 = vmatprep.subr.bf16.mxu0 %v10072_v14 }
 0x418   :  { %7993 = vmatprep.subr.bf16.mxu1 %v10074_v19 }
 0x41a   :  { %7822 = vmatpush1.bf16.msra.mxu0 %v10071_v5 }
 0x41b   :  { %7994 = vmatpush1.bf16.msra.mxu1 %v10073_v17  ;;  %7823 = vmatprep.subr.bf16.mxu0 %v10080_v27 }
 0x41c   :  { %7995 = vmatprep.subr.bf16.mxu1 %v10082_v29 }
 0x41e   :  { %7824 = vmatpush1.bf16.msra.mxu0 %v10079_v34 }
 0x41f   :  { %7996 = vmatpush1.bf16.msra.mxu1 %v10081_v35  ;;  %7825 = vmatprep.subr.bf16.mxu0 %v10088_v36 }
 0x420   :  { %7997 = vmatprep.subr.bf16.mxu1 %v10090_v37 }
 0x422   :  { %7826 = vmatpush1.bf16.msra.mxu0 %v10087_v42  ;;  %v4996_v42 = vld [vmem:[#allocation11 + $0xc68] sm:$0xff] }
 0x423   :  { %7998 = vmatpush1.bf16.msra.mxu1 %v10089_v7  ;;  %7827 = vmatprep.subr.bf16.mxu0 %v10096_v43  ;;  %v10121_v58 = vcombine.low %v4992_v41, %v4996_v42 }
 0x424   :  { %7999 = vmatprep.subr.bf16.mxu1 %v10098_v1 }
 0x426   :  { %7828 = vmatpush1.bf16.msra.mxu0 %v10095_v49  ;;  %v10120_v49 = vcombine.high %v4991_v38, %v4995_v40  ;;  %v5039_v40 = vld [vmem:[#allocation11 + $0xdc0] sm:$0xff] }
 0x427   :  { %8000 = vmatpush1.bf16.msra.mxu1 %v10097_v50  ;;  %7829 = vmatprep.subr.bf16.mxu0 %v10104_v51  ;;  %v10122_v50 = vcombine.high %v4992_v41, %v4996_v42  ;;  %v5003_v51 = vld [vmem:[#allocation11 + $0xca0] sm:$0xff]  ;;  %v5040_v42 = vld [vmem:[#allocation11 + $0xdc8] sm:$0xff] }
 0x428   :  { %8001 = vmatprep.subr.bf16.mxu1 %v10106_v52  ;;  %v5000_v52 = vld [vmem:[#allocation11 + $0xc88] sm:$0xff]  ;;  %v10128_v59 = vcombine.high %v4999_v46, %v5003_v51  ;;  %v5043_v41 = vld [vmem:[#allocation11 + $0xde0] sm:$0xff] }
 0x42a   :  { %7830 = vmatpush1.bf16.msra.mxu0 %v10103_v63  ;;  %v5004_v63 = vld [vmem:[#allocation11 + $0xca8] sm:$0xff] }
 0x42b   :  { %8002 = vmatpush1.bf16.msra.mxu1 %v10105_v2  ;;  %7842 = vmatprep.subr.bf16.mxu0 %v10112_v3  ;;  %v10130_v62 = vcombine.high %v5000_v52, %v5004_v63  ;;  %v5007_v2 = vld [vmem:[#allocation11 + $0xcc0] sm:$0xff] }
 0x42c   :  { %8014 = vmatprep.subr.bf16.mxu1 %v10114_v4  ;;  %v5011_v3 = vld [vmem:[#allocation11 + $0xce0] sm:$0xff]  ;;  %v5008_v4 = vld [vmem:[#allocation11 + $0xcc8] sm:$0xff] }
 0x440   :  { %v4394_v10 = vpop.f32.mrb[12].mxu0 }
 0x441   :  { %v10411_v11 = vadd.f32 %v4394_v10, %v1306_v57  ;;  %v4566_v12 = vpop.f32.mrb[12].mxu1  ;;  %v4396_v47 = vpop.f32.mrb[13].mxu0  ;;  %v5015_v10 = vld [vmem:[#allocation11 + $0xd00] sm:$0xff] }
 0x442   :  { %v10415_v60 = vadd.f32 %v4566_v12, %v1314_v25  ;;  %v10412_v14 = vadd.f32 %v4396_v47, %v1310_v15  ;;  %v4568_v19 = vpop.f32.mrb[13].mxu1  ;;  %v4398_v20 = vpop.f32.mrb[14].mxu0  ;;  %v5016_v12 = vld [vmem:[#allocation11 + $0xd08] sm:$0xff] }
 0x443   :  { %10660 = vtanh.f32 %v10411_v11  ;;  %v10416_v22 = vadd.f32 %v4568_v19, %v1318_v8  ;;  %v10413_v24 = vadd.f32 %v4398_v20, %v1306_v57  ;;  %v4570_v26 = vpop.f32.mrb[14].mxu1  ;;  %v4400_v5 = vpop.f32.mrb[15].mxu0  ;;  %v10127_v57 = vcombine.low %v4999_v46, %v5003_v51  ;;  %v5019_v11 = vld [vmem:[#allocation11 + $0xd20] sm:$0xff]  ;;  %v5020_v47 = vld [vmem:[#allocation11 + $0xd28] sm:$0xff] }
 0x444   :  { %10662 = vtanh.f32 %v10415_v60  ;;  %v10417_v17 = vadd.f32 %v4570_v26, %v1314_v25  ;;  %v4572_v27 = vpop.f32.mrb[15].mxu1  ;;  %v10414_v29 = vadd.f32 %v4400_v5, %v1310_v15  ;;  %v10129_v25 = vcombine.low %v5000_v52, %v5004_v63  ;;  %v5024_v26 = vld [vmem:[#allocation11 + $0xd48] sm:$0xff]  ;;  %v5051_v51 = vld [vmem:[#allocation11 + $0xe20] sm:$0xff] }
 0x445   :  { %10664 = vtanh.f32 %v10412_v14  ;;  %v10418_v30 = vadd.f32 %v4572_v27, %v1318_v8  ;;  %v10136_v15 = vcombine.high %v5007_v2, %v5011_v3  ;;  %v10138_v8 = vcombine.high %v5008_v4, %v5012_v6  ;;  %v5028_v5 = vld [vmem:[#allocation11 + $0xd68] sm:$0xff] }
 0x446   :  { %10666 = vtanh.f32 %v10416_v22  ;;  %v10135_v60 = vcombine.low %v5007_v2, %v5011_v3  ;;  %v10137_v14 = vcombine.low %v5008_v4, %v5012_v6  ;;  %v10144_v19 = vcombine.high %v5015_v10, %v5019_v11  ;;  %v5023_v22 = vld [vmem:[#allocation11 + $0xd40] sm:$0xff]  ;;  %v5048_v52 = vld [vmem:[#allocation11 + $0xe08] sm:$0xff] }
 0x447   :  { %10668 = vtanh.f32 %v10413_v24  ;;  %v10146_v20 = vcombine.high %v5016_v12, %v5020_v47  ;;  %v5027_v24 = vld [vmem:[#allocation11 + $0xd60] sm:$0xff]  ;;  %v10145_v27 = vcombine.low %v5016_v12, %v5020_v47  ;;  %v10168_v46 = vcombine.high %v5039_v40, %v5043_v41  ;;  %v5052_v63 = vld [vmem:[#allocation11 + $0xe28] sm:$0xff] }
 0x448   :  { %10670 = vtanh.f32 %v10417_v17  ;;  %v10143_v17 = vcombine.low %v5015_v10, %v5019_v11  ;;  %v5055_v2 = vld [vmem:[#allocation11 + $0xe40] sm:$0xff]  ;;  %v5056_v4 = vld [vmem:[#allocation11 + $0xe48] sm:$0xff] }
 0x449   :  { %10672 = vtanh.f32 %v10414_v29  ;;  %v10152_v29 = vcombine.high %v5023_v22, %v5027_v24  ;;  %v5059_v3 = vld [vmem:[#allocation11 + $0xe60] sm:$0xff]  ;;  %v5060_v6 = vld [vmem:[#allocation11 + $0xe68] sm:$0xff] }
 0x44a   :  { %10674 = vtanh.f32 %v10418_v30  ;;  %v10154_v30 = vcombine.high %v5024_v26, %v5028_v5  ;;  %v5063_v10 = vld [vmem:[#allocation11 + $0xe80] sm:$0xff]  ;;  %v5064_v12 = vld [vmem:[#allocation11 + $0xe88] sm:$0xff] }
 0x44b   :  { %v5067_v11 = vld [vmem:[#allocation11 + $0xea0] sm:$0xff]  ;;  %v5068_v47 = vld [vmem:[#allocation11 + $0xea8] sm:$0xff] }
 0x44d   :  { %v10661_v31 = vpop.eup %10660 }
 0x44e   :  { %v10663_v32 = vpop.eup %10662 }
 0x44f   :  { %v10665_v33 = vpop.eup %10664 }
 0x450   :  { %v10667_v34 = vpop.eup %10666 }
 0x451   :  { %v10669_v35 = vpop.eup %10668 }
 0x452   :  { %v10671_v36 = vpop.eup %10670  ;;  %v11290_v37 = vpack.c.bf16 %v10669_v35, %v10661_v31  ;;  %v5031_v31 = vld [vmem:[#allocation11 + $0xd80] sm:$0xff]  ;;  %v10151_v35 = vcombine.low %v5023_v22, %v5027_v24 }
 0x453   :  { %v10673_v39 = vpop.eup %10672  ;;  %v11292_v7 = vpack.c.bf16 %v10671_v36, %v10663_v32  ;;  %v5035_v32 = vld [vmem:[#allocation11 + $0xda0] sm:$0xff]  ;;  %v10153_v36 = vcombine.low %v5024_v26, %v5028_v5  ;;  %v5072_v26 = vld [vmem:[#allocation11 + $0xec8] sm:$0xff] }
 0x454   :  { %v10675_v43 = vpop.eup %10674  ;;  %v11294_v1 = vpack.c.bf16 %v10673_v39, %v10665_v33  ;;  %v5032_v33 = vld [vmem:[#allocation11 + $0xd88] sm:$0xff]  ;;  %v10160_v38 = vcombine.high %v5031_v31, %v5035_v32  ;;  %v5071_v22 = vld [vmem:[#allocation11 + $0xec0] sm:$0xff] }
 0x455   :  { %v11300_v0 = vpack.c.bf16 %v10675_v43, %v10667_v34  ;;  %v5036_v34 = vld [vmem:[#allocation11 + $0xda8] sm:$0xff]  ;;  %v5075_v24 = vld [vmem:[#allocation11 + $0xee0] sm:$0xff] }
 0x456   :  { %7831 = vmatprep.mubr.bf16.mxu0 %v11294_v1  ;;  %8003 = vmatprep.mubr.bf16.mxu1 %v11294_v1  ;;  %v10162_v39 = vcombine.high %v5032_v33, %v5036_v34  ;;  %v5044_v43 = vld [vmem:[#allocation11 + $0xde8] sm:$0xff] }
 0x457   :  { %7832 = vmatmul.mubr.bf16.vlgmr.msra.gmra.mrb[16].mxu0 %v11290_v37  ;;  %8004 = vmatmul.mubr.bf16.vlgmr.msra.gmra.mrb[16].mxu1 %v11290_v37  ;;  %v5076_v5 = vld [vmem:[#allocation11 + $0xee8] sm:$0xff] }
 0x458   :  { %7843 = vmatpush1.bf16.msra.mxu0 %v10111_v48  ;;  %8015 = vmatpush1.bf16.msra.mxu1 %v10113_v44  ;;  %v10159_v48 = vcombine.low %v5031_v31, %v5035_v32  ;;  %v10161_v44 = vcombine.low %v5032_v33, %v5036_v34  ;;  %v5079_v31 = vld [vmem:[#allocation11 + $0xf00] sm:$0xff]  ;;  %v5080_v33 = vld [vmem:[#allocation11 + $0xf08] sm:$0xff] }
 0x459   :  { %7874 = vmatprep.mubr.bf16.mxu0 %v11300_v0  ;;  %8046 = vmatprep.mubr.bf16.mxu1 %v11300_v0  ;;  %v5083_v32 = vld [vmem:[#allocation11 + $0xf20] sm:$0xff]  ;;  %v5084_v34 = vld [vmem:[#allocation11 + $0xf28] sm:$0xff] }
 0x45a   :  { %7844 = vmatprep.subr.bf16.mxu0 %v10120_v49  ;;  %8016 = vmatprep.subr.bf16.mxu1 %v10122_v50  ;;  %v10170_v49 = vcombine.high %v5040_v42, %v5044_v43  ;;  %v5047_v50 = vld [vmem:[#allocation11 + $0xe00] sm:$0xff] }
 0x45c   :  { %7845 = vmatpush1.bf16.msra.mxu0 %v10119_v54  ;;  %8017 = vmatpush1.bf16.msra.mxu1 %v10121_v58  ;;  %v10167_v54 = vcombine.low %v5039_v40, %v5043_v41  ;;  %v10169_v58 = vcombine.low %v5040_v42, %v5044_v43  ;;  %v5087_v40 = vld [vmem:[#allocation11 + $0xf40] sm:$0xff]  ;;  %v5088_v42 = vld [vmem:[#allocation11 + $0xf48] sm:$0xff] }
 0x45d   :  { %7846 = vmatprep.subr.bf16.mxu0 %v10128_v59  ;;  %8018 = vmatprep.subr.bf16.mxu1 %v10130_v62  ;;  %v10176_v59 = vcombine.high %v5047_v50, %v5051_v51  ;;  %v10178_v62 = vcombine.high %v5048_v52, %v5052_v63  ;;  %v5091_v41 = vld [vmem:[#allocation11 + $0xf60] sm:$0xff]  ;;  %v5092_v43 = vld [vmem:[#allocation11 + $0xf68] sm:$0xff] }
 0x460   :  { %7847 = vmatpush1.bf16.msra.mxu0 %v10127_v57  ;;  %8019 = vmatpush1.bf16.msra.mxu1 %v10129_v25  ;;  %v10175_v57 = vcombine.low %v5047_v50, %v5051_v51  ;;  %v10177_v25 = vcombine.low %v5048_v52, %v5052_v63  ;;  %v5095_v50 = vld [vmem:[#allocation11 + $0xf80] sm:$0xff]  ;;  %v5096_v52 = vld [vmem:[#allocation11 + $0xf88] sm:$0xff] }
 0x461   :  { %7848 = vmatprep.subr.bf16.mxu0 %v10136_v15  ;;  %8020 = vmatprep.subr.bf16.mxu1 %v10138_v8  ;;  %v10184_v15 = vcombine.high %v5055_v2, %v5059_v3  ;;  %v10186_v8 = vcombine.high %v5056_v4, %v5060_v6  ;;  %v5099_v51 = vld [vmem:[#allocation11 + $0xfa0] sm:$0xff]  ;;  %v5100_v63 = vld [vmem:[#allocation11 + $0xfa8] sm:$0xff] }
 0x464   :  { %7849 = vmatpush1.bf16.msra.mxu0 %v10135_v60  ;;  %8021 = vmatpush1.bf16.msra.mxu1 %v10137_v14  ;;  %v10183_v60 = vcombine.low %v5055_v2, %v5059_v3  ;;  %v10185_v14 = vcombine.low %v5056_v4, %v5060_v6  ;;  %v5103_v2 = vld [vmem:[#allocation11 + $0xfc0] sm:$0xff]  ;;  %v5104_v4 = vld [vmem:[#allocation11 + $0xfc8] sm:$0xff] }
 0x465   :  { %7850 = vmatprep.subr.bf16.mxu0 %v10144_v19  ;;  %8022 = vmatprep.subr.bf16.mxu1 %v10146_v20  ;;  %v10192_v19 = vcombine.high %v5063_v10, %v5067_v11  ;;  %v10194_v20 = vcombine.high %v5064_v12, %v5068_v47  ;;  %v5107_v3 = vld [vmem:[#allocation11 + $0xfe0] sm:$0xff]  ;;  %v5108_v6 = vld [vmem:[#allocation11 + $0xfe8] sm:$0xff] }
 0x468   :  { %7851 = vmatpush1.bf16.msra.mxu0 %v10143_v17  ;;  %8023 = vmatpush1.bf16.msra.mxu1 %v10145_v27  ;;  %v10191_v17 = vcombine.low %v5063_v10, %v5067_v11  ;;  %v10193_v27 = vcombine.low %v5064_v12, %v5068_v47  ;;  %v4601_v10 = vld [vmem:[#allocation11 + $0x10] sm:$0xff]  ;;  %v4602_v12 = vld [vmem:[#allocation11 + $0x18] sm:$0xff] }
 0x469   :  { %7852 = vmatprep.subr.bf16.mxu0 %v10152_v29  ;;  %8024 = vmatprep.subr.bf16.mxu1 %v10154_v30  ;;  %v10200_v29 = vcombine.high %v5071_v22, %v5075_v24  ;;  %v10202_v30 = vcombine.high %v5072_v26, %v5076_v5  ;;  %v4605_v11 = vld [vmem:[#allocation11 + $0x30] sm:$0xff]  ;;  %v4606_v47 = vld [vmem:[#allocation11 + $0x38] sm:$0xff] }
 0x46c   :  { %7853 = vmatpush1.bf16.msra.mxu0 %v10151_v35  ;;  %8025 = vmatpush1.bf16.msra.mxu1 %v10153_v36  ;;  %v10199_v35 = vcombine.low %v5071_v22, %v5075_v24  ;;  %v10201_v36 = vcombine.low %v5072_v26, %v5076_v5  ;;  %v4609_v22 = vld [vmem:[#allocation11 + $0x50] sm:$0xff]  ;;  %v4610_v26 = vld [vmem:[#allocation11 + $0x58] sm:$0xff] }
 0x46d   :  { %7854 = vmatprep.subr.bf16.mxu0 %v10160_v38  ;;  %8026 = vmatprep.subr.bf16.mxu1 %v10162_v39  ;;  %v10208_v38 = vcombine.high %v5079_v31, %v5083_v32  ;;  %v10210_v39 = vcombine.high %v5080_v33, %v5084_v34  ;;  %v4613_v24 = vld [vmem:[#allocation11 + $0x70] sm:$0xff]  ;;  %v4614_v5 = vld [vmem:[#allocation11 + $0x78] sm:$0xff] }
 0x470   :  { %7855 = vmatpush1.bf16.msra.mxu0 %v10159_v48  ;;  %8027 = vmatpush1.bf16.msra.mxu1 %v10161_v44  ;;  %v10207_v48 = vcombine.low %v5079_v31, %v5083_v32  ;;  %v10209_v44 = vcombine.low %v5080_v33, %v5084_v34  ;;  %v4617_v31 = vld [vmem:[#allocation11 + $0x90] sm:$0xff]  ;;  %v4618_v33 = vld [vmem:[#allocation11 + $0x98] sm:$0xff] }
 0x471   :  { %7856 = vmatprep.subr.bf16.mxu0 %v10168_v46  ;;  %8028 = vmatprep.subr.bf16.mxu1 %v10170_v49  ;;  %v10216_v46 = vcombine.high %v5087_v40, %v5091_v41  ;;  %v10218_v49 = vcombine.high %v5088_v42, %v5092_v43  ;;  %v4621_v32 = vld [vmem:[#allocation11 + $0xb0] sm:$0xff]  ;;  %v4622_v34 = vld [vmem:[#allocation11 + $0xb8] sm:$0xff] }
 0x474   :  { %7857 = vmatpush1.bf16.msra.mxu0 %v10167_v54  ;;  %8029 = vmatpush1.bf16.msra.mxu1 %v10169_v58  ;;  %v10215_v54 = vcombine.low %v5087_v40, %v5091_v41  ;;  %v10217_v58 = vcombine.low %v5088_v42, %v5092_v43  ;;  %v4625_v40 = vld [vmem:[#allocation11 + $0xd0] sm:$0xff]  ;;  %v4626_v42 = vld [vmem:[#allocation11 + $0xd8] sm:$0xff] }
 0x475   :  { %7858 = vmatprep.subr.bf16.mxu0 %v10176_v59  ;;  %8030 = vmatprep.subr.bf16.mxu1 %v10178_v62  ;;  %v10224_v59 = vcombine.high %v5095_v50, %v5099_v51  ;;  %v10226_v62 = vcombine.high %v5096_v52, %v5100_v63  ;;  %v4629_v41 = vld [vmem:[#allocation11 + $0xf0] sm:$0xff]  ;;  %v4630_v43 = vld [vmem:[#allocation11 + $0xf8] sm:$0xff] }
 0x478   :  { %7859 = vmatpush1.bf16.msra.mxu0 %v10175_v57  ;;  %8031 = vmatpush1.bf16.msra.mxu1 %v10177_v25  ;;  %v10223_v57 = vcombine.low %v5095_v50, %v5099_v51  ;;  %v10225_v25 = vcombine.low %v5096_v52, %v5100_v63  ;;  %v4633_v50 = vld [vmem:[#allocation11 + $0x110] sm:$0xff]  ;;  %v4638_v52 = vld [vmem:[#allocation11 + $0x138] sm:$0xff]  ;;  %v9755_v63 = vcombine.low %v4625_v40, %v4629_v41 }
 0x479   :  { %7860 = vmatprep.subr.bf16.mxu0 %v10184_v15  ;;  %8032 = vmatprep.subr.bf16.mxu1 %v10186_v8  ;;  %v10232_v15 = vcombine.high %v5103_v2, %v5107_v3  ;;  %v10234_v8 = vcombine.high %v5104_v4, %v5108_v6  ;;  %v4637_v51 = vld [vmem:[#allocation11 + $0x130] sm:$0xff] }
 0x47c   :  { %7861 = vmatpush1.bf16.msra.mxu0 %v10183_v60  ;;  %8033 = vmatpush1.bf16.msra.mxu1 %v10185_v14  ;;  %v10231_v60 = vcombine.low %v5103_v2, %v5107_v3  ;;  %v10233_v14 = vcombine.low %v5104_v4, %v5108_v6  ;;  %v4645_v2 = vld [vmem:[#allocation11 + $0x170] sm:$0xff]  ;;  %v4642_v3 = vld [vmem:[#allocation11 + $0x158] sm:$0xff]  ;;  %v9763_v6 = vcombine.low %v4633_v50, %v4637_v51 }
 0x47d   :  { %7862 = vmatprep.subr.bf16.mxu0 %v10192_v19  ;;  %8034 = vmatprep.subr.bf16.mxu1 %v10194_v20  ;;  %v9732_v19 = vcombine.high %v4601_v10, %v4605_v11  ;;  %v9734_v20 = vcombine.high %v4602_v12, %v4606_v47  ;;  %v4646_v4 = vld [vmem:[#allocation11 + $0x178] sm:$0xff] }
 0x480   :  { %7863 = vmatpush1.bf16.msra.mxu0 %v10191_v17  ;;  %8035 = vmatpush1.bf16.msra.mxu1 %v10193_v27  ;;  %v9731_v17 = vcombine.low %v4601_v10, %v4605_v11  ;;  %v9733_v27 = vcombine.low %v4602_v12, %v4606_v47  ;;  %v4653_v10 = vld [vmem:[#allocation11 + $0x1b0] sm:$0xff]  ;;  %v4650_v11 = vld [vmem:[#allocation11 + $0x198] sm:$0xff] }
 0x481   :  { %7864 = vmatprep.subr.bf16.mxu0 %v10200_v29  ;;  %8036 = vmatprep.subr.bf16.mxu1 %v10202_v30  ;;  %v9740_v29 = vcombine.high %v4609_v22, %v4613_v24  ;;  %v9742_v30 = vcombine.high %v4610_v26, %v4614_v5  ;;  %v4654_v12 = vld [vmem:[#allocation11 + $0x1b8] sm:$0xff] }
 0x484   :  { %7865 = vmatpush1.bf16.msra.mxu0 %v10199_v35  ;;  %8037 = vmatpush1.bf16.msra.mxu1 %v10201_v36  ;;  %v9739_v35 = vcombine.low %v4609_v22, %v4613_v24  ;;  %v9741_v36 = vcombine.low %v4610_v26, %v4614_v5  ;;  %v4661_v22 = vld [vmem:[#allocation11 + $0x1f0] sm:$0xff]  ;;  %v4658_v24 = vld [vmem:[#allocation11 + $0x1d8] sm:$0xff] }
 0x485   :  { %7866 = vmatprep.subr.bf16.mxu0 %v10208_v38  ;;  %8038 = vmatprep.subr.bf16.mxu1 %v10210_v39  ;;  %v9748_v38 = vcombine.high %v4617_v31, %v4621_v32  ;;  %v9750_v39 = vcombine.high %v4618_v33, %v4622_v34  ;;  %v4662_v26 = vld [vmem:[#allocation11 + $0x1f8] sm:$0xff] }
 0x488   :  { %7867 = vmatpush1.bf16.msra.mxu0 %v10207_v48  ;;  %8039 = vmatpush1.bf16.msra.mxu1 %v10209_v44  ;;  %v9747_v48 = vcombine.low %v4617_v31, %v4621_v32  ;;  %v9749_v44 = vcombine.low %v4618_v33, %v4622_v34  ;;  %v4669_v31 = vld [vmem:[#allocation11 + $0x230] sm:$0xff]  ;;  %v4666_v32 = vld [vmem:[#allocation11 + $0x218] sm:$0xff] }
 0x489   :  { %7868 = vmatprep.subr.bf16.mxu0 %v10216_v46  ;;  %8040 = vmatprep.subr.bf16.mxu1 %v10218_v49  ;;  %v9756_v46 = vcombine.high %v4625_v40, %v4629_v41  ;;  %v9758_v49 = vcombine.high %v4626_v42, %v4630_v43  ;;  %v4670_v33 = vld [vmem:[#allocation11 + $0x238] sm:$0xff]  ;;  %v4677_v40 = vld [vmem:[#allocation11 + $0x270] sm:$0xff] }
 0x48a   :  { %v4674_v41 = vld [vmem:[#allocation11 + $0x258] sm:$0xff] }
 0x48c   :  { %7869 = vmatpush1.bf16.msra.mxu0 %v10215_v54  ;;  %8041 = vmatpush1.bf16.msra.mxu1 %v10217_v58  ;;  %v9757_v54 = vcombine.low %v4626_v42, %v4630_v43  ;;  %v9764_v58 = vcombine.high %v4633_v50, %v4637_v51  ;;  %v4678_v42 = vld [vmem:[#allocation11 + $0x278] sm:$0xff]  ;;  %v4685_v50 = vld [vmem:[#allocation11 + $0x2b0] sm:$0xff] }
 0x48d   :  { %7870 = vmatprep.subr.bf16.mxu0 %v10224_v59  ;;  %8042 = vmatprep.subr.bf16.mxu1 %v10226_v62  ;;  %v4641_v62 = vld [vmem:[#allocation11 + $0x150] sm:$0xff]  ;;  %v4682_v51 = vld [vmem:[#allocation11 + $0x298] sm:$0xff] }
 0x48e   :  { %v9771_v47 = vcombine.low %v4641_v62, %v4645_v2 }
 0x490   :  { %7871 = vmatpush1.bf16.msra.mxu0 %v10223_v57  ;;  %8043 = vmatpush1.bf16.msra.mxu1 %v10225_v25  ;;  %v9772_v25 = vcombine.high %v4641_v62, %v4645_v2  ;;  %v4693_v62 = vld [vmem:[#allocation11 + $0x2f0] sm:$0xff]  ;;  %v4690_v2 = vld [vmem:[#allocation11 + $0x2d8] sm:$0xff] }
 0x491   :  { %7872 = vmatprep.subr.bf16.mxu0 %v10232_v15  ;;  %8044 = vmatprep.subr.bf16.mxu1 %v10234_v8  ;;  %v9774_v15 = vcombine.high %v4642_v3, %v4646_v4  ;;  %v4649_v8 = vld [vmem:[#allocation11 + $0x190] sm:$0xff] }
 0x492   :  { %v9779_v5 = vcombine.low %v4649_v8, %v4653_v10 }
 0x494   :  { %7873 = vmatpush1.bf16.msra.mxu0 %v10231_v60  ;;  %8045 = vmatpush1.bf16.msra.mxu1 %v10233_v14  ;;  %v9773_v60 = vcombine.low %v4642_v3, %v4646_v4  ;;  %v9780_v14 = vcombine.high %v4649_v8, %v4653_v10  ;;  %v4694_v3 = vld [vmem:[#allocation11 + $0x2f8] sm:$0xff]  ;;  %v4701_v8 = vld [vmem:[#allocation11 + $0x330] sm:$0xff] }
 0x495   :  { %8057 = vmatprep.subr.bf16.mxu0 %v9732_v19  ;;  %8229 = vmatprep.subr.bf16.mxu1 %v9734_v20  ;;  %v9782_v19 = vcombine.high %v4650_v11, %v4654_v12  ;;  %v4657_v20 = vld [vmem:[#allocation11 + $0x1d0] sm:$0xff]  ;;  %v4698_v10 = vld [vmem:[#allocation11 + $0x318] sm:$0xff] }
 0x496   :  { %v9787_v34 = vcombine.low %v4657_v20, %v4661_v22 }
 0x497   :  { %7875 = vmatmul.mubr.bf16.vlgmr.msra.gmra.mrb[16].mxu0 %v11292_v7  ;;  %8047 = vmatmul.mubr.bf16.vlgmr.msra.gmra.mrb[16].mxu1 %v11292_v7 }
 0x498   :  { %8058 = vmatpush1.bf16.msra.mxu0 %v9731_v17  ;;  %8089 = vmatprep.mubr.bf16.mxu0 %v11260_v56  ;;  %v9781_v17 = vcombine.low %v4650_v11, %v4654_v12  ;;  %v4702_v11 = vld [vmem:[#allocation11 + $0x338] sm:$0xff] }
 0x499   :  { %8230 = vmatpush1.bf16.msra.mxu1 %v9733_v27  ;;  %8261 = vmatprep.mubr.bf16.mxu1 %v11260_v56  ;;  %v4634_v56 = vld [vmem:[#allocation11 + $0x118] sm:$0xff]  ;;  %v9788_v27 = vcombine.high %v4657_v20, %v4661_v22  ;;  %v4709_v20 = vld [vmem:[#allocation11 + $0x370] sm:$0xff] }
 0x49a   :  { %8059 = vmatprep.subr.bf16.mxu0 %v9740_v29  ;;  %8231 = vmatprep.subr.bf16.mxu1 %v9742_v30  ;;  %v9766_v59 = vcombine.high %v4634_v56, %v4638_v52  ;;  %v9765_v57 = vcombine.low %v4634_v56, %v4638_v52  ;;  %v9790_v29 = vcombine.high %v4658_v24, %v4662_v26  ;;  %v4665_v30 = vld [vmem:[#allocation11 + $0x210] sm:$0xff]  ;;  %v4686_v56 = vld [vmem:[#allocation11 + $0x2b8] sm:$0xff] }
 0x49b   :  { %v9795_v43 = vcombine.low %v4665_v30, %v4669_v31  ;;  %v4706_v22 = vld [vmem:[#allocation11 + $0x358] sm:$0xff] }
 0x49c   :  { %8060 = vmatpush1.bf16.msra.mxu0 %v9739_v35  ;;  %v9789_v35 = vcombine.low %v4658_v24, %v4662_v26  ;;  %v4710_v24 = vld [vmem:[#allocation11 + $0x378] sm:$0xff] }
 0x49d   :  { %8232 = vmatpush1.bf16.msra.mxu1 %v9741_v36  ;;  %8061 = vmatprep.subr.bf16.mxu0 %v9748_v38  ;;  %v9796_v36 = vcombine.high %v4665_v30, %v4669_v31  ;;  %v9798_v38 = vcombine.high %v4666_v32, %v4670_v33  ;;  %v4717_v30 = vld [vmem:[#allocation11 + $0x3b0] sm:$0xff]  ;;  %v4714_v31 = vld [vmem:[#allocation11 + $0x398] sm:$0xff] }
 0x49e   :  { %8233 = vmatprep.subr.bf16.mxu1 %v9750_v39  ;;  %v4673_v39 = vld [vmem:[#allocation11 + $0x250] sm:$0xff] }
 0x49f   :  { %v9803_v52 = vcombine.low %v4673_v39, %v4677_v40 }
 0x4a0   :  { %8062 = vmatpush1.bf16.msra.mxu0 %v9747_v48  ;;  %v9797_v48 = vcombine.low %v4666_v32, %v4670_v33  ;;  %v4718_v32 = vld [vmem:[#allocation11 + $0x3b8] sm:$0xff] }
 0x4a1   :  { %8234 = vmatpush1.bf16.msra.mxu1 %v9749_v44  ;;  %8063 = vmatprep.subr.bf16.mxu0 %v9756_v46  ;;  %v9804_v44 = vcombine.high %v4673_v39, %v4677_v40  ;;  %v9806_v46 = vcombine.high %v4674_v41, %v4678_v42  ;;  %v4725_v39 = vld [vmem:[#allocation11 + $0x3f0] sm:$0xff]  ;;  %v4722_v40 = vld [vmem:[#allocation11 + $0x3d8] sm:$0xff] }
 0x4a2   :  { %8235 = vmatprep.subr.bf16.mxu1 %v9758_v49  ;;  %v4681_v49 = vld [vmem:[#allocation11 + $0x290] sm:$0xff] }
 0x4a3   :  { %v9811_v4 = vcombine.low %v4681_v49, %v4685_v50 }
 0x4a4   :  { %8064 = vmatpush1.bf16.msra.mxu0 %v9755_v63  ;;  %v9805_v63 = vcombine.low %v4674_v41, %v4678_v42  ;;  %v4726_v41 = vld [vmem:[#allocation11 + $0x3f8] sm:$0xff] }
 0x4a5   :  { %8236 = vmatpush1.bf16.msra.mxu1 %v9757_v54  ;;  %8065 = vmatprep.subr.bf16.mxu0 %v9764_v58  ;;  %v9812_v54 = vcombine.high %v4681_v49, %v4685_v50  ;;  %v9814_v58 = vcombine.high %v4682_v51, %v4686_v56  ;;  %v4733_v49 = vld [vmem:[#allocation11 + $0x430] sm:$0xff]  ;;  %v4730_v50 = vld [vmem:[#allocation11 + $0x418] sm:$0xff] }
 0x4a6   :  { %8237 = vmatprep.subr.bf16.mxu1 %v9766_v59  ;;  %v4689_v59 = vld [vmem:[#allocation11 + $0x2d0] sm:$0xff] }
 0x4a7   :  { %v9819_v12 = vcombine.low %v4689_v59, %v4693_v62 }
 0x4a8   :  { %8066 = vmatpush1.bf16.msra.mxu0 %v9763_v6  ;;  %v9813_v6 = vcombine.low %v4682_v51, %v4686_v56  ;;  %v4734_v51 = vld [vmem:[#allocation11 + $0x438] sm:$0xff] }
 0x4a9   :  { %8238 = vmatpush1.bf16.msra.mxu1 %v9765_v57  ;;  %8067 = vmatprep.subr.bf16.mxu0 %v9772_v25  ;;  %v9820_v57 = vcombine.high %v4689_v59, %v4693_v62  ;;  %v9822_v25 = vcombine.high %v4690_v2, %v4694_v3  ;;  %v4741_v59 = vld [vmem:[#allocation11 + $0x470] sm:$0xff] }
 0x4aa   :  { %8239 = vmatprep.subr.bf16.mxu1 %v9774_v15  ;;  %v4697_v15 = vld [vmem:[#allocation11 + $0x310] sm:$0xff] }
 0x4ab   :  { %v9827_v26 = vcombine.low %v4697_v15, %v4701_v8 }
 0x4ac   :  { %8068 = vmatpush1.bf16.msra.mxu0 %v9771_v47  ;;  %v9821_v47 = vcombine.low %v4690_v2, %v4694_v3  ;;  %v4738_v2 = vld [vmem:[#allocation11 + $0x458] sm:$0xff] }
 0x4ad   :  { %8240 = vmatpush1.bf16.msra.mxu1 %v9773_v60  ;;  %8069 = vmatprep.subr.bf16.mxu0 %v9780_v14  ;;  %v9828_v60 = vcombine.high %v4697_v15, %v4701_v8  ;;  %v9830_v14 = vcombine.high %v4698_v10, %v4702_v11  ;;  %v4742_v3 = vld [vmem:[#allocation11 + $0x478] sm:$0xff] }
 0x4ae   :  { %8241 = vmatprep.subr.bf16.mxu1 %v9782_v19  ;;  %v4705_v19 = vld [vmem:[#allocation11 + $0x350] sm:$0xff]  ;;  %v9870_v15 = vcombine.high %v4738_v2, %v4742_v3  ;;  %v4746_v8 = vld [vmem:[#allocation11 + $0x498] sm:$0xff] }
 0x4af   :  { %v9835_v33 = vcombine.low %v4705_v19, %v4709_v20 }
 0x4b0   :  { %8070 = vmatpush1.bf16.msra.mxu0 %v9779_v5  ;;  %v9829_v5 = vcombine.low %v4698_v10, %v4702_v11  ;;  %v4750_v10 = vld [vmem:[#allocation11 + $0x4b8] sm:$0xff] }
 0x4b1   :  { %8242 = vmatpush1.bf16.msra.mxu1 %v9781_v17  ;;  %8071 = vmatprep.subr.bf16.mxu0 %v9788_v27  ;;  %v9836_v17 = vcombine.high %v4705_v19, %v4709_v20  ;;  %v9838_v27 = vcombine.high %v4706_v22, %v4710_v24  ;;  %v4757_v19 = vld [vmem:[#allocation11 + $0x4f0] sm:$0xff]  ;;  %v4754_v20 = vld [vmem:[#allocation11 + $0x4d8] sm:$0xff] }
 0x4b2   :  { %8243 = vmatprep.subr.bf16.mxu1 %v9790_v29  ;;  %v4713_v29 = vld [vmem:[#allocation11 + $0x390] sm:$0xff] }
 0x4b3   :  { %v9843_v42 = vcombine.low %v4713_v29, %v4717_v30 }
 0x4b4   :  { %8072 = vmatpush1.bf16.msra.mxu0 %v9787_v34  ;;  %v9837_v34 = vcombine.low %v4706_v22, %v4710_v24  ;;  %v4758_v22 = vld [vmem:[#allocation11 + $0x4f8] sm:$0xff] }
 0x4b5   :  { %8244 = vmatpush1.bf16.msra.mxu1 %v9789_v35  ;;  %8073 = vmatprep.subr.bf16.mxu0 %v9796_v36  ;;  %v9844_v35 = vcombine.high %v4713_v29, %v4717_v30  ;;  %v9846_v36 = vcombine.high %v4714_v31, %v4718_v32  ;;  %v4762_v29 = vld [vmem:[#allocation11 + $0x518] sm:$0xff] }
 0x4b6   :  { %8245 = vmatprep.subr.bf16.mxu1 %v9798_v38  ;;  %v4721_v38 = vld [vmem:[#allocation11 + $0x3d0] sm:$0xff]  ;;  %v4766_v30 = vld [vmem:[#allocation11 + $0x538] sm:$0xff] }
 0x4b7   :  { %v9851_v56 = vcombine.low %v4721_v38, %v4725_v39 }
 0x4b8   :  { %8074 = vmatpush1.bf16.msra.mxu0 %v9795_v43  ;;  %v9845_v43 = vcombine.low %v4714_v31, %v4718_v32  ;;  %v9885_v31 = vcombine.low %v4754_v20, %v4758_v22 }
 0x4b9   :  { %8246 = vmatpush1.bf16.msra.mxu1 %v9797_v48  ;;  %8075 = vmatprep.subr.bf16.mxu0 %v9804_v44  ;;  %v9852_v48 = vcombine.high %v4721_v38, %v4725_v39  ;;  %v9854_v44 = vcombine.high %v4722_v40, %v4726_v41  ;;  %v4774_v38 = vld [vmem:[#allocation11 + $0x578] sm:$0xff] }
 0x4ba   :  { %8247 = vmatprep.subr.bf16.mxu1 %v9806_v46  ;;  %v4729_v46 = vld [vmem:[#allocation11 + $0x410] sm:$0xff] }
 0x4bb   :  { %v9859_v62 = vcombine.low %v4729_v46, %v4733_v49 }
 0x4bc   :  { %8076 = vmatpush1.bf16.msra.mxu0 %v9803_v52  ;;  %v9853_v52 = vcombine.low %v4722_v40, %v4726_v41  ;;  %v9893_v40 = vcombine.low %v4762_v29, %v4766_v30 }
 0x4bd   :  { %8248 = vmatpush1.bf16.msra.mxu1 %v9805_v63  ;;  %8077 = vmatprep.subr.bf16.mxu0 %v9812_v54  ;;  %v9860_v63 = vcombine.high %v4729_v46, %v4733_v49  ;;  %v9862_v54 = vcombine.high %v4730_v50, %v4734_v51  ;;  %v4782_v46 = vld [vmem:[#allocation11 + $0x5b8] sm:$0xff] }
 0x4be   :  { %8249 = vmatprep.subr.bf16.mxu1 %v9814_v58  ;;  %v4737_v58 = vld [vmem:[#allocation11 + $0x450] sm:$0xff] }
 0x4bf   :  { %v9867_v11 = vcombine.low %v4737_v58, %v4741_v59 }
 0x4c0   :  { %8078 = vmatpush1.bf16.msra.mxu0 %v9811_v4  ;;  %v9861_v4 = vcombine.low %v4730_v50, %v4734_v51 }
 0x4c1   :  { %8250 = vmatpush1.bf16.msra.mxu1 %v9813_v6  ;;  %8079 = vmatprep.subr.bf16.mxu0 %v9820_v57  ;;  %v9868_v6 = vcombine.high %v4737_v58, %v4741_v59  ;;  %v4745_v57 = vld [vmem:[#allocation11 + $0x490] sm:$0xff]  ;;  %v4790_v58 = vld [vmem:[#allocation11 + $0x5f8] sm:$0xff] }
 0x4c2   :  { %8251 = vmatprep.subr.bf16.mxu1 %v9822_v25  ;;  %v4749_v25 = vld [vmem:[#allocation11 + $0x4b0] sm:$0xff] }
 0x4c3   :  { %v9875_v24 = vcombine.low %v4745_v57, %v4749_v25 }
 0x4c4   :  { %8080 = vmatpush1.bf16.msra.mxu0 %v9819_v12  ;;  %v9869_v12 = vcombine.low %v4738_v2, %v4742_v3 }
 0x4c5   :  { %8252 = vmatpush1.bf16.msra.mxu1 %v9821_v47  ;;  %8081 = vmatprep.subr.bf16.mxu0 %v9828_v60  ;;  %v9876_v47 = vcombine.high %v4745_v57, %v4749_v25  ;;  %v9878_v60 = vcombine.high %v4746_v8, %v4750_v10  ;;  %v4794_v57 = vld [vmem:[#allocation11 + $0x618] sm:$0xff] }
 0x4c6   :  { %8253 = vmatprep.subr.bf16.mxu1 %v9830_v14  ;;  %v4753_v14 = vld [vmem:[#allocation11 + $0x4d0] sm:$0xff]  ;;  %v4798_v25 = vld [vmem:[#allocation11 + $0x638] sm:$0xff] }
 0x4c8   :  { %8082 = vmatpush1.bf16.msra.mxu0 %v9827_v26  ;;  %v9884_v26 = vcombine.high %v4753_v14, %v4757_v19 }
 0x4c9   :  { %8254 = vmatpush1.bf16.msra.mxu1 %v9829_v5  ;;  %8083 = vmatprep.subr.bf16.mxu0 %v9836_v17  ;;  %v9886_v5 = vcombine.high %v4754_v20, %v4758_v22  ;;  %v4761_v17 = vld [vmem:[#allocation11 + $0x510] sm:$0xff]  ;;  %v9925_v20 = vcombine.low %v4794_v57, %v4798_v25 }
 0x4ca   :  { %8255 = vmatprep.subr.bf16.mxu1 %v9838_v27  ;;  %v4765_v27 = vld [vmem:[#allocation11 + $0x530] sm:$0xff] }
 0x4cb   :  { %v9892_v32 = vcombine.high %v4761_v17, %v4765_v27  ;;  %v9891_v39 = vcombine.low %v4761_v17, %v4765_v27  ;;  %v4814_v17 = vld [vmem:[#allocation11 + $0x6b8] sm:$0xff] }
 0x4cc   :  { %8084 = vmatpush1.bf16.msra.mxu0 %v9835_v33  ;;  %v9894_v33 = vcombine.high %v4762_v29, %v4766_v30 }
 0x4cd   :  { %8256 = vmatpush1.bf16.msra.mxu1 %v9837_v34  ;;  %8085 = vmatprep.subr.bf16.mxu0 %v9844_v35  ;;  %v4769_v34 = vld [vmem:[#allocation11 + $0x550] sm:$0xff] }
 0x4ce   :  { %8257 = vmatprep.subr.bf16.mxu1 %v9846_v36  ;;  %v4773_v35 = vld [vmem:[#allocation11 + $0x570] sm:$0xff]  ;;  %v4770_v36 = vld [vmem:[#allocation11 + $0x558] sm:$0xff] }
 0x4cf   :  { %v9900_v41 = vcombine.high %v4769_v34, %v4773_v35  ;;  %v9899_v49 = vcombine.low %v4769_v34, %v4773_v35  ;;  %v9901_v50 = vcombine.low %v4770_v36, %v4774_v38  ;;  %v4822_v34 = vld [vmem:[#allocation11 + $0x6f8] sm:$0xff] }
 0x4d0   :  { %8086 = vmatpush1.bf16.msra.mxu0 %v9843_v42  ;;  %v9902_v42 = vcombine.high %v4770_v36, %v4774_v38 }
 0x4d1   :  { %8258 = vmatpush1.bf16.msra.mxu1 %v9845_v43  ;;  %8087 = vmatprep.subr.bf16.mxu0 %v9852_v48  ;;  %v4777_v43 = vld [vmem:[#allocation11 + $0x590] sm:$0xff] }
 0x4d2   :  { %8259 = vmatprep.subr.bf16.mxu1 %v9854_v44  ;;  %v4781_v48 = vld [vmem:[#allocation11 + $0x5b0] sm:$0xff]  ;;  %v4778_v44 = vld [vmem:[#allocation11 + $0x598] sm:$0xff] }
 0x4d3   :  { %v9908_v51 = vcombine.high %v4777_v43, %v4781_v48  ;;  %v9907_v59 = vcombine.low %v4777_v43, %v4781_v48  ;;  %v4830_v43 = vld [vmem:[#allocation11 + $0x738] sm:$0xff] }
 0x4d4   :  { %8088 = vmatpush1.bf16.msra.mxu0 %v9851_v56  ;;  %v9910_v56 = vcombine.high %v4778_v44, %v4782_v46 }
 0x4d5   :  { %8260 = vmatpush1.bf16.msra.mxu1 %v9853_v52  ;;  %8100 = vmatprep.subr.bf16.mxu0 %v9860_v63  ;;  %v4785_v52 = vld [vmem:[#allocation11 + $0x5d0] sm:$0xff] }
 0x4d6   :  { %8272 = vmatprep.subr.bf16.mxu1 %v9862_v54  ;;  %v4789_v63 = vld [vmem:[#allocation11 + $0x5f0] sm:$0xff]  ;;  %v4786_v54 = vld [vmem:[#allocation11 + $0x5d8] sm:$0xff] }
 0x4d7   :  { %8090 = vmatmul.mubr.bf16.vlgmr.msra.gmra.mrb[20].mxu0 %v11256_v45  ;;  %v9916_v2 = vcombine.high %v4785_v52, %v4789_v63  ;;  %v9918_v3 = vcombine.high %v4786_v54, %v4790_v58 }
 0x4d8   :  { %8262 = vmatmul.mubr.bf16.vlgmr.msra.gmra.mrb[20].mxu1 %v11256_v45  ;;  %8101 = vmatpush1.bf16.msra.mxu0 %v9859_v62  ;;  %v9877_v45 = vcombine.low %v4746_v8, %v4750_v10  ;;  %v9909_v62 = vcombine.low %v4778_v44, %v4782_v46  ;;  %v9917_v8 = vcombine.low %v4786_v54, %v4790_v58 }
 0x4d9   :  { %8132 = vmatprep.mubr.bf16.mxu0 %v11262_v61  ;;  %8273 = vmatpush1.bf16.msra.mxu1 %v9861_v4  ;;  %v4793_v4 = vld [vmem:[#allocation11 + $0x610] sm:$0xff] }
 0x4da   :  { %8304 = vmatprep.mubr.bf16.mxu1 %v11262_v61  ;;  %8102 = vmatprep.subr.bf16.mxu0 %v9868_v6  ;;  %v9883_v61 = vcombine.low %v4753_v14, %v4757_v19  ;;  %v4797_v6 = vld [vmem:[#allocation11 + $0x630] sm:$0xff]  ;;  %v4806_v14 = vld [vmem:[#allocation11 + $0x678] sm:$0xff] }
 0x4db   :  { %8274 = vmatprep.subr.bf16.mxu1 %v9870_v15  ;;  %v9915_v15 = vcombine.low %v4785_v52, %v4789_v63  ;;  %v9924_v10 = vcombine.high %v4793_v4, %v4797_v6  ;;  %v9923_v19 = vcombine.low %v4793_v4, %v4797_v6  ;;  %v4838_v52 = vld [vmem:[#allocation11 + $0x778] sm:$0xff] }
 0x4dc   :  { %8103 = vmatpush1.bf16.msra.mxu0 %v9867_v11  ;;  %v9926_v11 = vcombine.high %v4794_v57, %v4798_v25  ;;  %v4846_v4 = vld [vmem:[#allocation11 + $0x7b8] sm:$0xff] }
 0x4dd   :  { %8275 = vmatpush1.bf16.msra.mxu1 %v9869_v12  ;;  %8104 = vmatprep.subr.bf16.mxu0 %v9876_v47  ;;  %v4801_v12 = vld [vmem:[#allocation11 + $0x650] sm:$0xff] }
 0x4de   :  { %8276 = vmatprep.subr.bf16.mxu1 %v9878_v60  ;;  %v4805_v47 = vld [vmem:[#allocation11 + $0x670] sm:$0xff]  ;;  %v4802_v60 = vld [vmem:[#allocation11 + $0x658] sm:$0xff] }
 0x4df   :  { %v9932_v22 = vcombine.high %v4801_v12, %v4805_v47  ;;  %v9931_v27 = vcombine.low %v4801_v12, %v4805_v47  ;;  %v9933_v29 = vcombine.low %v4802_v60, %v4806_v14  ;;  %v4854_v12 = vld [vmem:[#allocation11 + $0x7f8] sm:$0xff] }
 0x4e0   :  { %8105 = vmatpush1.bf16.msra.mxu0 %v9875_v24  ;;  %v9934_v24 = vcombine.high %v4802_v60, %v4806_v14 }
 0x4e1   :  { %8277 = vmatpush1.bf16.msra.mxu1 %v9877_v45  ;;  %8106 = vmatprep.subr.bf16.mxu0 %v9884_v26  ;;  %v4809_v45 = vld [vmem:[#allocation11 + $0x690] sm:$0xff] }
 0x4e2   :  { %8278 = vmatprep.subr.bf16.mxu1 %v9886_v5  ;;  %v4813_v26 = vld [vmem:[#allocation11 + $0x6b0] sm:$0xff]  ;;  %v4810_v5 = vld [vmem:[#allocation11 + $0x698] sm:$0xff] }
 0x4e3   :  { %v9940_v30 = vcombine.high %v4809_v45, %v4813_v26  ;;  %v9939_v35 = vcombine.low %v4809_v45, %v4813_v26  ;;  %v9941_v36 = vcombine.low %v4810_v5, %v4814_v17  ;;  %v4862_v45 = vld [vmem:[#allocation11 + $0x838] sm:$0xff] }
 0x4e4   :  { %8107 = vmatpush1.bf16.msra.mxu0 %v9883_v61  ;;  %v9942_v61 = vcombine.high %v4810_v5, %v4814_v17 }
 0x4e5   :  { %8279 = vmatpush1.bf16.msra.mxu1 %v9885_v31  ;;  %8108 = vmatprep.subr.bf16.mxu0 %v9892_v32  ;;  %v4817_v31 = vld [vmem:[#allocation11 + $0x6d0] sm:$0xff] }
 0x4e6   :  { %8280 = vmatprep.subr.bf16.mxu1 %v9894_v33  ;;  %v4821_v32 = vld [vmem:[#allocation11 + $0x6f0] sm:$0xff]  ;;  %v4818_v33 = vld [vmem:[#allocation11 + $0x6d8] sm:$0xff] }
 0x4e7   :  { %v9948_v38 = vcombine.high %v4817_v31, %v4821_v32  ;;  %v9947_v48 = vcombine.low %v4817_v31, %v4821_v32  ;;  %v9949_v44 = vcombine.low %v4818_v33, %v4822_v34  ;;  %v4866_v31 = vld [vmem:[#allocation11 + $0x858] sm:$0xff] }
 0x4e8   :  { %8109 = vmatpush1.bf16.msra.mxu0 %v9891_v39  ;;  %v9950_v39 = vcombine.high %v4818_v33, %v4822_v34  ;;  %v4870_v32 = vld [vmem:[#allocation11 + $0x878] sm:$0xff] }
 0x4e9   :  { %8281 = vmatpush1.bf16.msra.mxu1 %v9893_v40  ;;  %8110 = vmatprep.subr.bf16.mxu0 %v9900_v41  ;;  %v4825_v40 = vld [vmem:[#allocation11 + $0x710] sm:$0xff] }
 0x4ea   :  { %8282 = vmatprep.subr.bf16.mxu1 %v9902_v42  ;;  %v4829_v41 = vld [vmem:[#allocation11 + $0x730] sm:$0xff]  ;;  %v4826_v42 = vld [vmem:[#allocation11 + $0x718] sm:$0xff] }
 0x4eb   :  { %v9956_v46 = vcombine.high %v4825_v40, %v4829_v41  ;;  %v9955_v63 = vcombine.low %v4825_v40, %v4829_v41  ;;  %v9957_v54 = vcombine.low %v4826_v42, %v4830_v43  ;;  %v4878_v40 = vld [vmem:[#allocation11 + $0x8b8] sm:$0xff] }
 0x4ec   :  { %8111 = vmatpush1.bf16.msra.mxu0 %v9899_v49  ;;  %v9958_v49 = vcombine.high %v4826_v42, %v4830_v43  ;;  %v9997_v42 = vcombine.low %v4866_v31, %v4870_v32 }
 0x4ed   :  { %8283 = vmatpush1.bf16.msra.mxu1 %v9901_v50  ;;  %8112 = vmatprep.subr.bf16.mxu0 %v9908_v51  ;;  %v4833_v50 = vld [vmem:[#allocation11 + $0x750] sm:$0xff] }
 0x4ee   :  { %8284 = vmatprep.subr.bf16.mxu1 %v9910_v56  ;;  %v4837_v51 = vld [vmem:[#allocation11 + $0x770] sm:$0xff]  ;;  %v4834_v56 = vld [vmem:[#allocation11 + $0x758] sm:$0xff] }
 0x4ef   :  { %v9964_v58 = vcombine.high %v4833_v50, %v4837_v51  ;;  %v9963_v6 = vcombine.low %v4833_v50, %v4837_v51  ;;  %v9965_v57 = vcombine.low %v4834_v56, %v4838_v52  ;;  %v4886_v50 = vld [vmem:[#allocation11 + $0x8f8] sm:$0xff] }
 0x4f0   :  { %8113 = vmatpush1.bf16.msra.mxu0 %v9907_v59  ;;  %v9966_v59 = vcombine.high %v4834_v56, %v4838_v52 }
 0x4f1   :  { %8285 = vmatpush1.bf16.msra.mxu1 %v9909_v62  ;;  %8114 = vmatprep.subr.bf16.mxu0 %v9916_v2  ;;  %v4841_v62 = vld [vmem:[#allocation11 + $0x790] sm:$0xff] }
 0x4f2   :  { %8286 = vmatprep.subr.bf16.mxu1 %v9918_v3  ;;  %v4845_v2 = vld [vmem:[#allocation11 + $0x7b0] sm:$0xff]  ;;  %v4842_v3 = vld [vmem:[#allocation11 + $0x798] sm:$0xff] }
 0x4f3   :  { %v9972_v25 = vcombine.high %v4841_v62, %v4845_v2  ;;  %v9971_v47 = vcombine.low %v4841_v62, %v4845_v2  ;;  %v9973_v60 = vcombine.low %v4842_v3, %v4846_v4 }
 0x4f4   :  { %8115 = vmatpush1.bf16.msra.mxu0 %v9915_v15  ;;  %v9974_v15 = vcombine.high %v4842_v3, %v4846_v4  ;;  %v4897_v4 = vld [vmem:[#allocation11 + $0x950] sm:$0xff] }
 0x4f5   :  { %8287 = vmatpush1.bf16.msra.mxu1 %v9917_v8  ;;  %8116 = vmatprep.subr.bf16.mxu0 %v9924_v10  ;;  %v4849_v8 = vld [vmem:[#allocation11 + $0x7d0] sm:$0xff] }
 0x4f6   :  { %8288 = vmatprep.subr.bf16.mxu1 %v9926_v11  ;;  %v4853_v10 = vld [vmem:[#allocation11 + $0x7f0] sm:$0xff]  ;;  %v4850_v11 = vld [vmem:[#allocation11 + $0x7d8] sm:$0xff] }
 0x4f7   :  { %v9980_v14 = vcombine.high %v4849_v8, %v4853_v10  ;;  %v9979_v26 = vcombine.low %v4849_v8, %v4853_v10  ;;  %v9981_v5 = vcombine.low %v4850_v11, %v4854_v12 }
 0x4f8   :  { %8117 = vmatpush1.bf16.msra.mxu0 %v9923_v19  ;;  %v9982_v19 = vcombine.high %v4850_v11, %v4854_v12  ;;  %v4905_v12 = vld [vmem:[#allocation11 + $0x990] sm:$0xff] }
 0x4f9   :  { %8289 = vmatpush1.bf16.msra.mxu1 %v9925_v20  ;;  %8118 = vmatprep.subr.bf16.mxu0 %v9932_v22  ;;  %v4857_v20 = vld [vmem:[#allocation11 + $0x810] sm:$0xff] }
 0x4fa   :  { %8290 = vmatprep.subr.bf16.mxu1 %v9934_v24  ;;  %v4861_v22 = vld [vmem:[#allocation11 + $0x830] sm:$0xff]  ;;  %v4858_v24 = vld [vmem:[#allocation11 + $0x818] sm:$0xff] }
 0x4fb   :  { %v9988_v17 = vcombine.high %v4857_v20, %v4861_v22  ;;  %v9989_v33 = vcombine.low %v4858_v24, %v4862_v45 }
 0x4fc   :  { %8119 = vmatpush1.bf16.msra.mxu0 %v9931_v27  ;;  %v9990_v27 = vcombine.high %v4858_v24, %v4862_v45  ;;  %v4913_v45 = vld [vmem:[#allocation11 + $0x9d0] sm:$0xff] }
 0x4fd   :  { %8291 = vmatpush1.bf16.msra.mxu1 %v9933_v29  ;;  %8120 = vmatprep.subr.bf16.mxu0 %v9940_v30  ;;  %v4865_v29 = vld [vmem:[#allocation11 + $0x850] sm:$0xff] }
 0x4fe   :  { %8292 = vmatprep.subr.bf16.mxu1 %v9942_v61  ;;  %v4869_v30 = vld [vmem:[#allocation11 + $0x870] sm:$0xff]  ;;  %v9987_v61 = vcombine.low %v4857_v20, %v4861_v22 }
 0x4ff   :  { %v9996_v34 = vcombine.high %v4865_v29, %v4869_v30  ;;  %v9995_v41 = vcombine.low %v4865_v29, %v4869_v30 }
 0x500   :  { %8121 = vmatpush1.bf16.msra.mxu0 %v9939_v35  ;;  %v4873_v35 = vld [vmem:[#allocation11 + $0x890] sm:$0xff] }
 0x501   :  { %8293 = vmatpush1.bf16.msra.mxu1 %v9941_v36  ;;  %8122 = vmatprep.subr.bf16.mxu0 %v9948_v38  ;;  %v4877_v36 = vld [vmem:[#allocation11 + $0x8b0] sm:$0xff]  ;;  %v9998_v38 = vcombine.high %v4866_v31, %v4870_v32 }
 0x502   :  { %8294 = vmatprep.subr.bf16.mxu1 %v9950_v39  ;;  %v4874_v39 = vld [vmem:[#allocation11 + $0x898] sm:$0xff]  ;;  %v10004_v43 = vcombine.high %v4873_v35, %v4877_v36  ;;  %v10003_v51 = vcombine.low %v4873_v35, %v4877_v36  ;;  %v4921_v31 = vld [vmem:[#allocation11 + $0xa10] sm:$0xff] }
 0x503   :  { %v4925_v32 = vld [vmem:[#allocation11 + $0xa30] sm:$0xff] }
 0x504   :  { %8123 = vmatpush1.bf16.msra.mxu0 %v9947_v48  ;;  %v10006_v48 = vcombine.high %v4874_v39, %v4878_v40 }
 0x505   :  { %8295 = vmatpush1.bf16.msra.mxu1 %v9949_v44  ;;  %8124 = vmatprep.subr.bf16.mxu0 %v9956_v46  ;;  %v4881_v44 = vld [vmem:[#allocation11 + $0x8d0] sm:$0xff] }
 0x506   :  { %8296 = vmatprep.subr.bf16.mxu1 %v9958_v49  ;;  %v4885_v46 = vld [vmem:[#allocation11 + $0x8f0] sm:$0xff]  ;;  %v4882_v49 = vld [vmem:[#allocation11 + $0x8d8] sm:$0xff] }
 0x507   :  { %v10012_v56 = vcombine.high %v4881_v44, %v4885_v46  ;;  %v10014_v52 = vcombine.high %v4882_v49, %v4886_v50  ;;  %v10013_v62 = vcombine.low %v4882_v49, %v4886_v50  ;;  %v4937_v50 = vld [vmem:[#allocation11 + $0xa90] sm:$0xff] }
 0x508   :  { %8125 = vmatpush1.bf16.msra.mxu0 %v9955_v63  ;;  %v4889_v63 = vld [vmem:[#allocation11 + $0x910] sm:$0xff] }
 0x509   :  { %8297 = vmatpush1.bf16.msra.mxu1 %v9957_v54  ;;  %8126 = vmatprep.subr.bf16.mxu0 %v9964_v58  ;;  %v4893_v54 = vld [vmem:[#allocation11 + $0x930] sm:$0xff]  ;;  %v4890_v58 = vld [vmem:[#allocation11 + $0x918] sm:$0xff] }
 0x50a   :  { %8298 = vmatprep.subr.bf16.mxu1 %v9966_v59  ;;  %v4894_v59 = vld [vmem:[#allocation11 + $0x938] sm:$0xff]  ;;  %v10020_v2 = vcombine.high %v4889_v63, %v4893_v54 }
 0x50b   :  { %v10022_v3 = vcombine.high %v4890_v58, %v4894_v59  ;;  %v10021_v8 = vcombine.low %v4890_v58, %v4894_v59  ;;  %v4945_v59 = vld [vmem:[#allocation11 + $0xad0] sm:$0xff] }
 0x50c   :  { %8127 = vmatpush1.bf16.msra.mxu0 %v9963_v6  ;;  %v4901_v6 = vld [vmem:[#allocation11 + $0x970] sm:$0xff] }
 0x50d   :  { %8299 = vmatpush1.bf16.msra.mxu1 %v9965_v57  ;;  %8128 = vmatprep.subr.bf16.mxu0 %v9972_v25  ;;  %v4898_v57 = vld [vmem:[#allocation11 + $0x958] sm:$0xff]  ;;  %v10028_v10 = vcombine.high %v4897_v4, %v4901_v6 }
 0x50e   :  { %8300 = vmatprep.subr.bf16.mxu1 %v9974_v15  ;;  %v4902_v25 = vld [vmem:[#allocation11 + $0x978] sm:$0xff]  ;;  %v10019_v15 = vcombine.low %v4889_v63, %v4893_v54 }
 0x50f   :  { %v10030_v11 = vcombine.high %v4898_v57, %v4902_v25  ;;  %v10029_v20 = vcombine.low %v4898_v57, %v4902_v25  ;;  %v4953_v25 = vld [vmem:[#allocation11 + $0xb10] sm:$0xff] }
 0x510   :  { %8129 = vmatpush1.bf16.msra.mxu0 %v9971_v47  ;;  %v4909_v47 = vld [vmem:[#allocation11 + $0x9b0] sm:$0xff] }
 0x511   :  { %8301 = vmatpush1.bf16.msra.mxu1 %v9973_v60  ;;  %8130 = vmatprep.subr.bf16.mxu0 %v9980_v14  ;;  %v4906_v60 = vld [vmem:[#allocation11 + $0x998] sm:$0xff]  ;;  %v10036_v22 = vcombine.high %v4905_v12, %v4909_v47 }
 0x512   :  { %8302 = vmatprep.subr.bf16.mxu1 %v9982_v19  ;;  %v4910_v14 = vld [vmem:[#allocation11 + $0x9b8] sm:$0xff]  ;;  %v10027_v19 = vcombine.low %v4897_v4, %v4901_v6 }
 0x513   :  { %v10038_v24 = vcombine.high %v4906_v60, %v4910_v14  ;;  %v10037_v29 = vcombine.low %v4906_v60, %v4910_v14  ;;  %v4961_v14 = vld [vmem:[#allocation11 + $0xb50] sm:$0xff] }
 0x514   :  { %8131 = vmatpush1.bf16.msra.mxu0 %v9979_v26  ;;  %v4917_v26 = vld [vmem:[#allocation11 + $0x9f0] sm:$0xff] }
 0x515   :  { %8303 = vmatpush1.bf16.msra.mxu1 %v9981_v5  ;;  %8143 = vmatprep.subr.bf16.mxu0 %v9988_v17  ;;  %v4914_v5 = vld [vmem:[#allocation11 + $0x9d8] sm:$0xff]  ;;  %v10044_v30 = vcombine.high %v4913_v45, %v4917_v26  ;;  %v10043_v35 = vcombine.low %v4913_v45, %v4917_v26 }
 0x516   :  { %8315 = vmatprep.subr.bf16.mxu1 %v9990_v27  ;;  %v4918_v17 = vld [vmem:[#allocation11 + $0x9f8] sm:$0xff]  ;;  %v10035_v27 = vcombine.low %v4905_v12, %v4909_v47 }
 0x517   :  { %8133 = vmatmul.mubr.bf16.vlgmr.msra.gmra.mrb[20].mxu0 %v11258_v28  ;;  %v10045_v36 = vcombine.low %v4914_v5, %v4918_v17 }
 0x518   :  { %8305 = vmatmul.mubr.bf16.vlgmr.msra.gmra.mrb[20].mxu1 %v11258_v28  ;;  %8144 = vmatpush1.bf16.msra.mxu0 %v9987_v61  ;;  %v10005_v28 = vcombine.low %v4874_v39, %v4878_v40  ;;  %v10046_v61 = vcombine.high %v4914_v5, %v4918_v17  ;;  %v4929_v40 = vld [vmem:[#allocation11 + $0xa50] sm:$0xff] }
 0x519   :  { %8175 = vmatprep.mubr.bf16.mxu0 %v11294_v1  ;;  %8316 = vmatpush1.bf16.msra.mxu1 %v9989_v33  ;;  %v4922_v33 = vld [vmem:[#allocation11 + $0xa18] sm:$0xff]  ;;  %v4969_v17 = vld [vmem:[#allocation11 + $0xb90] sm:$0xff] }
 0x51a   :  { %8347 = vmatprep.mubr.bf16.mxu1 %v11294_v1  ;;  %8145 = vmatprep.subr.bf16.mxu0 %v9996_v34  ;;  %v10011_v1 = vcombine.low %v4881_v44, %v4885_v46  ;;  %v4926_v34 = vld [vmem:[#allocation11 + $0xa38] sm:$0xff] }
 0x51b   :  { %8317 = vmatprep.subr.bf16.mxu1 %v9998_v38  ;;  %v10052_v38 = vcombine.high %v4921_v31, %v4925_v32  ;;  %v10054_v39 = vcombine.high %v4922_v33, %v4926_v34  ;;  %v10053_v44 = vcombine.low %v4922_v33, %v4926_v34  ;;  %v4977_v34 = vld [vmem:[#allocation11 + $0xbd0] sm:$0xff] }
 0x51c   :  { %8146 = vmatpush1.bf16.msra.mxu0 %v9995_v41  ;;  %v4933_v41 = vld [vmem:[#allocation11 + $0xa70] sm:$0xff] }
 0x51d   :  { %8318 = vmatpush1.bf16.msra.mxu1 %v9997_v42  ;;  %8147 = vmatprep.subr.bf16.mxu0 %v10004_v43  ;;  %v4930_v42 = vld [vmem:[#allocation11 + $0xa58] sm:$0xff]  ;;  %v10060_v46 = vcombine.high %v4929_v40, %v4933_v41 }
 0x51e   :  { %8319 = vmatprep.subr.bf16.mxu1 %v10006_v48  ;;  %v4934_v43 = vld [vmem:[#allocation11 + $0xa78] sm:$0xff]  ;;  %v10051_v48 = vcombine.low %v4921_v31, %v4925_v32 }
 0x51f   :  { %v10062_v49 = vcombine.high %v4930_v42, %v4934_v43  ;;  %v10061_v63 = vcombine.low %v4930_v42, %v4934_v43  ;;  %v4985_v43 = vld [vmem:[#allocation11 + $0xc10] sm:$0xff] }
 0x520   :  { %8148 = vmatpush1.bf16.msra.mxu0 %v10003_v51  ;;  %v4941_v51 = vld [vmem:[#allocation11 + $0xab0] sm:$0xff] }
 0x521   :  { %8320 = vmatpush1.bf16.msra.mxu1 %v10005_v28  ;;  %8149 = vmatprep.subr.bf16.mxu0 %v10012_v56  ;;  %v4938_v28 = vld [vmem:[#allocation11 + $0xa98] sm:$0xff]  ;;  %v10068_v54 = vcombine.high %v4937_v50, %v4941_v51 }
 0x522   :  { %8321 = vmatprep.subr.bf16.mxu1 %v10014_v52  ;;  %v4942_v56 = vld [vmem:[#allocation11 + $0xab8] sm:$0xff]  ;;  %v10059_v52 = vcombine.low %v4929_v40, %v4933_v41 }
 0x523   :  { %v10070_v58 = vcombine.high %v4938_v28, %v4942_v56  ;;  %v10069_v4 = vcombine.low %v4938_v28, %v4942_v56  ;;  %v4993_v56 = vld [vmem:[#allocation11 + $0xc50] sm:$0xff] }
 0x524   :  { %8150 = vmatpush1.bf16.msra.mxu0 %v10011_v1  ;;  %v4949_v1 = vld [vmem:[#allocation11 + $0xaf0] sm:$0xff] }
 0x525   :  { %8322 = vmatpush1.bf16.msra.mxu1 %v10013_v62  ;;  %8151 = vmatprep.subr.bf16.mxu0 %v10020_v2  ;;  %v4946_v62 = vld [vmem:[#allocation11 + $0xad8] sm:$0xff]  ;;  %v10076_v6 = vcombine.high %v4945_v59, %v4949_v1 }
 0x526   :  { %8323 = vmatprep.subr.bf16.mxu1 %v10022_v3  ;;  %v4950_v2 = vld [vmem:[#allocation11 + $0xaf8] sm:$0xff]  ;;  %v10067_v3 = vcombine.low %v4937_v50, %v4941_v51 }
 0x527   :  { %v10078_v57 = vcombine.high %v4946_v62, %v4950_v2  ;;  %v10077_v12 = vcombine.low %v4946_v62, %v4950_v2  ;;  %v5001_v62 = vld [vmem:[#allocation11 + $0xc90] sm:$0xff] }
 0x528   :  { %8152 = vmatpush1.bf16.msra.mxu0 %v10019_v15  ;;  %v4957_v15 = vld [vmem:[#allocation11 + $0xb30] sm:$0xff] }
 0x529   :  { %8324 = vmatpush1.bf16.msra.mxu1 %v10021_v8  ;;  %8153 = vmatprep.subr.bf16.mxu0 %v10028_v10  ;;  %v4954_v8 = vld [vmem:[#allocation11 + $0xb18] sm:$0xff]  ;;  %v10084_v47 = vcombine.high %v4953_v25, %v4957_v15  ;;  %v5005_v2 = vld [vmem:[#allocation11 + $0xcb0] sm:$0xff] }
 0x52a   :  { %8325 = vmatprep.subr.bf16.mxu1 %v10030_v11  ;;  %v4958_v10 = vld [vmem:[#allocation11 + $0xb38] sm:$0xff]  ;;  %v10075_v11 = vcombine.low %v4945_v59, %v4949_v1 }
 0x52b   :  { %v10086_v60 = vcombine.high %v4954_v8, %v4958_v10  ;;  %v10085_v45 = vcombine.low %v4954_v8, %v4958_v10  ;;  %v5009_v10 = vld [vmem:[#allocation11 + $0xcd0] sm:$0xff] }
 0x52c   :  { %8154 = vmatpush1.bf16.msra.mxu0 %v10027_v19  ;;  %v4965_v19 = vld [vmem:[#allocation11 + $0xb70] sm:$0xff] }
 0x52d   :  { %8326 = vmatpush1.bf16.msra.mxu1 %v10029_v20  ;;  %8155 = vmatprep.subr.bf16.mxu0 %v10036_v22  ;;  %v4962_v20 = vld [vmem:[#allocation11 + $0xb58] sm:$0xff]  ;;  %v10092_v26 = vcombine.high %v4961_v14, %v4965_v19 }
 0x52e   :  { %8327 = vmatprep.subr.bf16.mxu1 %v10038_v24  ;;  %v4966_v22 = vld [vmem:[#allocation11 + $0xb78] sm:$0xff]  ;;  %v10083_v24 = vcombine.low %v4953_v25, %v4957_v15  ;;  %v10132_v15 = vcombine.high %v5001_v62, %v5005_v2 }
 0x52f   :  { %v10094_v5 = vcombine.high %v4962_v20, %v4966_v22  ;;  %v10093_v31 = vcombine.low %v4962_v20, %v4966_v22  ;;  %v5017_v20 = vld [vmem:[#allocation11 + $0xd10] sm:$0xff] }
 0x530   :  { %8156 = vmatpush1.bf16.msra.mxu0 %v10035_v27  ;;  %v4973_v27 = vld [vmem:[#allocation11 + $0xbb0] sm:$0xff] }
 0x531   :  { %8328 = vmatpush1.bf16.msra.mxu1 %v10037_v29  ;;  %8157 = vmatprep.subr.bf16.mxu0 %v10044_v30  ;;  %v4970_v29 = vld [vmem:[#allocation11 + $0xb98] sm:$0xff]  ;;  %v10100_v32 = vcombine.high %v4969_v17, %v4973_v27  ;;  %v5021_v22 = vld [vmem:[#allocation11 + $0xd30] sm:$0xff] }
 0x532   :  { %8329 = vmatprep.subr.bf16.mxu1 %v10046_v61  ;;  %v4974_v30 = vld [vmem:[#allocation11 + $0xbb8] sm:$0xff]  ;;  %v10091_v61 = vcombine.low %v4961_v14, %v4965_v19 }
 0x533   :  { %v10102_v33 = vcombine.high %v4970_v29, %v4974_v30  ;;  %v10101_v40 = vcombine.low %v4970_v29, %v4974_v30  ;;  %v5029_v29 = vld [vmem:[#allocation11 + $0xd70] sm:$0xff]  ;;  %v5026_v30 = vld [vmem:[#allocation11 + $0xd58] sm:$0xff] }
 0x534   :  { %8158 = vmatpush1.bf16.msra.mxu0 %v10043_v35  ;;  %v4981_v35 = vld [vmem:[#allocation11 + $0xbf0] sm:$0xff] }
 0x535   :  { %8330 = vmatpush1.bf16.msra.mxu1 %v10045_v36  ;;  %8159 = vmatprep.subr.bf16.mxu0 %v10052_v38  ;;  %v4978_v36 = vld [vmem:[#allocation11 + $0xbd8] sm:$0xff]  ;;  %v10108_v41 = vcombine.high %v4977_v34, %v4981_v35 }
 0x536   :  { %8331 = vmatprep.subr.bf16.mxu1 %v10054_v39  ;;  %v4982_v38 = vld [vmem:[#allocation11 + $0xbf8] sm:$0xff]  ;;  %v10099_v39 = vcombine.low %v4969_v17, %v4973_v27  ;;  %v5025_v27 = vld [vmem:[#allocation11 + $0xd50] sm:$0xff] }
 0x537   :  { %v10110_v42 = vcombine.high %v4978_v36, %v4982_v38  ;;  %v10109_v50 = vcombine.low %v4978_v36, %v4982_v38  ;;  %v5033_v36 = vld [vmem:[#allocation11 + $0xd90] sm:$0xff] }
 0x538   :  { %8160 = vmatpush1.bf16.msra.mxu0 %v10051_v48  ;;  %v4989_v48 = vld [vmem:[#allocation11 + $0xc30] sm:$0xff] }
 0x539   :  { %8332 = vmatpush1.bf16.msra.mxu1 %v10053_v44  ;;  %8161 = vmatprep.subr.bf16.mxu0 %v10060_v46  ;;  %v4986_v44 = vld [vmem:[#allocation11 + $0xc18] sm:$0xff]  ;;  %v10116_v51 = vcombine.high %v4985_v43, %v4989_v48  ;;  %v5037_v38 = vld [vmem:[#allocation11 + $0xdb0] sm:$0xff] }
 0x53a   :  { %8333 = vmatprep.subr.bf16.mxu1 %v10062_v49  ;;  %v4990_v46 = vld [vmem:[#allocation11 + $0xc38] sm:$0xff]  ;;  %v10107_v49 = vcombine.low %v4977_v34, %v4981_v35  ;;  %v10156_v34 = vcombine.high %v5025_v27, %v5029_v29 }
 0x53b   :  { %v10118_v28 = vcombine.high %v4986_v44, %v4990_v46  ;;  %v10117_v59 = vcombine.low %v4986_v44, %v4990_v46  ;;  %v10155_v44 = vcombine.low %v5025_v27, %v5029_v29 }
 0x53c   :  { %8162 = vmatpush1.bf16.msra.mxu0 %v10059_v52  ;;  %v4997_v52 = vld [vmem:[#allocation11 + $0xc70] sm:$0xff] }
 0x53d   :  { %8334 = vmatpush1.bf16.msra.mxu1 %v10061_v63  ;;  %8163 = vmatprep.subr.bf16.mxu0 %v10068_v54  ;;  %v10115_v63 = vcombine.low %v4985_v43, %v4989_v48  ;;  %v4994_v54 = vld [vmem:[#allocation11 + $0xc58] sm:$0xff]  ;;  %v10124_v1 = vcombine.high %v4993_v56, %v4997_v52 }
 0x53e   :  { %8335 = vmatprep.subr.bf16.mxu1 %v10070_v58  ;;  %v4998_v58 = vld [vmem:[#allocation11 + $0xc78] sm:$0xff] }
 0x53f   :  { %v10125_v25 = vcombine.low %v4994_v54, %v4998_v58 }
 0x540   :  { %8164 = vmatpush1.bf16.msra.mxu0 %v10067_v3  ;;  %v10126_v3 = vcombine.high %v4994_v54, %v4998_v58  ;;  %v5042_v58 = vld [vmem:[#allocation11 + $0xdd8] sm:$0xff] }
 0x541   :  { %8336 = vmatpush1.bf16.msra.mxu1 %v10069_v4  ;;  %8165 = vmatprep.subr.bf16.mxu0 %v10076_v6  ;;  %v5002_v4 = vld [vmem:[#allocation11 + $0xc98] sm:$0xff] }
 0x542   :  { %8337 = vmatprep.subr.bf16.mxu1 %v10078_v57  ;;  %v5006_v6 = vld [vmem:[#allocation11 + $0xcb8] sm:$0xff]  ;;  %v10123_v57 = vcombine.low %v4993_v56, %v4997_v52 }
 0x543   :  { %v10134_v8 = vcombine.high %v5002_v4, %v5006_v6 }
 0x544   :  { %8166 = vmatpush1.bf16.msra.mxu0 %v10075_v11  ;;  %v5013_v11 = vld [vmem:[#allocation11 + $0xcf0] sm:$0xff] }
 0x545   :  { %8338 = vmatpush1.bf16.msra.mxu1 %v10077_v12  ;;  %8167 = vmatprep.subr.bf16.mxu0 %v10084_v47  ;;  %v5010_v12 = vld [vmem:[#allocation11 + $0xcd8] sm:$0xff]  ;;  %v10140_v14 = vcombine.high %v5009_v10, %v5013_v11 }
 0x546   :  { %8339 = vmatprep.subr.bf16.mxu1 %v10086_v60  ;;  %v5014_v47 = vld [vmem:[#allocation11 + $0xcf8] sm:$0xff]  ;;  %v10131_v60 = vcombine.low %v5001_v62, %v5005_v2  ;;  %v10163_v2 = vcombine.low %v5033_v36, %v5037_v38 }
 0x547   :  { %v10142_v19 = vcombine.high %v5010_v12, %v5014_v47 }
 0x548   :  { %8168 = vmatpush1.bf16.msra.mxu0 %v10083_v24  ;;  %v5018_v24 = vld [vmem:[#allocation11 + $0xd18] sm:$0xff] }
 0x549   :  { %8340 = vmatpush1.bf16.msra.mxu1 %v10085_v45  ;;  %8169 = vmatprep.subr.bf16.mxu0 %v10092_v26  ;;  %v5022_v45 = vld [vmem:[#allocation11 + $0xd38] sm:$0xff]  ;;  %v10141_v26 = vcombine.low %v5010_v12, %v5014_v47 }
 0x54a   :  { %8341 = vmatprep.subr.bf16.mxu1 %v10094_v5  ;;  %v10148_v5 = vcombine.high %v5017_v20, %v5021_v22  ;;  %v10150_v17 = vcombine.high %v5018_v24, %v5022_v45  ;;  %v5050_v47 = vld [vmem:[#allocation11 + $0xe18] sm:$0xff] }
 0x54c   :  { %8170 = vmatpush1.bf16.msra.mxu0 %v10091_v61  ;;  %v5030_v61 = vld [vmem:[#allocation11 + $0xd78] sm:$0xff] }
 0x54d   :  { %8342 = vmatpush1.bf16.msra.mxu1 %v10093_v31  ;;  %8171 = vmatprep.subr.bf16.mxu0 %v10100_v32  ;;  %v10147_v31 = vcombine.low %v5017_v20, %v5021_v22  ;;  %v11324_v32 = vld [vmem:[#allocation13] sm:$0xff]  ;;  %v10158_v35 = vcombine.high %v5026_v30, %v5030_v61  ;;  %v10157_v46 = vcombine.low %v5026_v30, %v5030_v61  ;;  %v5065_v30 = vld [vmem:[#allocation11 + $0xe90] sm:$0xff] }
 0x54e   :  { %8343 = vmatprep.subr.bf16.mxu1 %v10102_v33  ;;  %v10149_v33 = vcombine.low %v5018_v24, %v5022_v45  ;;  %v5120_v43 = vrot.slane %v11324_v32, %v11170_v18  ;;  %v5128_v48 = vrot.slane %v11324_v32, %v11180_v23  ;;  %v5046_v18 = vld [vmem:[#allocation11 + $0xdf8] sm:$0xff]  ;;  %v5057_v24 = vld [vmem:[#allocation11 + $0xe50] sm:$0xff] }
 0x54f   :  { %v5061_v45 = vld [vmem:[#allocation11 + $0xe70] sm:$0xff] }
 0x550   :  { %8172 = vmatpush1.bf16.msra.mxu0 %v10099_v39  ;;  %v5116_v39 = vrot.slane %v11324_v32, %v11165_v16  ;;  %v10188_v27 = vcombine.high %v5057_v24, %v5061_v45  ;;  %v5069_v61 = vld [vmem:[#allocation11 + $0xeb0] sm:$0xff] }
 0x551   :  { %8344 = vmatpush1.bf16.msra.mxu1 %v10101_v40  ;;  %8173 = vmatprep.subr.bf16.mxu0 %v10108_v41  ;;  %v5124_v40 = vrot.slane %v11324_v32, %v11177_v21  ;;  %v5034_v41 = vld [vmem:[#allocation11 + $0xd98] sm:$0xff]  ;;  %v5045_v21 = vld [vmem:[#allocation11 + $0xdf0] sm:$0xff] }
 0x552   :  { %8345 = vmatprep.subr.bf16.mxu1 %v10110_v42  ;;  %v5038_v42 = vld [vmem:[#allocation11 + $0xdb8] sm:$0xff] }
 0x553   :  { %v10166_v16 = vcombine.high %v5034_v41, %v5038_v42 }
 0x554   :  { %8174 = vmatpush1.bf16.msra.mxu0 %v10107_v49  ;;  %v10164_v49 = vcombine.high %v5033_v36, %v5037_v38  ;;  %v10187_v36 = vcombine.low %v5057_v24, %v5061_v45 }
 0x555   :  { %8346 = vmatpush1.bf16.msra.mxu1 %v10109_v50  ;;  %8186 = vmatprep.subr.bf16.mxu0 %v10116_v51 }
 0x556   :  { %8358 = vmatprep.subr.bf16.mxu1 %v10118_v28  ;;  %v5041_v28 = vld [vmem:[#allocation11 + $0xdd0] sm:$0xff] }
 0x557   :  { %8176 = vmatmul.mubr.bf16.vlgmr.msra.gmra.mrb[20].mxu0 %v11290_v37 }
 0x558   :  { %8348 = vmatmul.mubr.bf16.vlgmr.msra.gmra.mrb[20].mxu1 %v11290_v37  ;;  %8187 = vmatpush1.bf16.msra.mxu0 %v10115_v63  ;;  %v10133_v37 = vcombine.low %v5002_v4, %v5006_v6 }
 0x559   :  { %8218 = vmatprep.mubr.bf16.mxu0 %v11300_v0  ;;  %8359 = vmatpush1.bf16.msra.mxu1 %v10117_v59 }
 0x55a   :  { %8390 = vmatprep.mubr.bf16.mxu1 %v11300_v0  ;;  %8188 = vmatprep.subr.bf16.mxu0 %v10124_v1  ;;  %v10139_v0 = vcombine.low %v5009_v10, %v5013_v11  ;;  %v5049_v10 = vld [vmem:[#allocation11 + $0xe10] sm:$0xff] }
 0x55b   :  { %8360 = vmatprep.subr.bf16.mxu1 %v10126_v3  ;;  %v5053_v11 = vld [vmem:[#allocation11 + $0xe30] sm:$0xff] }
 0x55c   :  { %8189 = vmatpush1.bf16.msra.mxu0 %v10123_v57  ;;  %v10165_v57 = vcombine.low %v5034_v41, %v5038_v42  ;;  %v10180_v20 = vcombine.high %v5049_v10, %v5053_v11 }
 0x55d   :  { %8361 = vmatpush1.bf16.msra.mxu1 %v10125_v25  ;;  %8190 = vmatprep.subr.bf16.mxu0 %v10132_v15  ;;  %v10172_v25 = vcombine.high %v5041_v28, %v5045_v21 }
 0x55e   :  { %8362 = vmatprep.subr.bf16.mxu1 %v10134_v8  ;;  %v10174_v8 = vcombine.high %v5042_v58, %v5046_v18 }
 0x560   :  { %8191 = vmatpush1.bf16.msra.mxu0 %v10131_v60  ;;  %v5054_v60 = vld [vmem:[#allocation11 + $0xe38] sm:$0xff] }
 0x561   :  { %8363 = vmatpush1.bf16.msra.mxu1 %v10133_v37  ;;  %8192 = vmatprep.subr.bf16.mxu0 %v10140_v14  ;;  %v10171_v14 = vcombine.low %v5041_v28, %v5045_v21  ;;  %v10182_v22 = vcombine.high %v5050_v47, %v5054_v60 }
 0x562   :  { %8364 = vmatprep.subr.bf16.mxu1 %v10142_v19  ;;  %v10173_v19 = vcombine.low %v5042_v58, %v5046_v18  ;;  %v5081_v58 = vld [vmem:[#allocation11 + $0xf10] sm:$0xff] }
 0x563   :  { %v5085_v18 = vld [vmem:[#allocation11 + $0xf30] sm:$0xff] }
 0x564   :  { %8193 = vmatpush1.bf16.msra.mxu0 %v10139_v0  ;;  %v5058_v0 = vld [vmem:[#allocation11 + $0xe58] sm:$0xff] }
 0x565   :  { %8365 = vmatpush1.bf16.msra.mxu1 %v10141_v26  ;;  %8194 = vmatprep.subr.bf16.mxu0 %v10148_v5  ;;  %v5062_v26 = vld [vmem:[#allocation11 + $0xe78] sm:$0xff]  ;;  %v10179_v5 = vcombine.low %v5049_v10, %v5053_v11  ;;  %v10211_v10 = vcombine.low %v5081_v58, %v5085_v18 }
 0x566   :  { %8366 = vmatprep.subr.bf16.mxu1 %v10150_v17  ;;  %v10181_v17 = vcombine.low %v5050_v47, %v5054_v60  ;;  %v10190_v29 = vcombine.high %v5058_v0, %v5062_v26  ;;  %v5097_v60 = vld [vmem:[#allocation11 + $0xf90] sm:$0xff] }
 0x568   :  { %8195 = vmatpush1.bf16.msra.mxu0 %v10147_v31 }
 0x569   :  { %8367 = vmatpush1.bf16.msra.mxu1 %v10149_v33  ;;  %8196 = vmatprep.subr.bf16.mxu0 %v10156_v34  ;;  %v5066_v33 = vld [vmem:[#allocation11 + $0xe98] sm:$0xff] }
 0x56a   :  { %v7876_v50 = vpop.f32.mrb[16].mxu0  ;;  %v8048_v51 = vpop.f32.mrb[16].mxu1  ;;  %8368 = vmatprep.subr.bf16.mxu1 %v10158_v35  ;;  %v5070_v34 = vld [vmem:[#allocation11 + $0xeb8] sm:$0xff] }
 0x56b   :  { %v10419_v56 = vadd.f32 %v7876_v50, %v5116_v39  ;;  %v10423_v52 = vadd.f32 %v8048_v51, %v5124_v40  ;;  %v7878_v63 = vpop.f32.mrb[17].mxu0  ;;  %v8050_v54 = vpop.f32.mrb[17].mxu1  ;;  %v10198_v42 = vcombine.high %v5066_v33, %v5070_v34  ;;  %v10195_v51 = vcombine.low %v5065_v30, %v5069_v61 }
 0x56c   :  { %v10420_v59 = vadd.f32 %v7878_v63, %v5120_v43  ;;  %v10424_v1 = vadd.f32 %v8050_v54, %v5128_v48  ;;  %v7880_v23 = vpop.f32.mrb[18].mxu0  ;;  %v8052_v62 = vpop.f32.mrb[18].mxu1  ;;  %8197 = vmatpush1.bf16.msra.mxu0 %v10155_v44  ;;  %v10197_v21 = vcombine.low %v5066_v33, %v5070_v34 }
 0x56d   :  { %10676 = vtanh.f32 %v10419_v56  ;;  %v10421_v3 = vadd.f32 %v7880_v23, %v5116_v39  ;;  %8369 = vmatpush1.bf16.msra.mxu1 %v10157_v46  ;;  %v7882_v4 = vpop.f32.mrb[19].mxu0  ;;  %v8054_v6 = vpop.f32.mrb[19].mxu1  ;;  %8198 = vmatprep.subr.bf16.mxu0 %v10164_v49  ;;  %v10425_v15 = vadd.f32 %v8052_v62, %v5124_v40  ;;  %v10189_v39 = vcombine.low %v5058_v0, %v5062_v26  ;;  %v5074_v46 = vld [vmem:[#allocation11 + $0xed8] sm:$0xff]  ;;  %v5105_v0 = vld [vmem:[#allocation11 + $0xfd0] sm:$0xff] }
 0x56e   :  { %10678 = vtanh.f32 %v10423_v52  ;;  %8370 = vmatprep.subr.bf16.mxu1 %v10166_v16  ;;  %v10422_v12 = vadd.f32 %v7882_v4, %v5120_v43  ;;  %v10426_v37 = vadd.f32 %v8054_v6, %v5128_v48  ;;  %v10196_v40 = vcombine.high %v5065_v30, %v5069_v61  ;;  %v5073_v43 = vld [vmem:[#allocation11 + $0xed0] sm:$0xff]  ;;  %v5078_v49 = vld [vmem:[#allocation11 + $0xef8] sm:$0xff] }
 0x56f   :  { %10680 = vtanh.f32 %v10420_v59  ;;  %v5077_v48 = vld [vmem:[#allocation11 + $0xef0] sm:$0xff]  ;;  %v10206_v54 = vcombine.high %v5074_v46, %v5078_v49  ;;  %v5086_v23 = vld [vmem:[#allocation11 + $0xf38] sm:$0xff]  ;;  %v10212_v4 = vcombine.high %v5081_v58, %v5085_v18  ;;  %v10561_v58 = vld [vmem:[#allocation14 + $0xd8] sm:$0xff]  }
 0x570   :  { %10682 = vtanh.f32 %v10424_v1  ;;  %8199 = vmatpush1.bf16.msra.mxu0 %v10163_v2  ;;  %v10204_v56 = vcombine.high %v5073_v43, %v5077_v48  ;;  %v5082_v1 = vld [vmem:[#allocation11 + $0xf18] sm:$0xff]  ;;  %v10203_v2 = vcombine.low %v5073_v43, %v5077_v48  ;;  %v5109_v26 = vld [vmem:[#allocation11 + $0xff0] sm:$0xff]  ;;  %v10564_v18 = vld [vmem:[#allocation14 + $0x60] sm:$0xff]  }
 0x571   :  { %10684 = vtanh.f32 %v10421_v3  ;;  %8371 = vmatpush1.bf16.msra.mxu1 %v10165_v57  ;;  %8200 = vmatprep.subr.bf16.mxu0 %v10172_v25  ;;  %v10205_v3 = vcombine.low %v5074_v46, %v5078_v49  ;;  %v10214_v6 = vcombine.high %v5082_v1, %v5086_v23  ;;  %v5089_v57 = vld [vmem:[#allocation11 + $0xf50] sm:$0xff]  ;;  %v10213_v11 = vcombine.low %v5082_v1, %v5086_v23 }
 0x572   :  { %10686 = vtanh.f32 %v10425_v15  ;;  %8372 = vmatprep.subr.bf16.mxu1 %v10174_v8  ;;  %v5093_v25 = vld [vmem:[#allocation11 + $0xf70] sm:$0xff]  ;;  %v5090_v15 = vld [vmem:[#allocation11 + $0xf58] sm:$0xff]  ;;  %v10236_v30 = vcombine.high %v5105_v0, %v5109_v26  ;;  %v10235_v33 = vcombine.low %v5105_v0, %v5109_v26  ;;  %v10598_v26 = vld [vmem:[#allocation14 + $0x120] sm:$0xff]  }
 0x573   :  { %10688 = vtanh.f32 %v10422_v12  ;;  %v5094_v8 = vld [vmem:[#allocation11 + $0xf78] sm:$0xff]  ;;  %v10220_v12 = vcombine.high %v5089_v57, %v5093_v25  ;;  %v10552_v43 = vld [vmem:[#allocation14 + $0x48] sm:$0xff]  }
 0x574   :  { %10690 = vtanh.f32 %v10426_v37  ;;  %8201 = vmatpush1.bf16.msra.mxu0 %v10171_v14  ;;  %v10222_v47 = vcombine.high %v5090_v15, %v5094_v8  ;;  %v5101_v37 = vld [vmem:[#allocation11 + $0xfb0] sm:$0xff]  ;;  %v5098_v14 = vld [vmem:[#allocation11 + $0xf98] sm:$0xff] }
 0x575   :  { %8373 = vmatpush1.bf16.msra.mxu1 %v10173_v19  ;;  %8202 = vmatprep.subr.bf16.mxu0 %v10180_v20  ;;  %v5102_v19 = vld [vmem:[#allocation11 + $0xfb8] sm:$0xff]  ;;  %v10219_v20 = vcombine.low %v5089_v57, %v5093_v25  ;;  %v10228_v24 = vcombine.high %v5097_v60, %v5101_v37  ;;  %v10553_v48 = vld [vmem:[#allocation14 + $0xc8] sm:$0xff]   ;;  %v10576_v25 = vld [vmem:[#allocation14 + $0x78] sm:$0xff]  }
 0x576   :  { %8374 = vmatprep.subr.bf16.mxu1 %v10182_v22  ;;  %v10221_v22 = vcombine.low %v5090_v15, %v5094_v8  ;;  %v10230_v45 = vcombine.high %v5098_v14, %v5102_v19  ;;  %v10554_v46 = vld [vmem:[#allocation14 + $0x8] sm:$0xff]   ;;  %v10575_v57 = vld [vmem:[#allocation14 + $0xb0] sm:$0xff]   ;;  %v10577_v15 = vld [vmem:[#allocation14 + $0xf8] sm:$0xff]  }
 0x577   :  { %v11334_v31 = vpop.eup %10676  ;;  %v10555_v49 = vld [vmem:[#allocation14 + $0x88] sm:$0xff]   ;;  %v10578_v8 = vld [vmem:[#allocation14 + $0x38] sm:$0xff]   ;;  %v10591_v0 = vld [vmem:[#allocation14 + $0x190] sm:$0xff]  }
 0x578   :  { %v11336_v35 = vpop.eup %10678  ;;  %8203 = vmatpush1.bf16.msra.mxu0 %v10179_v5  ;;  %v5106_v5 = vld [vmem:[#allocation11 + $0xfd8] sm:$0xff]  ;;  %v10568_v1 = vld [vmem:[#allocation14 + $0x68] sm:$0xff]  }
 0x579   :  { %v11338_v38 = vpop.eup %10680  ;;  %8375 = vmatpush1.bf16.msra.mxu1 %v10181_v17  ;;  %8204 = vmatprep.subr.bf16.mxu0 %v10188_v27  ;;  %v5110_v17 = vld [vmem:[#allocation11 + $0xff8] sm:$0xff]  ;;  %v10227_v27 = vcombine.low %v5097_v60, %v5101_v37  ;;  %v10569_v23 = vld [vmem:[#allocation14 + $0xe8] sm:$0xff]   ;;  %v10583_v60 = vld [vmem:[#allocation14 + $0x180] sm:$0xff]  }
 0x57a   :  { %v11340_v41 = vpop.eup %10682  ;;  %8376 = vmatprep.subr.bf16.mxu1 %v10190_v29  ;;  %v10229_v29 = vcombine.low %v5098_v14, %v5102_v19  ;;  %v10238_v61 = vcombine.high %v5106_v5, %v5110_v17  ;;  %v10237_v34 = vcombine.low %v5106_v5, %v5110_v17  ;;  %v10584_v37 = vld [vmem:[#allocation14 + $0x148] sm:$0xff]   ;;  %v10599_v5 = vld [vmem:[#allocation14 + $0x1a0] sm:$0xff]  }
 0x57b   :  { %v11342_v44 = vpop.eup %10684  ;;  %v10585_v14 = vld [vmem:[#allocation14 + $0x1c8] sm:$0xff]  }
 0x57c   :  { %v11344_v50 = vpop.eup %10686  ;;  %8205 = vmatpush1.bf16.msra.mxu0 %v10187_v36  ;;  %v8417_v16 = vpack.c.bf16 %v11342_v44, %v11334_v31  ;;  %v10548_v36 = vld [vmem:[#allocation14 + $0x40] sm:$0xff]   ;;  %v10586_v19 = vld [vmem:[#allocation14 + $0x108] sm:$0xff]   ;;  %v10592_v31 = vld [vmem:[#allocation14 + $0x158] sm:$0xff]  }
 0x57d   :  { %v11348_v28 = vpop.eup %10688  ;;  %8377 = vmatpush1.bf16.msra.mxu1 %v10189_v39  ;;  %8206 = vmatprep.subr.bf16.mxu0 %v10196_v40  ;;  %v8419_v52 = vpack.c.bf16 %v11344_v50, %v11336_v35  ;;  %v10549_v39 = vld [vmem:[#allocation14 + $0xc0] sm:$0xff]   ;;  %v10593_v44 = vld [vmem:[#allocation14 + $0x1d8] sm:$0xff]   ;;  %v10600_v17 = vld [vmem:[#allocation14 + $0x168] sm:$0xff]  }
 0x57e   :  { %v11352_v63 = vpop.eup %10690  ;;  %8378 = vmatprep.subr.bf16.mxu1 %v10198_v42  ;;  %v8418_v59 = vpack.c.bf16 %v11348_v28, %v11338_v38  ;;  %v10550_v40 = vld [vmem:[#allocation14] sm:$0xff]   ;;  %v10562_v38 = vld [vmem:[#allocation14 + $0x18] sm:$0xff]  }
 0x57f   :  { %v8420_v62 = vpack.c.bf16 %v11352_v63, %v11340_v41  ;;  %v10551_v42 = vld [vmem:[#allocation14 + $0x80] sm:$0xff]   ;;  %v10563_v28 = vld [vmem:[#allocation14 + $0x98] sm:$0xff]  }
 0x580   :  { %8207 = vmatpush1.bf16.msra.mxu0 %v10195_v51  ;;  %v10556_v51 = vld [vmem:[#allocation14 + $0x50] sm:$0xff]   ;;  %v10565_v41 = vld [vmem:[#allocation14 + $0xe0] sm:$0xff]   ;;  %v10594_v35 = vld [vmem:[#allocation14 + $0x118] sm:$0xff]  }
 0x581   :  { %8379 = vmatpush1.bf16.msra.mxu1 %v10197_v21  ;;  %8208 = vmatprep.subr.bf16.mxu0 %v10204_v56  ;;  %v10557_v21 = vld [vmem:[#allocation14 + $0xd0] sm:$0xff]   ;;  %v10566_v63 = vld [vmem:[#allocation14 + $0x20] sm:$0xff]   ;;  %v10595_v50 = vld [vmem:[#allocation14 + $0x198] sm:$0xff]  }
 0x582   :  { %8380 = vmatprep.subr.bf16.mxu1 %v10206_v54  ;;  %v10558_v56 = vld [vmem:[#allocation14 + $0x10] sm:$0xff]   ;;  %v10560_v54 = vld [vmem:[#allocation14 + $0x58] sm:$0xff]  }
 0x584   :  { %8209 = vmatpush1.bf16.msra.mxu0 %v10203_v2  ;;  %v10571_v2 = vld [vmem:[#allocation14 + $0xa8] sm:$0xff]  }
 0x585   :  { %8381 = vmatpush1.bf16.msra.mxu1 %v10205_v3  ;;  %8210 = vmatprep.subr.bf16.mxu0 %v10212_v4  ;;  %v10572_v3 = vld [vmem:[#allocation14 + $0x70] sm:$0xff]  }
 0x586   :  { %8382 = vmatprep.subr.bf16.mxu1 %v10214_v6  ;;  %v10573_v4 = vld [vmem:[#allocation14 + $0xf0] sm:$0xff]  }
 0x587   :  { %v10574_v6 = vld [vmem:[#allocation14 + $0x30] sm:$0xff]  }
 0x588   :  { %8211 = vmatpush1.bf16.msra.mxu0 %v10211_v10  ;;  %v10579_v10 = vld [vmem:[#allocation14 + $0xb8] sm:$0xff]  }
 0x589   :  { %8383 = vmatpush1.bf16.msra.mxu1 %v10213_v11  ;;  %8212 = vmatprep.subr.bf16.mxu0 %v10220_v12  ;;  %v10580_v11 = vld [vmem:[#allocation14 + $0x140] sm:$0xff]  }
 0x58a   :  { %8384 = vmatprep.subr.bf16.mxu1 %v10222_v47  ;;  %v10581_v12 = vld [vmem:[#allocation14 + $0x1c0] sm:$0xff]  }
 0x58b   :  { %v10582_v47 = vld [vmem:[#allocation14 + $0x100] sm:$0xff]  }
 0x58c   :  { %8213 = vmatpush1.bf16.msra.mxu0 %v10219_v20  ;;  %v10587_v20 = vld [vmem:[#allocation14 + $0x188] sm:$0xff]  }
 0x58d   :  { %8385 = vmatpush1.bf16.msra.mxu1 %v10221_v22  ;;  %8214 = vmatprep.subr.bf16.mxu0 %v10228_v24  ;;  %v10588_v22 = vld [vmem:[#allocation14 + $0x150] sm:$0xff]  }
 0x58e   :  { %8386 = vmatprep.subr.bf16.mxu1 %v10230_v45  ;;  %v10589_v24 = vld [vmem:[#allocation14 + $0x1d0] sm:$0xff]  }
 0x58f   :  { %v10590_v45 = vld [vmem:[#allocation14 + $0x110] sm:$0xff]  }
 0x590   :  { %8215 = vmatpush1.bf16.msra.mxu0 %v10227_v27  ;;  %v10601_v27 = vld [vmem:[#allocation14 + $0x1e8] sm:$0xff]  }
 0x591   :  { %8387 = vmatpush1.bf16.msra.mxu1 %v10229_v29  ;;  %8216 = vmatprep.subr.bf16.mxu0 %v10236_v30  ;;  %v10602_v29 = vld [vmem:[#allocation14 + $0x128] sm:$0xff]  }
 0x592   :  { %8388 = vmatprep.subr.bf16.mxu1 %v10238_v61  ;;  %v10603_v30 = vld [vmem:[#allocation14 + $0x1a8] sm:$0xff]   ;;  %v10604_v61 = vld [vmem:[#allocation14 + $0x170] sm:$0xff]  }
 0x594   :  { %8217 = vmatpush1.bf16.msra.mxu0 %v10235_v33  ;;  %v10605_v33 = vld [vmem:[#allocation14 + $0x1f0] sm:$0xff]  }
 0x595   :  { %8389 = vmatpush1.bf16.msra.mxu1 %v10237_v34  ;;  %10315 = vmatprep.subr.bf16.mxu0 %v10548_v36  ;;  %v10606_v34 = vld [vmem:[#allocation14 + $0x130] sm:$0xff]  }
 0x596   :  { %10337 = vmatprep.subr.bf16.mxu1 %v10549_v39  ;;  %v10607_v36 = vld [vmem:[#allocation14 + $0x1b0] sm:$0xff]   ;;  %v10608_v39 = vld [vmem:[#allocation14 + $0x178] sm:$0xff]  }
 0x597   :  { %8219 = vmatmul.mubr.bf16.vlgmr.msra.gmra.mrb[20].mxu0 %v11292_v7 }
 0x598   :  { %8391 = vmatmul.mubr.bf16.vlgmr.msra.gmra.mrb[20].mxu1 %v11292_v7  ;;  %10316 = vmatpush3.bf16.msra.mxu0 %v10550_v40  ;;  %v10559_v7 = vld [vmem:[#allocation14 + $0x90] sm:$0xff]   ;;  %v10609_v40 = vld [vmem:[#allocation14 + $0x1f8] sm:$0xff]  }
 0x599   :  { %8976 = vmatprep.mubr.bf16.mxu0 %v8418_v59  ;;  %10338 = vmatpush3.bf16.msra.mxu1 %v10551_v42  ;;  %v10567_v59 = vld [vmem:[#allocation14 + $0xa0] sm:$0xff]   ;;  %v10610_v42 = vld [vmem:[#allocation14 + $0x138] sm:$0xff]  }
 0x59a   :  { %9017 = vmatprep.mubr.bf16.mxu1 %v8420_v62  ;;  %10317 = vmatprep.subr.bf16.mxu0 %v10552_v43  ;;  %v10570_v62 = vld [vmem:[#allocation14 + $0x28] sm:$0xff]   ;;  %v10611_v43 = vld [vmem:[#allocation14 + $0x1b8] sm:$0xff]  }
 0x59b   :  { %10339 = vmatprep.subr.bf16.mxu1 %v10553_v48  ;;  %v5132_v48 = vrot.slane %v11324_v32, %v11199_v9 }
 0x59c   :  { %10318 = vmatpush3.bf16.msra.mxu0 %v10554_v46  ;;  %v5140_v46 = vrot.slane %v11324_v32, %v11215_v53 }
 0x59d   :  { %10340 = vmatpush3.bf16.msra.mxu1 %v10555_v49  ;;  %10319 = vmatprep.subr.bf16.mxu0 %v10556_v51  ;;  %v5136_v49 = vrot.slane %v11324_v32, %v11202_v13  ;;  %v5144_v51 = vrot.slane %v11324_v32, %v11218_v55 }
 0x59e   :  { %10341 = vmatprep.subr.bf16.mxu1 %v10557_v21 }
 0x5a0   :  { %10320 = vmatpush3.bf16.msra.mxu0 %v10558_v56 }
 0x5a1   :  { %10342 = vmatpush3.bf16.msra.mxu1 %v10559_v7  ;;  %10321 = vmatprep.subr.bf16.mxu0 %v10560_v54 }
 0x5a2   :  { %10343 = vmatprep.subr.bf16.mxu1 %v10561_v58 }
 0x5a4   :  { %10322 = vmatpush3.bf16.msra.mxu0 %v10562_v38 }
 0x5a5   :  { %10344 = vmatpush3.bf16.msra.mxu1 %v10563_v28  ;;  %10323 = vmatprep.subr.bf16.mxu0 %v10564_v18 }
 0x5a6   :  { %10345 = vmatprep.subr.bf16.mxu1 %v10565_v41 }
 0x5a8   :  { %10324 = vmatpush3.bf16.msra.mxu0 %v10566_v63 }
 0x5a9   :  { %10346 = vmatpush3.bf16.msra.mxu1 %v10567_v59  ;;  %10325 = vmatprep.subr.bf16.mxu0 %v10568_v1 }
 0x5aa   :  { %10347 = vmatprep.subr.bf16.mxu1 %v10569_v23 }
 0x5ac   :  { %10326 = vmatpush3.bf16.msra.mxu0 %v10570_v62 }
 0x5ad   :  { %10348 = vmatpush3.bf16.msra.mxu1 %v10571_v2  ;;  %10327 = vmatprep.subr.bf16.mxu0 %v10572_v3 }
 0x5ae   :  { %10349 = vmatprep.subr.bf16.mxu1 %v10573_v4 }
 0x5b0   :  { %10328 = vmatpush3.bf16.msra.mxu0 %v10574_v6 }
 0x5b1   :  { %10350 = vmatpush3.bf16.msra.mxu1 %v10575_v57  ;;  %10329 = vmatprep.subr.bf16.mxu0 %v10576_v25 }
 0x5b2   :  { %10351 = vmatprep.subr.bf16.mxu1 %v10577_v15 }
 0x5b4   :  { %10330 = vmatpush3.bf16.msra.mxu0 %v10578_v8 }
 0x5b5   :  { %10352 = vmatpush3.bf16.msra.mxu1 %v10579_v10  ;;  %10359 = vmatprep.subr.bf16.mxu0 %v10580_v11 }
 0x5b6   :  { %10381 = vmatprep.subr.bf16.mxu1 %v10581_v12 }
 0x5b7   :  { %8977 = vmatmul.mubr.bf16.vlgmr.msra.gmra.mrb[24].mxu0 %v8417_v16  ;;  %v10596_v16 = vld [vmem:[#allocation14 + $0x160] sm:$0xff]  }
 0x5b8   :  { %9018 = vmatmul.mubr.bf16.vlgmr.msra.gmra.mrb[24].mxu1 %v8419_v52  ;;  %10360 = vmatpush3.bf16.msra.mxu0 %v10582_v47  ;;  %v10597_v52 = vld [vmem:[#allocation14 + $0x1e0] sm:$0xff]  }
 0x5b9   :  { %10382 = vmatpush3.bf16.msra.mxu1 %v10583_v60  ;;  %10361 = vmatprep.subr.bf16.mxu0 %v10584_v37  ;;  %v10239_v47 = vld [vmem:[#allocation16] ss:$0 sm:$0xff] }
 0x5ba   :  { %10383 = vmatprep.subr.bf16.mxu1 %v10585_v14 }
 0x5bc   :  { %10362 = vmatpush3.bf16.msra.mxu0 %v10586_v19 }
 0x5bd   :  { %10384 = vmatpush3.bf16.msra.mxu1 %v10587_v20  ;;  %10363 = vmatprep.subr.bf16.mxu0 %v10588_v22 }
 0x5be   :  { %10385 = vmatprep.subr.bf16.mxu1 %v10589_v24 }
 0x5c0   :  { %10364 = vmatpush3.bf16.msra.mxu0 %v10590_v45 }
 0x5c1   :  { %10386 = vmatpush3.bf16.msra.mxu1 %v10591_v0  ;;  %10365 = vmatprep.subr.bf16.mxu0 %v10592_v31 }
 0x5c2   :  { %10387 = vmatprep.subr.bf16.mxu1 %v10593_v44 }
 0x5c4   :  { %10366 = vmatpush3.bf16.msra.mxu0 %v10594_v35 }
 0x5c5   :  { %10388 = vmatpush3.bf16.msra.mxu1 %v10595_v50  ;;  %10367 = vmatprep.subr.bf16.mxu0 %v10596_v16 }
 0x5c6   :  { %10389 = vmatprep.subr.bf16.mxu1 %v10597_v52 }
 0x5c8   :  { %10368 = vmatpush3.bf16.msra.mxu0 %v10598_v26 }
 0x5c9   :  { %10390 = vmatpush3.bf16.msra.mxu1 %v10599_v5  ;;  %10369 = vmatprep.subr.bf16.mxu0 %v10600_v17 }
 0x5ca   :  { %10391 = vmatprep.subr.bf16.mxu1 %v10601_v27 }
 0x5cc   :  { %10370 = vmatpush3.bf16.msra.mxu0 %v10602_v29 }
 0x5cd   :  { %10392 = vmatpush3.bf16.msra.mxu1 %v10603_v30  ;;  %10371 = vmatprep.subr.bf16.mxu0 %v10604_v61 }
 0x5ce   :  { %10393 = vmatprep.subr.bf16.mxu1 %v10605_v33 }
 0x5d0   :  { %10372 = vmatpush3.bf16.msra.mxu0 %v10606_v34 }
 0x5d1   :  { %10394 = vmatpush3.bf16.msra.mxu1 %v10607_v36  ;;  %10373 = vmatprep.subr.bf16.mxu0 %v10608_v39 }
 0x5d2   :  { %10395 = vmatprep.subr.bf16.mxu1 %v10609_v40 }
 0x5d4   :  { %10374 = vmatpush3.bf16.msra.mxu0 %v10610_v42 }
 0x5d5   :  { %10396 = vmatpush3.bf16.msra.mxu1 %v10611_v43 }
 0x66a   :  { %v8220_v21 = vpop.f32.mrb[20].mxu0 }
 0x66b   :  { %v10427_v56 = vadd.f32 %v8220_v21, %v5132_v48  ;;  %v8392_v7 = vpop.f32.mrb[20].mxu1  ;;  %v8222_v54 = vpop.f32.mrb[21].mxu0 }
 0x66c   :  { %v10431_v58 = vadd.f32 %v8392_v7, %v5140_v46  ;;  %v10428_v38 = vadd.f32 %v8222_v54, %v5136_v49  ;;  %v8394_v28 = vpop.f32.mrb[21].mxu1  ;;  %v8224_v18 = vpop.f32.mrb[22].mxu0 }
 0x66d   :  { %10692 = vtanh.f32 %v10427_v56  ;;  %v10432_v41 = vadd.f32 %v8394_v28, %v5144_v51  ;;  %v10429_v9 = vadd.f32 %v8224_v18, %v5132_v48  ;;  %v8396_v63 = vpop.f32.mrb[22].mxu1  ;;  %v8226_v59 = vpop.f32.mrb[23].mxu0 }
 0x66e   :  { %10694 = vtanh.f32 %v10431_v58  ;;  %v10433_v53 = vadd.f32 %v8396_v63, %v5140_v46  ;;  %v8398_v1 = vpop.f32.mrb[23].mxu1  ;;  %v10430_v13 = vadd.f32 %v8226_v59, %v5136_v49 }
 0x66f   :  { %10696 = vtanh.f32 %v10428_v38  ;;  %v10434_v55 = vadd.f32 %v8398_v1, %v5144_v51 }
 0x670   :  { %10698 = vtanh.f32 %v10432_v41 }
 0x671   :  { %10700 = vtanh.f32 %v10429_v9 }
 0x672   :  { %10702 = vtanh.f32 %v10433_v53 }
 0x673   :  { %10704 = vtanh.f32 %v10430_v13 }
 0x674   :  { %10706 = vtanh.f32 %v10434_v55 }
 0x677   :  { %v10693_v32 = vpop.eup %10692 }
 0x678   :  { %v10695_v23 = vpop.eup %10694 }
 0x679   :  { %v10697_v62 = vpop.eup %10696 }
 0x67a   :  { %v10699_v2 = vpop.eup %10698 }
 0x67b   :  { %v10701_v3 = vpop.eup %10700 }
 0x67c   :  { %v10703_v4 = vpop.eup %10702  ;;  %v8421_v6 = vpack.c.bf16 %v10701_v3, %v10693_v32 }
 0x67d   :  { %v10705_v57 = vpop.eup %10704  ;;  %v8423_v25 = vpack.c.bf16 %v10703_v4, %v10695_v23 }
 0x67e   :  { %v10707_v15 = vpop.eup %10706  ;;  %v8422_v8 = vpack.c.bf16 %v10705_v57, %v10697_v62 }
 0x67f   :  { %v8424_v10 = vpack.c.bf16 %v10707_v15, %v10699_v2 }
 0x680   :  { %9058 = vmatprep.mubr.bf16.mxu0 %v8422_v8 }
 0x681   :  { %9099 = vmatprep.mubr.bf16.mxu1 %v8424_v10  ;;  %9059 = vmatmul.mubr.bf16.vlgmr.msra.gmra.mrb[28].mxu0 %v8421_v6 }
 0x682   :  { %9100 = vmatmul.mubr.bf16.vlgmr.msra.gmra.mrb[28].mxu1 %v8423_v25 }
 0x68a   :  { %v10331_v11 = vpop.f32.mrb[24].mxu0 }
 0x68b   :  { %v10353_v12 = vpop.f32.mrb[24].mxu1  ;;  %v10332_v60 = vpop.f32.mrb[25].mxu0 }
 0x68c   :  { %v10333_v37 = vadd.f32 %v10332_v60, %v10331_v11  ;;  %v10354_v14 = vpop.f32.mrb[25].mxu1  ;;  %v10334_v19 = vpop.f32.mrb[26].mxu0 }
 0x68d   :  { %v10355_v20 = vadd.f32 %v10354_v14, %v10353_v12  ;;  %v10356_v22 = vpop.f32.mrb[26].mxu1  ;;  %v10335_v24 = vpop.f32.mrb[27].mxu0 }
 0x68e   :  { %v8979_v45 = vadd.f32 %v10333_v37, %v10239_v47  ;;  %v10336_v0 = vadd.f32 %v10335_v24, %v10334_v19  ;;  %v10357_v31 = vpop.f32.mrb[27].mxu1 }
 0x68f   :  { %v10358_v44 = vadd.f32 %v10357_v31, %v10356_v22 }
 0x690   :  { %v9020_v35 = vadd.f32 %v10355_v20, %v8979_v45  ;;  %v8982_v50 = vadd.f32 %v10336_v0, %v10239_v47 }
 0x692   :  { %v9023_v16 = vadd.f32 %v10358_v44, %v8982_v50 }
 0x754   :  { %v10375_v52 = vpop.f32.mrb[28].mxu0 }
 0x755   :  { %v10397_v26 = vpop.f32.mrb[28].mxu1  ;;  %v10376_v5 = vpop.f32.mrb[29].mxu0 }
 0x756   :  { %v10377_v17 = vadd.f32 %v10376_v5, %v10375_v52  ;;  %v10398_v27 = vpop.f32.mrb[29].mxu1  ;;  %v10378_v29 = vpop.f32.mrb[30].mxu0 }
 0x757   :  { %v10399_v30 = vadd.f32 %v10398_v27, %v10397_v26  ;;  %v10400_v61 = vpop.f32.mrb[30].mxu1  ;;  %v10379_v33 = vpop.f32.mrb[31].mxu0 }
 0x758   :  { %v9061_v34 = vadd.f32 %v10377_v17, %v9020_v35  ;;  %v10380_v36 = vadd.f32 %v10379_v33, %v10378_v29  ;;  %v10401_v39 = vpop.f32.mrb[31].mxu1 }
 0x759   :  { %v10402_v40 = vadd.f32 %v10401_v39, %v10400_v61 }
 0x75a   :  { %v9102_v42 = vadd.f32 %v10399_v30, %v9061_v34  ;;  %v9064_v43 = vadd.f32 %v10380_v36, %v9023_v16 }
 0x75c   :  { %v10304_v48 = vmul.f32 -1.442695, %v9102_v42  ;;  %v9105_v46 = vadd.f32 %v10402_v40, %v9064_v43 }
 0x75e   :  { %10708 = vpow2.f32 %v10304_v48  ;;  %v10305_v49 = vmul.f32 -1.442695, %v9105_v46 }
 0x760   :  { %10710 = vpow2.f32 %v10305_v49 }
 0x768   :  { %v10709_v51 = vpop.eup %10708 }
 0x769   :  { %v9114_v21 = vadd.f32 1.0, %v10709_v51 }
 0x76a   :  { %v10711_v56 = vpop.eup %10710 }
 0x76b   :  { %v9115_v7 = vadd.f32 1.0, %v10711_v56  ;;  %10712 = vrcp.f32 %v9114_v21 }
 0x76d   :  { %10714 = vrcp.f32 %v9115_v7 }
 0x775   :  { %v10713_v54 = vpop.eup %10712 }
 0x777   :  { %v10715_v58 = vpop.eup %10714 }
 0x778   :  { %v10313_v38 = vpack.c.bf16 %v10715_v58, %v10713_v54 }
 0x77a   :  { %10314 = vst [vmem:[#allocation17] sm:$0xff] %v10313_v38  }
 0x77b   :  { %10926 = shalt.err (!%p10923_p6)
}
 0x77c   :  { %s10927_s11 = scalar_lea.hbm %s11404_s9, 128 }
 0x77d   :  { %p10928_p7 = scmp.ne.s32.totalorder %s11404_s9, %s10927_s11  ;;  %p10931_p8 = scmp.lt.u32.totalorder %s10927_s11, %s11404_s9 }
 0x77f   :  { %p10933_p9 = pnand %p10931_p8, %p10928_p7 }
 0x781   :  { %10936 = shalt.err (!%p10933_p9)
}
 0x782   :  { %9141 = dma.vmem_to_hbm [thread:$0]  %s9136_s2, 128, %s11404_s9, [#allocation4], %s10955_s5, %s10955_s5, %s10956_s19  }
 0x783   :  { %10947 = dma.done.wait [#allocation4], 128  }
 0x784   :  { %10948 = vsyncadd [#allocation4], 4294967168 }
 0x785   :  { %9145 = vsyncpa [#allocation3], 1 }
 0x786   :  { %9146 = vsyncpa [#allocation6], 1 }
 0x787   :  { %9147 = vsyncpa [#allocation9], 1 }
 0x788   :  { %9148 = vsyncpa [#allocation12], 1 }
 0x789   :  { %9149 = vsyncpa [#allocation15], 1 }
 0x78a   :  { %9150 = vsyncpa [#allocation4], 1 }

</bundles_post_ra>
